<compile_context>
chip_gen: v5e
topology: v5e:2x2
jax: 0.10.0
libtpu: 0.0.40
codegen_flags: <defaults>
</compile_context>

<pallas_src>
import functools

import jax
import jax.numpy as jnp
from jax import lax
from jax.experimental import pallas as pl
from jax.experimental.pallas import tpu as pltpu


# ----------------------------------------------------------------------------
# Fused Pallas kernel: whole Discriminator forward, whole batch, one grid step
# ----------------------------------------------------------------------------
def _discriminator_kernel(x_ref, coord_ref, w1_ref, w2_ref, w3_ref, w4_ref,
                          c_ref, o_ref, *, H, W, n_img):
    L = x_ref.shape[1]                      # n_img * H * W (lane axis)
    hw = H * W

    ii = coord_ref[0:1, :]                  # (1, L) int32: row within image
    jj = coord_ref[1:2, :]                  # (1, L) int32: col within image
    ee = coord_ref[2:3, :] > 0              # (1, L) bool: even-row & even-col

    c1 = w1_ref.shape[1]
    c2 = w2_ref.shape[1]
    c3 = w3_ref.shape[1]
    c4 = w4_ref.shape[0]
    b1 = c_ref[0:c1, 0:1]
    b2 = c_ref[0:c2, 1:2]
    b3 = c_ref[0:c3, 2:3]
    b4 = c_ref[0:c4, 3:4]
    wo = c_ref[0:c4, 4:5]                   # final Linear weight as a column
    bo = c_ref[0:1, 5:6]                    # final Linear bias

    def shift_lanes(v, s):
        # y[:, p] = v[:, p + s]; wrap-around lanes are masked by the caller.
        if s == 0:
            return v
        return jnp.concatenate([v[:, s:], v[:, :s]], axis=1)

    def conv3x3(v, w_ref, dil):
        # v: (Cin, L) lane-dense activations, w_ref: (9, Cout, Cin) folded.
        acc = None
        for kh in range(3):
            for kw in range(3):
                di = (kh - 1) * dil
                dj = (kw - 1) * dil
                tap = shift_lanes(v, di * W + dj)
                ok = None
                if di < 0:
                    ok = ii >= -di
                if di > 0:
                    m = ii < (H - di)
                    ok = m if ok is None else ok & m
                if dj < 0:
                    m = jj >= -dj
                    ok = m if ok is None else ok & m
                if dj > 0:
                    m = jj < (W - dj)
                    ok = m if ok is None else ok & m
                if ok is not None:
                    tap = jnp.where(ok, tap, 0.0)
                z = jnp.dot(w_ref[kh * 3 + kw], tap,
                            preferred_element_type=jnp.float32)
                acc = z if acc is None else acc + z
        return acc

    x = x_ref[...]                                                   # (Cin, L)
    # ---- layer 1: Conv3x3(3->16) + folded BN + ReLU --------------------------
    h1 = jnp.maximum(conv3x3(x, w1_ref, 1) + b1, 0.0)                # (16, L)
    # ---- layer 2: Conv3x3(16->32, stride 2) + BN + ReLU ----------------------
    # Computed at full resolution; the even/even lanes are exactly the stride-2
    # outputs.  The remaining lanes are never read by later (dilated) layers.
    h2 = jnp.maximum(conv3x3(h1, w2_ref, 1) + b2, 0.0)               # (32, L)
    # ---- layer 3: Conv3x3(32->32) on the 8x8 grid == dilation-2 taps ---------
    h3 = jnp.maximum(conv3x3(h2, w3_ref, 2) + b3, 0.0)               # (32, L)
    # ---- layer 4: Conv1x1(32->32) + BN + ReLU (plain matmul) -----------------
    h4 = jnp.maximum(
        jnp.dot(w4_ref[...], h3, preferred_element_type=jnp.float32) + b4, 0.0)

    # ---- AdaptiveAvgPool2d((1,1)) over the valid 8x8 grid + Linear(32->1) ----
    h4m = jnp.where(ee, h4, 0.0)                                     # (32, L)
    pools = [jnp.sum(h4m[:, n * hw:(n + 1) * hw], axis=1, keepdims=True)
             for n in range(n_img)]
    pooled = pools[0] if n_img == 1 else jnp.concatenate(pools, axis=1)
    inv = 1.0 / float(((H + 1) // 2) * ((W + 1) // 2))
    out = jnp.sum(pooled * wo, axis=0, keepdims=True) * inv + bo     # (1, n_img)
    o_ref[...] = out


# ----------------------------------------------------------------------------
# One-time parameter preprocessing (hoisted out of the jitted forward)
# ----------------------------------------------------------------------------
def _fold_bn(block, eps=1e-5):
    s = block['gamma'] / jnp.sqrt(block['var'] + eps)               # (Cout,)
    w = block['w'] * s[:, None, None, None]                         # OIHW, folded
    b = (block['b'] - block['mean']) * s + block['beta']
    return w.astype(jnp.float32), b.astype(jnp.float32)


def prepare_params(params, eps=1e-5):
    fp = {}
    biases = []
    # 3x3 conv layers -> (9, Cout, Cin) with tap index t = kh*3 + kw
    for i, name in ((1, 'l1'), (2, 'l2'), (3, 'l3')):
        w, b = _fold_bn(params[name], eps)
        cout, cin, kh, kw = w.shape
        fp[f'w{i}'] = jnp.transpose(w, (2, 3, 0, 1)).reshape(kh * kw, cout, cin)
        biases.append(b)
    # 1x1 conv layer -> (Cout, Cin)
    w4, b4 = _fold_bn(params['l4'], eps)
    fp['w4'] = w4.reshape(w4.shape[0], w4.shape[1])
    biases.append(b4)

    # Pack biases, Linear weight and Linear bias into one small constant block.
    rows = max(max(b.shape[0] for b in biases), params['out_w'].shape[1], 8)
    cpack = jnp.zeros((rows, 8), jnp.float32)
    for col, b in enumerate(biases):                                 # cols 0..3
        cpack = cpack.at[:b.shape[0], col].set(b)
    cpack = cpack.at[:params['out_w'].shape[1], 4].set(
        params['out_w'][0].astype(jnp.float32))                      # col 4: wo
    cpack = cpack.at[0, 5].set(params['out_b'].astype(jnp.float32)[0])  # col 5
    fp['cpack'] = cpack
    return fp


# ----------------------------------------------------------------------------
# Forward wrapper
# ----------------------------------------------------------------------------
@jax.jit
def discriminator_forward(image_nchw, fp):
    x = image_nchw.astype(jnp.float32)
    N, C, H, W = x.shape
    L = N * H * W
    # Lane-dense kernel input: (C, N*H*W) with the spatial/batch axis on lanes.
    x2d = jnp.transpose(x, (1, 0, 2, 3)).reshape(C, L)

    # Precomputed per-lane coordinates (constant-folded by XLA): row, col and
    # the even/even (stride-2 grid) indicator.
    hw = H * W
    q = jnp.arange(L, dtype=jnp.int32) % hw
    ii = q // W
    jj = q % W
    ee = ((ii % 2 == 0) & (jj % 2 == 0)).astype(jnp.int32)
    coord = jnp.stack([ii, jj, ee], axis=0)                          # (3, L)

    kernel = functools.partial(_discriminator_kernel, H=H, W=W, n_img=N)

    def full(shape):
        nd = len(shape)
        return pl.BlockSpec(tuple(shape), lambda b, _nd=nd: (0,) * _nd)

    out = pl.pallas_call(
        kernel,
        out_shape=jax.ShapeDtypeStruct((1, N), jnp.float32),
        grid=(1,),
        in_specs=[
            full((C, L)),                 # x
            full((3, L)),                 # coords
            full(fp['w1'].shape), full(fp['w2'].shape),
            full(fp['w3'].shape), full(fp['w4'].shape),
            full(fp['cpack'].shape),      # packed biases / Linear
        ],
        out_specs=full((1, N)),
        compiler_params=pltpu.CompilerParams(
            dimension_semantics=("arbitrary",)),
    )(x2d, coord, fp['w1'], fp['w2'], fp['w3'], fp['w4'], fp['cpack'])
    return out.reshape(N, 1)


# ----------------------------------------------------------------------------
# Deterministic parameter init (shapes per the PyTorch __init__)
# ----------------------------------------------------------------------------
def init_params(key):
    def conv_block(k, cin, cout, ksize):
        ks = jax.random.split(k, 6)
        return dict(
            w=jax.random.normal(ks[0], (cout, cin, ksize, ksize), jnp.float32) * 0.1,
            b=jax.random.normal(ks[1], (cout,), jnp.float32) * 0.1,
            gamma=jax.random.uniform(ks[2], (cout,), jnp.float32, 0.5, 1.5),
            beta=jax.random.normal(ks[3], (cout,), jnp.float32) * 0.1,
            mean=jax.random.normal(ks[4], (cout,), jnp.float32) * 0.1,
            var=jax.random.uniform(ks[5], (cout,), jnp.float32, 0.5, 1.5),
        )

    k1, k2, k3, k4, k5 = jax.random.split(key, 5)
    ko1, ko2 = jax.random.split(k5)
    return dict(
        l1=conv_block(k1, 3, 16, 3),
        l2=conv_block(k2, 16, 32, 3),
        l3=conv_block(k3, 32, 32, 3),
        l4=conv_block(k4, 32, 32, 1),
        out_w=jax.random.normal(ko1, (1, 32), jnp.float32) * 0.1,  # Linear (out,in)
        out_b=jax.random.normal(ko2, (1,), jnp.float32) * 0.1,
    )


# ----------------------------------------------------------------------------
# Pure-JAX reference (correctness check)
# ----------------------------------------------------------------------------
def reference_forward(image_nchw, params, eps=1e-5):
    x = jnp.transpose(image_nchw, (0, 2, 3, 1)).astype(jnp.float32)

    def block(x, p, stride, pad):
        s = p['gamma'] / jnp.sqrt(p['var'] + eps)
        w = jnp.transpose(p['w'], (2, 3, 1, 0)) * s                  # HWIO, folded
        b = (p['b'] - p['mean']) * s + p['beta']
        y = lax.conv_general_dilated(
            x, w, (stride, stride), ((pad, pad), (pad, pad)),
            dimension_numbers=('NHWC', 'HWIO', 'NHWC'))
        return jnp.maximum(y + b, 0.0)

    x = block(x, params['l1'], 1, 1)
    x = block(x, params['l2'], 2, 1)
    x = block(x, params['l3'], 1, 1)
    x = block(x, params['l4'], 1, 0)
    pooled = jnp.mean(x, axis=(1, 2))
    return pooled @ params['out_w'].T + params['out_b']


if __name__ == "__main__":
    key = jax.random.PRNGKey(0)
    pkey, xkey = jax.random.split(key)
    params = init_params(pkey)
    folded = prepare_params(params)          # one-time BN folding, outside the jit

    # PyTorch-convention input: (N, C, H, W) = (2, 3, 16, 16)
    image = jax.random.normal(xkey, (2, 3, 16, 16), jnp.float32)

    out = discriminator_forward(image, folded)
    out = jax.block_until_ready(out)
    assert out.shape == (2, 1), out.shape

    ref = reference_forward(image, params)
    if not jnp.allclose(out, ref, atol=2e-3, rtol=2e-3):
        err = float(jnp.max(jnp.abs(out - ref)))
        raise AssertionError(f"Pallas output mismatch vs reference, max abs err={err}")

    print("KERNEL_OK")
</pallas_src>

<mosaic_0001>
module attributes {stable_mosaic.version = 11 : i64} {
  func.func @_discriminator_kernel(%arg0: i32, %arg1: memref<3x512xf32, #tpu.memory_space<vmem>>, %arg2: memref<3x512xi32, #tpu.memory_space<vmem>>, %arg3: memref<9x16x3xf32, #tpu.memory_space<vmem>>, %arg4: memref<9x32x16xf32, #tpu.memory_space<vmem>>, %arg5: memref<9x32x32xf32, #tpu.memory_space<vmem>>, %arg6: memref<32x32xf32, #tpu.memory_space<vmem>>, %arg7: memref<32x8xf32, #tpu.memory_space<vmem>>, %arg8: memref<1x2xf32, #tpu.memory_space<vmem>>) attributes {dimension_semantics = [#tpu.dimension_semantics<arbitrary>], iteration_bounds = array<i64: 1>, scalar_prefetch = 0 : i64, scratch_operands = 0 : i64, tpu.core_type = #tpu.core_type<tc>, window_params = [{pipeline_mode = #tpu.pipeline_mode<synchronous>, transform_indices = @transform_0, window_bounds = array<i64: 3, 512>}, {pipeline_mode = #tpu.pipeline_mode<synchronous>, transform_indices = @transform_1, window_bounds = array<i64: 3, 512>}, {pipeline_mode = #tpu.pipeline_mode<synchronous>, transform_indices = @transform_2, window_bounds = array<i64: 9, 16, 3>}, {pipeline_mode = #tpu.pipeline_mode<synchronous>, transform_indices = @transform_3, window_bounds = array<i64: 9, 32, 16>}, {pipeline_mode = #tpu.pipeline_mode<synchronous>, transform_indices = @transform_4, window_bounds = array<i64: 9, 32, 32>}, {pipeline_mode = #tpu.pipeline_mode<synchronous>, transform_indices = @transform_5, window_bounds = array<i64: 32, 32>}, {pipeline_mode = #tpu.pipeline_mode<synchronous>, transform_indices = @transform_6, window_bounds = array<i64: 32, 8>}, {pipeline_mode = #tpu.pipeline_mode<synchronous>, transform_indices = @transform_7, window_bounds = array<i64: 1, 2>}]} {
    %c0 = arith.constant 0 : index
    %c0_0 = arith.constant 0 : index
    %0 = vector.load %arg2[%c0, %c0_0] : memref<3x512xi32, #tpu.memory_space<vmem>>, vector<1x512xi32>
    %c1 = arith.constant 1 : index
    %c0_1 = arith.constant 0 : index
    %1 = vector.load %arg2[%c1, %c0_1] : memref<3x512xi32, #tpu.memory_space<vmem>>, vector<1x512xi32>
    %c2 = arith.constant 2 : index
    %c0_2 = arith.constant 0 : index
    %2 = vector.load %arg2[%c2, %c0_2] : memref<3x512xi32, #tpu.memory_space<vmem>>, vector<1x512xi32>
    %c0_i32 = arith.constant 0 : i32
    %3 = vector.broadcast %c0_i32 : i32 to vector<1x512xi32>
    %4 = arith.cmpi sgt, %2, %3 : vector<1x512xi32>
    %c0_3 = arith.constant 0 : index
    %c0_4 = arith.constant 0 : index
    %5 = vector.load %arg7[%c0_3, %c0_4] : memref<32x8xf32, #tpu.memory_space<vmem>>, vector<16x1xf32>
    %c0_5 = arith.constant 0 : index
    %c1_6 = arith.constant 1 : index
    %6 = vector.load %arg7[%c0_5, %c1_6] : memref<32x8xf32, #tpu.memory_space<vmem>>, vector<32x1xf32>
    %c0_7 = arith.constant 0 : index
    %c2_8 = arith.constant 2 : index
    %7 = vector.load %arg7[%c0_7, %c2_8] : memref<32x8xf32, #tpu.memory_space<vmem>>, vector<32x1xf32>
    %c0_9 = arith.constant 0 : index
    %c3 = arith.constant 3 : index
    %8 = vector.load %arg7[%c0_9, %c3] : memref<32x8xf32, #tpu.memory_space<vmem>>, vector<32x1xf32>
    %c0_10 = arith.constant 0 : index
    %c4 = arith.constant 4 : index
    %9 = vector.load %arg7[%c0_10, %c4] : memref<32x8xf32, #tpu.memory_space<vmem>>, vector<32x1xf32>
    %c0_11 = arith.constant 0 : index
    %c5 = arith.constant 5 : index
    %10 = vector.load %arg7[%c0_11, %c5] : memref<32x8xf32, #tpu.memory_space<vmem>>, vector<1x1xf32>
    %c0_12 = arith.constant 0 : index
    %c0_13 = arith.constant 0 : index
    %11 = vector.load %arg1[%c0_12, %c0_13] : memref<3x512xf32, #tpu.memory_space<vmem>>, vector<3x512xf32>
    %12 = vector.extract_strided_slice %11 {offsets = [0, 495], sizes = [3, 17], strides = [1, 1]} : vector<3x512xf32> to vector<3x17xf32>
    %13 = vector.extract_strided_slice %11 {offsets = [0, 0], sizes = [3, 495], strides = [1, 1]} : vector<3x512xf32> to vector<3x495xf32>
    %14 = tpu.concatenate %12, %13 in 1 : vector<3x17xf32>, vector<3x495xf32> -> vector<3x512xf32>
    %c1_i32 = arith.constant 1 : i32
    %15 = vector.broadcast %c1_i32 : i32 to vector<1x512xi32>
    %16 = arith.cmpi sge, %0, %15 : vector<1x512xi32>
    %c1_i32_14 = arith.constant 1 : i32
    %17 = vector.broadcast %c1_i32_14 : i32 to vector<1x512xi32>
    %18 = arith.cmpi sge, %1, %17 : vector<1x512xi32>
    %19 = arith.andi %16, %18 : vector<1x512xi1>
    %cst = arith.constant 0.000000e+00 : f32
    %20 = vector.shape_cast %19 : vector<1x512xi1> to vector<1x512xi1>
    %21 = vector.broadcast %20 : vector<1x512xi1> to vector<3x512xi1>
    %22 = vector.broadcast %cst : f32 to vector<3x512xf32>
    %23 = arith.select %21, %14, %22 : vector<3x512xi1>, vector<3x512xf32>
    %c0_15 = arith.constant 0 : index
    %c0_16 = arith.constant 0 : index
    %c0_17 = arith.constant 0 : index
    %24 = vector.load %arg3[%c0_15, %c0_16, %c0_17] : memref<9x16x3xf32, #tpu.memory_space<vmem>>, vector<1x16x3xf32>
    %25 = vector.shape_cast %24 : vector<1x16x3xf32> to vector<16x3xf32>
    %cst_18 = arith.constant dense<0.000000e+00> : vector<16x512xf32>
    %26 = tpu.matmul %25, %23, %cst_18 {dimension_numbers = #tpu.dot_dimension_numbers<[1], [0], [0], [1], [0, 0, 1, 1], [], []>} : vector<16x3xf32>, vector<3x512xf32>, vector<16x512xf32> -> vector<16x512xf32>
    %27 = vector.extract_strided_slice %11 {offsets = [0, 496], sizes = [3, 16], strides = [1, 1]} : vector<3x512xf32> to vector<3x16xf32>
    %28 = vector.extract_strided_slice %11 {offsets = [0, 0], sizes = [3, 496], strides = [1, 1]} : vector<3x512xf32> to vector<3x496xf32>
    %29 = tpu.concatenate %27, %28 in 1 : vector<3x16xf32>, vector<3x496xf32> -> vector<3x512xf32>
    %c1_i32_19 = arith.constant 1 : i32
    %30 = vector.broadcast %c1_i32_19 : i32 to vector<1x512xi32>
    %31 = arith.cmpi sge, %0, %30 : vector<1x512xi32>
    %cst_20 = arith.constant 0.000000e+00 : f32
    %32 = vector.shape_cast %31 : vector<1x512xi1> to vector<1x512xi1>
    %33 = vector.broadcast %32 : vector<1x512xi1> to vector<3x512xi1>
    %34 = vector.broadcast %cst_20 : f32 to vector<3x512xf32>
    %35 = arith.select %33, %29, %34 : vector<3x512xi1>, vector<3x512xf32>
    %c1_21 = arith.constant 1 : index
    %c0_22 = arith.constant 0 : index
    %c0_23 = arith.constant 0 : index
    %36 = vector.load %arg3[%c1_21, %c0_22, %c0_23] : memref<9x16x3xf32, #tpu.memory_space<vmem>>, vector<1x16x3xf32>
    %37 = vector.shape_cast %36 : vector<1x16x3xf32> to vector<16x3xf32>
    %cst_24 = arith.constant dense<0.000000e+00> : vector<16x512xf32>
    %38 = tpu.matmul %37, %35, %cst_24 {dimension_numbers = #tpu.dot_dimension_numbers<[1], [0], [0], [1], [0, 0, 1, 1], [], []>} : vector<16x3xf32>, vector<3x512xf32>, vector<16x512xf32> -> vector<16x512xf32>
    %39 = arith.addf %26, %38 : vector<16x512xf32>
    %40 = vector.extract_strided_slice %11 {offsets = [0, 497], sizes = [3, 15], strides = [1, 1]} : vector<3x512xf32> to vector<3x15xf32>
    %41 = vector.extract_strided_slice %11 {offsets = [0, 0], sizes = [3, 497], strides = [1, 1]} : vector<3x512xf32> to vector<3x497xf32>
    %42 = tpu.concatenate %40, %41 in 1 : vector<3x15xf32>, vector<3x497xf32> -> vector<3x512xf32>
    %c1_i32_25 = arith.constant 1 : i32
    %43 = vector.broadcast %c1_i32_25 : i32 to vector<1x512xi32>
    %44 = arith.cmpi sge, %0, %43 : vector<1x512xi32>
    %c15_i32 = arith.constant 15 : i32
    %45 = vector.broadcast %c15_i32 : i32 to vector<1x512xi32>
    %46 = arith.cmpi slt, %1, %45 : vector<1x512xi32>
    %47 = arith.andi %44, %46 : vector<1x512xi1>
    %cst_26 = arith.constant 0.000000e+00 : f32
    %48 = vector.shape_cast %47 : vector<1x512xi1> to vector<1x512xi1>
    %49 = vector.broadcast %48 : vector<1x512xi1> to vector<3x512xi1>
    %50 = vector.broadcast %cst_26 : f32 to vector<3x512xf32>
    %51 = arith.select %49, %42, %50 : vector<3x512xi1>, vector<3x512xf32>
    %c2_27 = arith.constant 2 : index
    %c0_28 = arith.constant 0 : index
    %c0_29 = arith.constant 0 : index
    %52 = vector.load %arg3[%c2_27, %c0_28, %c0_29] : memref<9x16x3xf32, #tpu.memory_space<vmem>>, vector<1x16x3xf32>
    %53 = vector.shape_cast %52 : vector<1x16x3xf32> to vector<16x3xf32>
    %cst_30 = arith.constant dense<0.000000e+00> : vector<16x512xf32>
    %54 = tpu.matmul %53, %51, %cst_30 {dimension_numbers = #tpu.dot_dimension_numbers<[1], [0], [0], [1], [0, 0, 1, 1], [], []>} : vector<16x3xf32>, vector<3x512xf32>, vector<16x512xf32> -> vector<16x512xf32>
    %55 = arith.addf %39, %54 : vector<16x512xf32>
    %56 = vector.extract_strided_slice %11 {offsets = [0, 511], sizes = [3, 1], strides = [1, 1]} : vector<3x512xf32> to vector<3x1xf32>
    %57 = vector.extract_strided_slice %11 {offsets = [0, 0], sizes = [3, 511], strides = [1, 1]} : vector<3x512xf32> to vector<3x511xf32>
    %58 = tpu.concatenate %56, %57 in 1 : vector<3x1xf32>, vector<3x511xf32> -> vector<3x512xf32>
    %c1_i32_31 = arith.constant 1 : i32
    %59 = vector.broadcast %c1_i32_31 : i32 to vector<1x512xi32>
    %60 = arith.cmpi sge, %1, %59 : vector<1x512xi32>
    %cst_32 = arith.constant 0.000000e+00 : f32
    %61 = vector.shape_cast %60 : vector<1x512xi1> to vector<1x512xi1>
    %62 = vector.broadcast %61 : vector<1x512xi1> to vector<3x512xi1>
    %63 = vector.broadcast %cst_32 : f32 to vector<3x512xf32>
    %64 = arith.select %62, %58, %63 : vector<3x512xi1>, vector<3x512xf32>
    %c3_33 = arith.constant 3 : index
    %c0_34 = arith.constant 0 : index
    %c0_35 = arith.constant 0 : index
    %65 = vector.load %arg3[%c3_33, %c0_34, %c0_35] : memref<9x16x3xf32, #tpu.memory_space<vmem>>, vector<1x16x3xf32>
    %66 = vector.shape_cast %65 : vector<1x16x3xf32> to vector<16x3xf32>
    %cst_36 = arith.constant dense<0.000000e+00> : vector<16x512xf32>
    %67 = tpu.matmul %66, %64, %cst_36 {dimension_numbers = #tpu.dot_dimension_numbers<[1], [0], [0], [1], [0, 0, 1, 1], [], []>} : vector<16x3xf32>, vector<3x512xf32>, vector<16x512xf32> -> vector<16x512xf32>
    %68 = arith.addf %55, %67 : vector<16x512xf32>
    %c4_37 = arith.constant 4 : index
    %c0_38 = arith.constant 0 : index
    %c0_39 = arith.constant 0 : index
    %69 = vector.load %arg3[%c4_37, %c0_38, %c0_39] : memref<9x16x3xf32, #tpu.memory_space<vmem>>, vector<1x16x3xf32>
    %70 = vector.shape_cast %69 : vector<1x16x3xf32> to vector<16x3xf32>
    %cst_40 = arith.constant dense<0.000000e+00> : vector<16x512xf32>
    %71 = tpu.matmul %70, %11, %cst_40 {dimension_numbers = #tpu.dot_dimension_numbers<[1], [0], [0], [1], [0, 0, 1, 1], [], []>} : vector<16x3xf32>, vector<3x512xf32>, vector<16x512xf32> -> vector<16x512xf32>
    %72 = arith.addf %68, %71 : vector<16x512xf32>
    %73 = vector.extract_strided_slice %11 {offsets = [0, 1], sizes = [3, 511], strides = [1, 1]} : vector<3x512xf32> to vector<3x511xf32>
    %74 = vector.extract_strided_slice %11 {offsets = [0, 0], sizes = [3, 1], strides = [1, 1]} : vector<3x512xf32> to vector<3x1xf32>
    %75 = tpu.concatenate %73, %74 in 1 : vector<3x511xf32>, vector<3x1xf32> -> vector<3x512xf32>
    %c15_i32_41 = arith.constant 15 : i32
    %76 = vector.broadcast %c15_i32_41 : i32 to vector<1x512xi32>
    %77 = arith.cmpi slt, %1, %76 : vector<1x512xi32>
    %cst_42 = arith.constant 0.000000e+00 : f32
    %78 = vector.shape_cast %77 : vector<1x512xi1> to vector<1x512xi1>
    %79 = vector.broadcast %78 : vector<1x512xi1> to vector<3x512xi1>
    %80 = vector.broadcast %cst_42 : f32 to vector<3x512xf32>
    %81 = arith.select %79, %75, %80 : vector<3x512xi1>, vector<3x512xf32>
    %c5_43 = arith.constant 5 : index
    %c0_44 = arith.constant 0 : index
    %c0_45 = arith.constant 0 : index
    %82 = vector.load %arg3[%c5_43, %c0_44, %c0_45] : memref<9x16x3xf32, #tpu.memory_space<vmem>>, vector<1x16x3xf32>
    %83 = vector.shape_cast %82 : vector<1x16x3xf32> to vector<16x3xf32>
    %cst_46 = arith.constant dense<0.000000e+00> : vector<16x512xf32>
    %84 = tpu.matmul %83, %81, %cst_46 {dimension_numbers = #tpu.dot_dimension_numbers<[1], [0], [0], [1], [0, 0, 1, 1], [], []>} : vector<16x3xf32>, vector<3x512xf32>, vector<16x512xf32> -> vector<16x512xf32>
    %85 = arith.addf %72, %84 : vector<16x512xf32>
    %86 = vector.extract_strided_slice %11 {offsets = [0, 15], sizes = [3, 497], strides = [1, 1]} : vector<3x512xf32> to vector<3x497xf32>
    %87 = vector.extract_strided_slice %11 {offsets = [0, 0], sizes = [3, 15], strides = [1, 1]} : vector<3x512xf32> to vector<3x15xf32>
    %88 = tpu.concatenate %86, %87 in 1 : vector<3x497xf32>, vector<3x15xf32> -> vector<3x512xf32>
    %c15_i32_47 = arith.constant 15 : i32
    %89 = vector.broadcast %c15_i32_47 : i32 to vector<1x512xi32>
    %90 = arith.cmpi slt, %0, %89 : vector<1x512xi32>
    %c1_i32_48 = arith.constant 1 : i32
    %91 = vector.broadcast %c1_i32_48 : i32 to vector<1x512xi32>
    %92 = arith.cmpi sge, %1, %91 : vector<1x512xi32>
    %93 = arith.andi %90, %92 : vector<1x512xi1>
    %cst_49 = arith.constant 0.000000e+00 : f32
    %94 = vector.shape_cast %93 : vector<1x512xi1> to vector<1x512xi1>
    %95 = vector.broadcast %94 : vector<1x512xi1> to vector<3x512xi1>
    %96 = vector.broadcast %cst_49 : f32 to vector<3x512xf32>
    %97 = arith.select %95, %88, %96 : vector<3x512xi1>, vector<3x512xf32>
    %c6 = arith.constant 6 : index
    %c0_50 = arith.constant 0 : index
    %c0_51 = arith.constant 0 : index
    %98 = vector.load %arg3[%c6, %c0_50, %c0_51] : memref<9x16x3xf32, #tpu.memory_space<vmem>>, vector<1x16x3xf32>
    %99 = vector.shape_cast %98 : vector<1x16x3xf32> to vector<16x3xf32>
    %cst_52 = arith.constant dense<0.000000e+00> : vector<16x512xf32>
    %100 = tpu.matmul %99, %97, %cst_52 {dimension_numbers = #tpu.dot_dimension_numbers<[1], [0], [0], [1], [0, 0, 1, 1], [], []>} : vector<16x3xf32>, vector<3x512xf32>, vector<16x512xf32> -> vector<16x512xf32>
    %101 = arith.addf %85, %100 : vector<16x512xf32>
    %102 = vector.extract_strided_slice %11 {offsets = [0, 16], sizes = [3, 496], strides = [1, 1]} : vector<3x512xf32> to vector<3x496xf32>
    %103 = vector.extract_strided_slice %11 {offsets = [0, 0], sizes = [3, 16], strides = [1, 1]} : vector<3x512xf32> to vector<3x16xf32>
    %104 = tpu.concatenate %102, %103 in 1 : vector<3x496xf32>, vector<3x16xf32> -> vector<3x512xf32>
    %c15_i32_53 = arith.constant 15 : i32
    %105 = vector.broadcast %c15_i32_53 : i32 to vector<1x512xi32>
    %106 = arith.cmpi slt, %0, %105 : vector<1x512xi32>
    %cst_54 = arith.constant 0.000000e+00 : f32
    %107 = vector.shape_cast %106 : vector<1x512xi1> to vector<1x512xi1>
    %108 = vector.broadcast %107 : vector<1x512xi1> to vector<3x512xi1>
    %109 = vector.broadcast %cst_54 : f32 to vector<3x512xf32>
    %110 = arith.select %108, %104, %109 : vector<3x512xi1>, vector<3x512xf32>
    %c7 = arith.constant 7 : index
    %c0_55 = arith.constant 0 : index
    %c0_56 = arith.constant 0 : index
    %111 = vector.load %arg3[%c7, %c0_55, %c0_56] : memref<9x16x3xf32, #tpu.memory_space<vmem>>, vector<1x16x3xf32>
    %112 = vector.shape_cast %111 : vector<1x16x3xf32> to vector<16x3xf32>
    %cst_57 = arith.constant dense<0.000000e+00> : vector<16x512xf32>
    %113 = tpu.matmul %112, %110, %cst_57 {dimension_numbers = #tpu.dot_dimension_numbers<[1], [0], [0], [1], [0, 0, 1, 1], [], []>} : vector<16x3xf32>, vector<3x512xf32>, vector<16x512xf32> -> vector<16x512xf32>
    %114 = arith.addf %101, %113 : vector<16x512xf32>
    %115 = vector.extract_strided_slice %11 {offsets = [0, 17], sizes = [3, 495], strides = [1, 1]} : vector<3x512xf32> to vector<3x495xf32>
    %116 = vector.extract_strided_slice %11 {offsets = [0, 0], sizes = [3, 17], strides = [1, 1]} : vector<3x512xf32> to vector<3x17xf32>
    %117 = tpu.concatenate %115, %116 in 1 : vector<3x495xf32>, vector<3x17xf32> -> vector<3x512xf32>
    %c15_i32_58 = arith.constant 15 : i32
    %118 = vector.broadcast %c15_i32_58 : i32 to vector<1x512xi32>
    %119 = arith.cmpi slt, %0, %118 : vector<1x512xi32>
    %c15_i32_59 = arith.constant 15 : i32
    %120 = vector.broadcast %c15_i32_59 : i32 to vector<1x512xi32>
    %121 = arith.cmpi slt, %1, %120 : vector<1x512xi32>
    %122 = arith.andi %119, %121 : vector<1x512xi1>
    %cst_60 = arith.constant 0.000000e+00 : f32
    %123 = vector.shape_cast %122 : vector<1x512xi1> to vector<1x512xi1>
    %124 = vector.broadcast %123 : vector<1x512xi1> to vector<3x512xi1>
    %125 = vector.broadcast %cst_60 : f32 to vector<3x512xf32>
    %126 = arith.select %124, %117, %125 : vector<3x512xi1>, vector<3x512xf32>
    %c8 = arith.constant 8 : index
    %c0_61 = arith.constant 0 : index
    %c0_62 = arith.constant 0 : index
    %127 = vector.load %arg3[%c8, %c0_61, %c0_62] : memref<9x16x3xf32, #tpu.memory_space<vmem>>, vector<1x16x3xf32>
    %128 = vector.shape_cast %127 : vector<1x16x3xf32> to vector<16x3xf32>
    %cst_63 = arith.constant dense<0.000000e+00> : vector<16x512xf32>
    %129 = tpu.matmul %128, %126, %cst_63 {dimension_numbers = #tpu.dot_dimension_numbers<[1], [0], [0], [1], [0, 0, 1, 1], [], []>} : vector<16x3xf32>, vector<3x512xf32>, vector<16x512xf32> -> vector<16x512xf32>
    %130 = arith.addf %114, %129 : vector<16x512xf32>
    %131 = vector.broadcast %5 : vector<16x1xf32> to vector<16x512xf32>
    %132 = arith.addf %130, %131 : vector<16x512xf32>
    %cst_64 = arith.constant 0.000000e+00 : f32
    %133 = vector.broadcast %cst_64 : f32 to vector<16x512xf32>
    %134 = arith.maximumf %132, %133 : vector<16x512xf32>
    %135 = vector.extract_strided_slice %134 {offsets = [0, 495], sizes = [16, 17], strides = [1, 1]} : vector<16x512xf32> to vector<16x17xf32>
    %136 = vector.extract_strided_slice %134 {offsets = [0, 0], sizes = [16, 495], strides = [1, 1]} : vector<16x512xf32> to vector<16x495xf32>
    %137 = tpu.concatenate %135, %136 in 1 : vector<16x17xf32>, vector<16x495xf32> -> vector<16x512xf32>
    %c1_i32_65 = arith.constant 1 : i32
    %138 = vector.broadcast %c1_i32_65 : i32 to vector<1x512xi32>
    %139 = arith.cmpi sge, %0, %138 : vector<1x512xi32>
    %c1_i32_66 = arith.constant 1 : i32
    %140 = vector.broadcast %c1_i32_66 : i32 to vector<1x512xi32>
    %141 = arith.cmpi sge, %1, %140 : vector<1x512xi32>
    %142 = arith.andi %139, %141 : vector<1x512xi1>
    %cst_67 = arith.constant 0.000000e+00 : f32
    %143 = vector.shape_cast %142 : vector<1x512xi1> to vector<1x512xi1>
    %144 = vector.broadcast %143 : vector<1x512xi1> to vector<16x512xi1>
    %145 = vector.broadcast %cst_67 : f32 to vector<16x512xf32>
    %146 = arith.select %144, %137, %145 : vector<16x512xi1>, vector<16x512xf32>
    %c0_68 = arith.constant 0 : index
    %c0_69 = arith.constant 0 : index
    %c0_70 = arith.constant 0 : index
    %147 = vector.load %arg4[%c0_68, %c0_69, %c0_70] : memref<9x32x16xf32, #tpu.memory_space<vmem>>, vector<1x32x16xf32>
    %148 = vector.shape_cast %147 : vector<1x32x16xf32> to vector<32x16xf32>
    %cst_71 = arith.constant dense<0.000000e+00> : vector<32x512xf32>
    %149 = tpu.matmul %148, %146, %cst_71 {dimension_numbers = #tpu.dot_dimension_numbers<[1], [0], [0], [1], [0, 0, 1, 1], [], []>} : vector<32x16xf32>, vector<16x512xf32>, vector<32x512xf32> -> vector<32x512xf32>
    %150 = vector.extract_strided_slice %134 {offsets = [0, 496], sizes = [16, 16], strides = [1, 1]} : vector<16x512xf32> to vector<16x16xf32>
    %151 = vector.extract_strided_slice %134 {offsets = [0, 0], sizes = [16, 496], strides = [1, 1]} : vector<16x512xf32> to vector<16x496xf32>
    %152 = tpu.concatenate %150, %151 in 1 : vector<16x16xf32>, vector<16x496xf32> -> vector<16x512xf32>
    %c1_i32_72 = arith.constant 1 : i32
    %153 = vector.broadcast %c1_i32_72 : i32 to vector<1x512xi32>
    %154 = arith.cmpi sge, %0, %153 : vector<1x512xi32>
    %cst_73 = arith.constant 0.000000e+00 : f32
    %155 = vector.shape_cast %154 : vector<1x512xi1> to vector<1x512xi1>
    %156 = vector.broadcast %155 : vector<1x512xi1> to vector<16x512xi1>
    %157 = vector.broadcast %cst_73 : f32 to vector<16x512xf32>
    %158 = arith.select %156, %152, %157 : vector<16x512xi1>, vector<16x512xf32>
    %c1_74 = arith.constant 1 : index
    %c0_75 = arith.constant 0 : index
    %c0_76 = arith.constant 0 : index
    %159 = vector.load %arg4[%c1_74, %c0_75, %c0_76] : memref<9x32x16xf32, #tpu.memory_space<vmem>>, vector<1x32x16xf32>
    %160 = vector.shape_cast %159 : vector<1x32x16xf32> to vector<32x16xf32>
    %cst_77 = arith.constant dense<0.000000e+00> : vector<32x512xf32>
    %161 = tpu.matmul %160, %158, %cst_77 {dimension_numbers = #tpu.dot_dimension_numbers<[1], [0], [0], [1], [0, 0, 1, 1], [], []>} : vector<32x16xf32>, vector<16x512xf32>, vector<32x512xf32> -> vector<32x512xf32>
    %162 = arith.addf %149, %161 : vector<32x512xf32>
    %163 = vector.extract_strided_slice %134 {offsets = [0, 497], sizes = [16, 15], strides = [1, 1]} : vector<16x512xf32> to vector<16x15xf32>
    %164 = vector.extract_strided_slice %134 {offsets = [0, 0], sizes = [16, 497], strides = [1, 1]} : vector<16x512xf32> to vector<16x497xf32>
    %165 = tpu.concatenate %163, %164 in 1 : vector<16x15xf32>, vector<16x497xf32> -> vector<16x512xf32>
    %c1_i32_78 = arith.constant 1 : i32
    %166 = vector.broadcast %c1_i32_78 : i32 to vector<1x512xi32>
    %167 = arith.cmpi sge, %0, %166 : vector<1x512xi32>
    %c15_i32_79 = arith.constant 15 : i32
    %168 = vector.broadcast %c15_i32_79 : i32 to vector<1x512xi32>
    %169 = arith.cmpi slt, %1, %168 : vector<1x512xi32>
    %170 = arith.andi %167, %169 : vector<1x512xi1>
    %cst_80 = arith.constant 0.000000e+00 : f32
    %171 = vector.shape_cast %170 : vector<1x512xi1> to vector<1x512xi1>
    %172 = vector.broadcast %171 : vector<1x512xi1> to vector<16x512xi1>
    %173 = vector.broadcast %cst_80 : f32 to vector<16x512xf32>
    %174 = arith.select %172, %165, %173 : vector<16x512xi1>, vector<16x512xf32>
    %c2_81 = arith.constant 2 : index
    %c0_82 = arith.constant 0 : index
    %c0_83 = arith.constant 0 : index
    %175 = vector.load %arg4[%c2_81, %c0_82, %c0_83] : memref<9x32x16xf32, #tpu.memory_space<vmem>>, vector<1x32x16xf32>
    %176 = vector.shape_cast %175 : vector<1x32x16xf32> to vector<32x16xf32>
    %cst_84 = arith.constant dense<0.000000e+00> : vector<32x512xf32>
    %177 = tpu.matmul %176, %174, %cst_84 {dimension_numbers = #tpu.dot_dimension_numbers<[1], [0], [0], [1], [0, 0, 1, 1], [], []>} : vector<32x16xf32>, vector<16x512xf32>, vector<32x512xf32> -> vector<32x512xf32>
    %178 = arith.addf %162, %177 : vector<32x512xf32>
    %179 = vector.extract_strided_slice %134 {offsets = [0, 511], sizes = [16, 1], strides = [1, 1]} : vector<16x512xf32> to vector<16x1xf32>
    %180 = vector.extract_strided_slice %134 {offsets = [0, 0], sizes = [16, 511], strides = [1, 1]} : vector<16x512xf32> to vector<16x511xf32>
    %181 = tpu.concatenate %179, %180 in 1 : vector<16x1xf32>, vector<16x511xf32> -> vector<16x512xf32>
    %c1_i32_85 = arith.constant 1 : i32
    %182 = vector.broadcast %c1_i32_85 : i32 to vector<1x512xi32>
    %183 = arith.cmpi sge, %1, %182 : vector<1x512xi32>
    %cst_86 = arith.constant 0.000000e+00 : f32
    %184 = vector.shape_cast %183 : vector<1x512xi1> to vector<1x512xi1>
    %185 = vector.broadcast %184 : vector<1x512xi1> to vector<16x512xi1>
    %186 = vector.broadcast %cst_86 : f32 to vector<16x512xf32>
    %187 = arith.select %185, %181, %186 : vector<16x512xi1>, vector<16x512xf32>
    %c3_87 = arith.constant 3 : index
    %c0_88 = arith.constant 0 : index
    %c0_89 = arith.constant 0 : index
    %188 = vector.load %arg4[%c3_87, %c0_88, %c0_89] : memref<9x32x16xf32, #tpu.memory_space<vmem>>, vector<1x32x16xf32>
    %189 = vector.shape_cast %188 : vector<1x32x16xf32> to vector<32x16xf32>
    %cst_90 = arith.constant dense<0.000000e+00> : vector<32x512xf32>
    %190 = tpu.matmul %189, %187, %cst_90 {dimension_numbers = #tpu.dot_dimension_numbers<[1], [0], [0], [1], [0, 0, 1, 1], [], []>} : vector<32x16xf32>, vector<16x512xf32>, vector<32x512xf32> -> vector<32x512xf32>
    %191 = arith.addf %178, %190 : vector<32x512xf32>
    %c4_91 = arith.constant 4 : index
    %c0_92 = arith.constant 0 : index
    %c0_93 = arith.constant 0 : index
    %192 = vector.load %arg4[%c4_91, %c0_92, %c0_93] : memref<9x32x16xf32, #tpu.memory_space<vmem>>, vector<1x32x16xf32>
    %193 = vector.shape_cast %192 : vector<1x32x16xf32> to vector<32x16xf32>
    %cst_94 = arith.constant dense<0.000000e+00> : vector<32x512xf32>
    %194 = tpu.matmul %193, %134, %cst_94 {dimension_numbers = #tpu.dot_dimension_numbers<[1], [0], [0], [1], [0, 0, 1, 1], [], []>} : vector<32x16xf32>, vector<16x512xf32>, vector<32x512xf32> -> vector<32x512xf32>
    %195 = arith.addf %191, %194 : vector<32x512xf32>
    %196 = vector.extract_strided_slice %134 {offsets = [0, 1], sizes = [16, 511], strides = [1, 1]} : vector<16x512xf32> to vector<16x511xf32>
    %197 = vector.extract_strided_slice %134 {offsets = [0, 0], sizes = [16, 1], strides = [1, 1]} : vector<16x512xf32> to vector<16x1xf32>
    %198 = tpu.concatenate %196, %197 in 1 : vector<16x511xf32>, vector<16x1xf32> -> vector<16x512xf32>
    %c15_i32_95 = arith.constant 15 : i32
    %199 = vector.broadcast %c15_i32_95 : i32 to vector<1x512xi32>
    %200 = arith.cmpi slt, %1, %199 : vector<1x512xi32>
    %cst_96 = arith.constant 0.000000e+00 : f32
    %201 = vector.shape_cast %200 : vector<1x512xi1> to vector<1x512xi1>
    %202 = vector.broadcast %201 : vector<1x512xi1> to vector<16x512xi1>
    %203 = vector.broadcast %cst_96 : f32 to vector<16x512xf32>
    %204 = arith.select %202, %198, %203 : vector<16x512xi1>, vector<16x512xf32>
    %c5_97 = arith.constant 5 : index
    %c0_98 = arith.constant 0 : index
    %c0_99 = arith.constant 0 : index
    %205 = vector.load %arg4[%c5_97, %c0_98, %c0_99] : memref<9x32x16xf32, #tpu.memory_space<vmem>>, vector<1x32x16xf32>
    %206 = vector.shape_cast %205 : vector<1x32x16xf32> to vector<32x16xf32>
    %cst_100 = arith.constant dense<0.000000e+00> : vector<32x512xf32>
    %207 = tpu.matmul %206, %204, %cst_100 {dimension_numbers = #tpu.dot_dimension_numbers<[1], [0], [0], [1], [0, 0, 1, 1], [], []>} : vector<32x16xf32>, vector<16x512xf32>, vector<32x512xf32> -> vector<32x512xf32>
    %208 = arith.addf %195, %207 : vector<32x512xf32>
    %209 = vector.extract_strided_slice %134 {offsets = [0, 15], sizes = [16, 497], strides = [1, 1]} : vector<16x512xf32> to vector<16x497xf32>
    %210 = vector.extract_strided_slice %134 {offsets = [0, 0], sizes = [16, 15], strides = [1, 1]} : vector<16x512xf32> to vector<16x15xf32>
    %211 = tpu.concatenate %209, %210 in 1 : vector<16x497xf32>, vector<16x15xf32> -> vector<16x512xf32>
    %c15_i32_101 = arith.constant 15 : i32
    %212 = vector.broadcast %c15_i32_101 : i32 to vector<1x512xi32>
    %213 = arith.cmpi slt, %0, %212 : vector<1x512xi32>
    %c1_i32_102 = arith.constant 1 : i32
    %214 = vector.broadcast %c1_i32_102 : i32 to vector<1x512xi32>
    %215 = arith.cmpi sge, %1, %214 : vector<1x512xi32>
    %216 = arith.andi %213, %215 : vector<1x512xi1>
    %cst_103 = arith.constant 0.000000e+00 : f32
    %217 = vector.shape_cast %216 : vector<1x512xi1> to vector<1x512xi1>
    %218 = vector.broadcast %217 : vector<1x512xi1> to vector<16x512xi1>
    %219 = vector.broadcast %cst_103 : f32 to vector<16x512xf32>
    %220 = arith.select %218, %211, %219 : vector<16x512xi1>, vector<16x512xf32>
    %c6_104 = arith.constant 6 : index
    %c0_105 = arith.constant 0 : index
    %c0_106 = arith.constant 0 : index
    %221 = vector.load %arg4[%c6_104, %c0_105, %c0_106] : memref<9x32x16xf32, #tpu.memory_space<vmem>>, vector<1x32x16xf32>
    %222 = vector.shape_cast %221 : vector<1x32x16xf32> to vector<32x16xf32>
    %cst_107 = arith.constant dense<0.000000e+00> : vector<32x512xf32>
    %223 = tpu.matmul %222, %220, %cst_107 {dimension_numbers = #tpu.dot_dimension_numbers<[1], [0], [0], [1], [0, 0, 1, 1], [], []>} : vector<32x16xf32>, vector<16x512xf32>, vector<32x512xf32> -> vector<32x512xf32>
    %224 = arith.addf %208, %223 : vector<32x512xf32>
    %225 = vector.extract_strided_slice %134 {offsets = [0, 16], sizes = [16, 496], strides = [1, 1]} : vector<16x512xf32> to vector<16x496xf32>
    %226 = vector.extract_strided_slice %134 {offsets = [0, 0], sizes = [16, 16], strides = [1, 1]} : vector<16x512xf32> to vector<16x16xf32>
    %227 = tpu.concatenate %225, %226 in 1 : vector<16x496xf32>, vector<16x16xf32> -> vector<16x512xf32>
    %c15_i32_108 = arith.constant 15 : i32
    %228 = vector.broadcast %c15_i32_108 : i32 to vector<1x512xi32>
    %229 = arith.cmpi slt, %0, %228 : vector<1x512xi32>
    %cst_109 = arith.constant 0.000000e+00 : f32
    %230 = vector.shape_cast %229 : vector<1x512xi1> to vector<1x512xi1>
    %231 = vector.broadcast %230 : vector<1x512xi1> to vector<16x512xi1>
    %232 = vector.broadcast %cst_109 : f32 to vector<16x512xf32>
    %233 = arith.select %231, %227, %232 : vector<16x512xi1>, vector<16x512xf32>
    %c7_110 = arith.constant 7 : index
    %c0_111 = arith.constant 0 : index
    %c0_112 = arith.constant 0 : index
    %234 = vector.load %arg4[%c7_110, %c0_111, %c0_112] : memref<9x32x16xf32, #tpu.memory_space<vmem>>, vector<1x32x16xf32>
    %235 = vector.shape_cast %234 : vector<1x32x16xf32> to vector<32x16xf32>
    %cst_113 = arith.constant dense<0.000000e+00> : vector<32x512xf32>
    %236 = tpu.matmul %235, %233, %cst_113 {dimension_numbers = #tpu.dot_dimension_numbers<[1], [0], [0], [1], [0, 0, 1, 1], [], []>} : vector<32x16xf32>, vector<16x512xf32>, vector<32x512xf32> -> vector<32x512xf32>
    %237 = arith.addf %224, %236 : vector<32x512xf32>
    %238 = vector.extract_strided_slice %134 {offsets = [0, 17], sizes = [16, 495], strides = [1, 1]} : vector<16x512xf32> to vector<16x495xf32>
    %239 = vector.extract_strided_slice %134 {offsets = [0, 0], sizes = [16, 17], strides = [1, 1]} : vector<16x512xf32> to vector<16x17xf32>
    %240 = tpu.concatenate %238, %239 in 1 : vector<16x495xf32>, vector<16x17xf32> -> vector<16x512xf32>
    %c15_i32_114 = arith.constant 15 : i32
    %241 = vector.broadcast %c15_i32_114 : i32 to vector<1x512xi32>
    %242 = arith.cmpi slt, %0, %241 : vector<1x512xi32>
    %c15_i32_115 = arith.constant 15 : i32
    %243 = vector.broadcast %c15_i32_115 : i32 to vector<1x512xi32>
    %244 = arith.cmpi slt, %1, %243 : vector<1x512xi32>
    %245 = arith.andi %242, %244 : vector<1x512xi1>
    %cst_116 = arith.constant 0.000000e+00 : f32
    %246 = vector.shape_cast %245 : vector<1x512xi1> to vector<1x512xi1>
    %247 = vector.broadcast %246 : vector<1x512xi1> to vector<16x512xi1>
    %248 = vector.broadcast %cst_116 : f32 to vector<16x512xf32>
    %249 = arith.select %247, %240, %248 : vector<16x512xi1>, vector<16x512xf32>
    %c8_117 = arith.constant 8 : index
    %c0_118 = arith.constant 0 : index
    %c0_119 = arith.constant 0 : index
    %250 = vector.load %arg4[%c8_117, %c0_118, %c0_119] : memref<9x32x16xf32, #tpu.memory_space<vmem>>, vector<1x32x16xf32>
    %251 = vector.shape_cast %250 : vector<1x32x16xf32> to vector<32x16xf32>
    %cst_120 = arith.constant dense<0.000000e+00> : vector<32x512xf32>
    %252 = tpu.matmul %251, %249, %cst_120 {dimension_numbers = #tpu.dot_dimension_numbers<[1], [0], [0], [1], [0, 0, 1, 1], [], []>} : vector<32x16xf32>, vector<16x512xf32>, vector<32x512xf32> -> vector<32x512xf32>
    %253 = arith.addf %237, %252 : vector<32x512xf32>
    %254 = vector.broadcast %6 : vector<32x1xf32> to vector<32x512xf32>
    %255 = arith.addf %253, %254 : vector<32x512xf32>
    %cst_121 = arith.constant 0.000000e+00 : f32
    %256 = vector.broadcast %cst_121 : f32 to vector<32x512xf32>
    %257 = arith.maximumf %255, %256 : vector<32x512xf32>
    %258 = vector.extract_strided_slice %257 {offsets = [0, 478], sizes = [32, 34], strides = [1, 1]} : vector<32x512xf32> to vector<32x34xf32>
    %259 = vector.extract_strided_slice %257 {offsets = [0, 0], sizes = [32, 478], strides = [1, 1]} : vector<32x512xf32> to vector<32x478xf32>
    %260 = tpu.concatenate %258, %259 in 1 : vector<32x34xf32>, vector<32x478xf32> -> vector<32x512xf32>
    %c2_i32 = arith.constant 2 : i32
    %261 = vector.broadcast %c2_i32 : i32 to vector<1x512xi32>
    %262 = arith.cmpi sge, %0, %261 : vector<1x512xi32>
    %c2_i32_122 = arith.constant 2 : i32
    %263 = vector.broadcast %c2_i32_122 : i32 to vector<1x512xi32>
    %264 = arith.cmpi sge, %1, %263 : vector<1x512xi32>
    %265 = arith.andi %262, %264 : vector<1x512xi1>
    %cst_123 = arith.constant 0.000000e+00 : f32
    %266 = vector.shape_cast %265 : vector<1x512xi1> to vector<1x512xi1>
    %267 = vector.broadcast %266 : vector<1x512xi1> to vector<32x512xi1>
    %268 = vector.broadcast %cst_123 : f32 to vector<32x512xf32>
    %269 = arith.select %267, %260, %268 : vector<32x512xi1>, vector<32x512xf32>
    %c0_124 = arith.constant 0 : index
    %c0_125 = arith.constant 0 : index
    %c0_126 = arith.constant 0 : index
    %270 = vector.load %arg5[%c0_124, %c0_125, %c0_126] : memref<9x32x32xf32, #tpu.memory_space<vmem>>, vector<1x32x32xf32>
    %271 = vector.shape_cast %270 : vector<1x32x32xf32> to vector<32x32xf32>
    %cst_127 = arith.constant dense<0.000000e+00> : vector<32x512xf32>
    %272 = tpu.matmul %271, %269, %cst_127 {dimension_numbers = #tpu.dot_dimension_numbers<[1], [0], [0], [1], [0, 0, 1, 1], [], []>} : vector<32x32xf32>, vector<32x512xf32>, vector<32x512xf32> -> vector<32x512xf32>
    %273 = vector.extract_strided_slice %257 {offsets = [0, 480], sizes = [32, 32], strides = [1, 1]} : vector<32x512xf32> to vector<32x32xf32>
    %274 = vector.extract_strided_slice %257 {offsets = [0, 0], sizes = [32, 480], strides = [1, 1]} : vector<32x512xf32> to vector<32x480xf32>
    %275 = tpu.concatenate %273, %274 in 1 : vector<32x32xf32>, vector<32x480xf32> -> vector<32x512xf32>
    %c2_i32_128 = arith.constant 2 : i32
    %276 = vector.broadcast %c2_i32_128 : i32 to vector<1x512xi32>
    %277 = arith.cmpi sge, %0, %276 : vector<1x512xi32>
    %cst_129 = arith.constant 0.000000e+00 : f32
    %278 = vector.shape_cast %277 : vector<1x512xi1> to vector<1x512xi1>
    %279 = vector.broadcast %278 : vector<1x512xi1> to vector<32x512xi1>
    %280 = vector.broadcast %cst_129 : f32 to vector<32x512xf32>
    %281 = arith.select %279, %275, %280 : vector<32x512xi1>, vector<32x512xf32>
    %c1_130 = arith.constant 1 : index
    %c0_131 = arith.constant 0 : index
    %c0_132 = arith.constant 0 : index
    %282 = vector.load %arg5[%c1_130, %c0_131, %c0_132] : memref<9x32x32xf32, #tpu.memory_space<vmem>>, vector<1x32x32xf32>
    %283 = vector.shape_cast %282 : vector<1x32x32xf32> to vector<32x32xf32>
    %cst_133 = arith.constant dense<0.000000e+00> : vector<32x512xf32>
    %284 = tpu.matmul %283, %281, %cst_133 {dimension_numbers = #tpu.dot_dimension_numbers<[1], [0], [0], [1], [0, 0, 1, 1], [], []>} : vector<32x32xf32>, vector<32x512xf32>, vector<32x512xf32> -> vector<32x512xf32>
    %285 = arith.addf %272, %284 : vector<32x512xf32>
    %286 = vector.extract_strided_slice %257 {offsets = [0, 482], sizes = [32, 30], strides = [1, 1]} : vector<32x512xf32> to vector<32x30xf32>
    %287 = vector.extract_strided_slice %257 {offsets = [0, 0], sizes = [32, 482], strides = [1, 1]} : vector<32x512xf32> to vector<32x482xf32>
    %288 = tpu.concatenate %286, %287 in 1 : vector<32x30xf32>, vector<32x482xf32> -> vector<32x512xf32>
    %c2_i32_134 = arith.constant 2 : i32
    %289 = vector.broadcast %c2_i32_134 : i32 to vector<1x512xi32>
    %290 = arith.cmpi sge, %0, %289 : vector<1x512xi32>
    %c14_i32 = arith.constant 14 : i32
    %291 = vector.broadcast %c14_i32 : i32 to vector<1x512xi32>
    %292 = arith.cmpi slt, %1, %291 : vector<1x512xi32>
    %293 = arith.andi %290, %292 : vector<1x512xi1>
    %cst_135 = arith.constant 0.000000e+00 : f32
    %294 = vector.shape_cast %293 : vector<1x512xi1> to vector<1x512xi1>
    %295 = vector.broadcast %294 : vector<1x512xi1> to vector<32x512xi1>
    %296 = vector.broadcast %cst_135 : f32 to vector<32x512xf32>
    %297 = arith.select %295, %288, %296 : vector<32x512xi1>, vector<32x512xf32>
    %c2_136 = arith.constant 2 : index
    %c0_137 = arith.constant 0 : index
    %c0_138 = arith.constant 0 : index
    %298 = vector.load %arg5[%c2_136, %c0_137, %c0_138] : memref<9x32x32xf32, #tpu.memory_space<vmem>>, vector<1x32x32xf32>
    %299 = vector.shape_cast %298 : vector<1x32x32xf32> to vector<32x32xf32>
    %cst_139 = arith.constant dense<0.000000e+00> : vector<32x512xf32>
    %300 = tpu.matmul %299, %297, %cst_139 {dimension_numbers = #tpu.dot_dimension_numbers<[1], [0], [0], [1], [0, 0, 1, 1], [], []>} : vector<32x32xf32>, vector<32x512xf32>, vector<32x512xf32> -> vector<32x512xf32>
    %301 = arith.addf %285, %300 : vector<32x512xf32>
    %302 = vector.extract_strided_slice %257 {offsets = [0, 510], sizes = [32, 2], strides = [1, 1]} : vector<32x512xf32> to vector<32x2xf32>
    %303 = vector.extract_strided_slice %257 {offsets = [0, 0], sizes = [32, 510], strides = [1, 1]} : vector<32x512xf32> to vector<32x510xf32>
    %304 = tpu.concatenate %302, %303 in 1 : vector<32x2xf32>, vector<32x510xf32> -> vector<32x512xf32>
    %c2_i32_140 = arith.constant 2 : i32
    %305 = vector.broadcast %c2_i32_140 : i32 to vector<1x512xi32>
    %306 = arith.cmpi sge, %1, %305 : vector<1x512xi32>
    %cst_141 = arith.constant 0.000000e+00 : f32
    %307 = vector.shape_cast %306 : vector<1x512xi1> to vector<1x512xi1>
    %308 = vector.broadcast %307 : vector<1x512xi1> to vector<32x512xi1>
    %309 = vector.broadcast %cst_141 : f32 to vector<32x512xf32>
    %310 = arith.select %308, %304, %309 : vector<32x512xi1>, vector<32x512xf32>
    %c3_142 = arith.constant 3 : index
    %c0_143 = arith.constant 0 : index
    %c0_144 = arith.constant 0 : index
    %311 = vector.load %arg5[%c3_142, %c0_143, %c0_144] : memref<9x32x32xf32, #tpu.memory_space<vmem>>, vector<1x32x32xf32>
    %312 = vector.shape_cast %311 : vector<1x32x32xf32> to vector<32x32xf32>
    %cst_145 = arith.constant dense<0.000000e+00> : vector<32x512xf32>
    %313 = tpu.matmul %312, %310, %cst_145 {dimension_numbers = #tpu.dot_dimension_numbers<[1], [0], [0], [1], [0, 0, 1, 1], [], []>} : vector<32x32xf32>, vector<32x512xf32>, vector<32x512xf32> -> vector<32x512xf32>
    %314 = arith.addf %301, %313 : vector<32x512xf32>
    %c4_146 = arith.constant 4 : index
    %c0_147 = arith.constant 0 : index
    %c0_148 = arith.constant 0 : index
    %315 = vector.load %arg5[%c4_146, %c0_147, %c0_148] : memref<9x32x32xf32, #tpu.memory_space<vmem>>, vector<1x32x32xf32>
    %316 = vector.shape_cast %315 : vector<1x32x32xf32> to vector<32x32xf32>
    %cst_149 = arith.constant dense<0.000000e+00> : vector<32x512xf32>
    %317 = tpu.matmul %316, %257, %cst_149 {dimension_numbers = #tpu.dot_dimension_numbers<[1], [0], [0], [1], [0, 0, 1, 1], [], []>} : vector<32x32xf32>, vector<32x512xf32>, vector<32x512xf32> -> vector<32x512xf32>
    %318 = arith.addf %314, %317 : vector<32x512xf32>
    %319 = vector.extract_strided_slice %257 {offsets = [0, 2], sizes = [32, 510], strides = [1, 1]} : vector<32x512xf32> to vector<32x510xf32>
    %320 = vector.extract_strided_slice %257 {offsets = [0, 0], sizes = [32, 2], strides = [1, 1]} : vector<32x512xf32> to vector<32x2xf32>
    %321 = tpu.concatenate %319, %320 in 1 : vector<32x510xf32>, vector<32x2xf32> -> vector<32x512xf32>
    %c14_i32_150 = arith.constant 14 : i32
    %322 = vector.broadcast %c14_i32_150 : i32 to vector<1x512xi32>
    %323 = arith.cmpi slt, %1, %322 : vector<1x512xi32>
    %cst_151 = arith.constant 0.000000e+00 : f32
    %324 = vector.shape_cast %323 : vector<1x512xi1> to vector<1x512xi1>
    %325 = vector.broadcast %324 : vector<1x512xi1> to vector<32x512xi1>
    %326 = vector.broadcast %cst_151 : f32 to vector<32x512xf32>
    %327 = arith.select %325, %321, %326 : vector<32x512xi1>, vector<32x512xf32>
    %c5_152 = arith.constant 5 : index
    %c0_153 = arith.constant 0 : index
    %c0_154 = arith.constant 0 : index
    %328 = vector.load %arg5[%c5_152, %c0_153, %c0_154] : memref<9x32x32xf32, #tpu.memory_space<vmem>>, vector<1x32x32xf32>
    %329 = vector.shape_cast %328 : vector<1x32x32xf32> to vector<32x32xf32>
    %cst_155 = arith.constant dense<0.000000e+00> : vector<32x512xf32>
    %330 = tpu.matmul %329, %327, %cst_155 {dimension_numbers = #tpu.dot_dimension_numbers<[1], [0], [0], [1], [0, 0, 1, 1], [], []>} : vector<32x32xf32>, vector<32x512xf32>, vector<32x512xf32> -> vector<32x512xf32>
    %331 = arith.addf %318, %330 : vector<32x512xf32>
    %332 = vector.extract_strided_slice %257 {offsets = [0, 30], sizes = [32, 482], strides = [1, 1]} : vector<32x512xf32> to vector<32x482xf32>
    %333 = vector.extract_strided_slice %257 {offsets = [0, 0], sizes = [32, 30], strides = [1, 1]} : vector<32x512xf32> to vector<32x30xf32>
    %334 = tpu.concatenate %332, %333 in 1 : vector<32x482xf32>, vector<32x30xf32> -> vector<32x512xf32>
    %c14_i32_156 = arith.constant 14 : i32
    %335 = vector.broadcast %c14_i32_156 : i32 to vector<1x512xi32>
    %336 = arith.cmpi slt, %0, %335 : vector<1x512xi32>
    %c2_i32_157 = arith.constant 2 : i32
    %337 = vector.broadcast %c2_i32_157 : i32 to vector<1x512xi32>
    %338 = arith.cmpi sge, %1, %337 : vector<1x512xi32>
    %339 = arith.andi %336, %338 : vector<1x512xi1>
    %cst_158 = arith.constant 0.000000e+00 : f32
    %340 = vector.shape_cast %339 : vector<1x512xi1> to vector<1x512xi1>
    %341 = vector.broadcast %340 : vector<1x512xi1> to vector<32x512xi1>
    %342 = vector.broadcast %cst_158 : f32 to vector<32x512xf32>
    %343 = arith.select %341, %334, %342 : vector<32x512xi1>, vector<32x512xf32>
    %c6_159 = arith.constant 6 : index
    %c0_160 = arith.constant 0 : index
    %c0_161 = arith.constant 0 : index
    %344 = vector.load %arg5[%c6_159, %c0_160, %c0_161] : memref<9x32x32xf32, #tpu.memory_space<vmem>>, vector<1x32x32xf32>
    %345 = vector.shape_cast %344 : vector<1x32x32xf32> to vector<32x32xf32>
    %cst_162 = arith.constant dense<0.000000e+00> : vector<32x512xf32>
    %346 = tpu.matmul %345, %343, %cst_162 {dimension_numbers = #tpu.dot_dimension_numbers<[1], [0], [0], [1], [0, 0, 1, 1], [], []>} : vector<32x32xf32>, vector<32x512xf32>, vector<32x512xf32> -> vector<32x512xf32>
    %347 = arith.addf %331, %346 : vector<32x512xf32>
    %348 = vector.extract_strided_slice %257 {offsets = [0, 32], sizes = [32, 480], strides = [1, 1]} : vector<32x512xf32> to vector<32x480xf32>
    %349 = vector.extract_strided_slice %257 {offsets = [0, 0], sizes = [32, 32], strides = [1, 1]} : vector<32x512xf32> to vector<32x32xf32>
    %350 = tpu.concatenate %348, %349 in 1 : vector<32x480xf32>, vector<32x32xf32> -> vector<32x512xf32>
    %c14_i32_163 = arith.constant 14 : i32
    %351 = vector.broadcast %c14_i32_163 : i32 to vector<1x512xi32>
    %352 = arith.cmpi slt, %0, %351 : vector<1x512xi32>
    %cst_164 = arith.constant 0.000000e+00 : f32
    %353 = vector.shape_cast %352 : vector<1x512xi1> to vector<1x512xi1>
    %354 = vector.broadcast %353 : vector<1x512xi1> to vector<32x512xi1>
    %355 = vector.broadcast %cst_164 : f32 to vector<32x512xf32>
    %356 = arith.select %354, %350, %355 : vector<32x512xi1>, vector<32x512xf32>
    %c7_165 = arith.constant 7 : index
    %c0_166 = arith.constant 0 : index
    %c0_167 = arith.constant 0 : index
    %357 = vector.load %arg5[%c7_165, %c0_166, %c0_167] : memref<9x32x32xf32, #tpu.memory_space<vmem>>, vector<1x32x32xf32>
    %358 = vector.shape_cast %357 : vector<1x32x32xf32> to vector<32x32xf32>
    %cst_168 = arith.constant dense<0.000000e+00> : vector<32x512xf32>
    %359 = tpu.matmul %358, %356, %cst_168 {dimension_numbers = #tpu.dot_dimension_numbers<[1], [0], [0], [1], [0, 0, 1, 1], [], []>} : vector<32x32xf32>, vector<32x512xf32>, vector<32x512xf32> -> vector<32x512xf32>
    %360 = arith.addf %347, %359 : vector<32x512xf32>
    %361 = vector.extract_strided_slice %257 {offsets = [0, 34], sizes = [32, 478], strides = [1, 1]} : vector<32x512xf32> to vector<32x478xf32>
    %362 = vector.extract_strided_slice %257 {offsets = [0, 0], sizes = [32, 34], strides = [1, 1]} : vector<32x512xf32> to vector<32x34xf32>
    %363 = tpu.concatenate %361, %362 in 1 : vector<32x478xf32>, vector<32x34xf32> -> vector<32x512xf32>
    %c14_i32_169 = arith.constant 14 : i32
    %364 = vector.broadcast %c14_i32_169 : i32 to vector<1x512xi32>
    %365 = arith.cmpi slt, %0, %364 : vector<1x512xi32>
    %c14_i32_170 = arith.constant 14 : i32
    %366 = vector.broadcast %c14_i32_170 : i32 to vector<1x512xi32>
    %367 = arith.cmpi slt, %1, %366 : vector<1x512xi32>
    %368 = arith.andi %365, %367 : vector<1x512xi1>
    %cst_171 = arith.constant 0.000000e+00 : f32
    %369 = vector.shape_cast %368 : vector<1x512xi1> to vector<1x512xi1>
    %370 = vector.broadcast %369 : vector<1x512xi1> to vector<32x512xi1>
    %371 = vector.broadcast %cst_171 : f32 to vector<32x512xf32>
    %372 = arith.select %370, %363, %371 : vector<32x512xi1>, vector<32x512xf32>
    %c8_172 = arith.constant 8 : index
    %c0_173 = arith.constant 0 : index
    %c0_174 = arith.constant 0 : index
    %373 = vector.load %arg5[%c8_172, %c0_173, %c0_174] : memref<9x32x32xf32, #tpu.memory_space<vmem>>, vector<1x32x32xf32>
    %374 = vector.shape_cast %373 : vector<1x32x32xf32> to vector<32x32xf32>
    %cst_175 = arith.constant dense<0.000000e+00> : vector<32x512xf32>
    %375 = tpu.matmul %374, %372, %cst_175 {dimension_numbers = #tpu.dot_dimension_numbers<[1], [0], [0], [1], [0, 0, 1, 1], [], []>} : vector<32x32xf32>, vector<32x512xf32>, vector<32x512xf32> -> vector<32x512xf32>
    %376 = arith.addf %360, %375 : vector<32x512xf32>
    %377 = vector.broadcast %7 : vector<32x1xf32> to vector<32x512xf32>
    %378 = arith.addf %376, %377 : vector<32x512xf32>
    %cst_176 = arith.constant 0.000000e+00 : f32
    %379 = vector.broadcast %cst_176 : f32 to vector<32x512xf32>
    %380 = arith.maximumf %378, %379 : vector<32x512xf32>
    %c0_177 = arith.constant 0 : index
    %c0_178 = arith.constant 0 : index
    %381 = vector.load %arg6[%c0_177, %c0_178] : memref<32x32xf32, #tpu.memory_space<vmem>>, vector<32x32xf32>
    %cst_179 = arith.constant dense<0.000000e+00> : vector<32x512xf32>
    %382 = tpu.matmul %381, %380, %cst_179 {dimension_numbers = #tpu.dot_dimension_numbers<[1], [0], [0], [1], [0, 0, 1, 1], [], []>} : vector<32x32xf32>, vector<32x512xf32>, vector<32x512xf32> -> vector<32x512xf32>
    %383 = vector.broadcast %8 : vector<32x1xf32> to vector<32x512xf32>
    %384 = arith.addf %382, %383 : vector<32x512xf32>
    %cst_180 = arith.constant 0.000000e+00 : f32
    %385 = vector.broadcast %cst_180 : f32 to vector<32x512xf32>
    %386 = arith.maximumf %384, %385 : vector<32x512xf32>
    %cst_181 = arith.constant 0.000000e+00 : f32
    %387 = vector.shape_cast %4 : vector<1x512xi1> to vector<1x512xi1>
    %388 = vector.broadcast %387 : vector<1x512xi1> to vector<32x512xi1>
    %389 = vector.broadcast %cst_181 : f32 to vector<32x512xf32>
    %390 = arith.select %388, %386, %389 : vector<32x512xi1>, vector<32x512xf32>
    %391 = vector.extract_strided_slice %390 {offsets = [0, 0], sizes = [32, 256], strides = [1, 1]} : vector<32x512xf32> to vector<32x256xf32>
    %cst_182 = arith.constant dense<0.000000e+00> : vector<32xf32>
    %392 = vector.multi_reduction <add>, %391, %cst_182 [1] : vector<32x256xf32> to vector<32xf32>
    %393 = vector.shape_cast %392 : vector<32xf32> to vector<32x1xf32>
    %394 = vector.extract_strided_slice %390 {offsets = [0, 256], sizes = [32, 256], strides = [1, 1]} : vector<32x512xf32> to vector<32x256xf32>
    %cst_183 = arith.constant dense<0.000000e+00> : vector<32xf32>
    %395 = vector.multi_reduction <add>, %394, %cst_183 [1] : vector<32x256xf32> to vector<32xf32>
    %396 = vector.shape_cast %395 : vector<32xf32> to vector<32x1xf32>
    %397 = tpu.concatenate %393, %396 in 1 : vector<32x1xf32>, vector<32x1xf32> -> vector<32x2xf32>
    %398 = vector.broadcast %9 : vector<32x1xf32> to vector<32x2xf32>
    %399 = arith.mulf %397, %398 : vector<32x2xf32>
    %cst_184 = arith.constant dense<0.000000e+00> : vector<2xf32>
    %400 = vector.multi_reduction <add>, %399, %cst_184 [0] : vector<32x2xf32> to vector<2xf32>
    %401 = vector.shape_cast %400 : vector<2xf32> to vector<1x2xf32>
    %cst_185 = arith.constant 1.562500e-02 : f32
    %402 = vector.broadcast %cst_185 : f32 to vector<1x2xf32>
    %403 = arith.mulf %401, %402 : vector<1x2xf32>
    %404 = vector.broadcast %10 : vector<1x1xf32> to vector<1x2xf32>
    %405 = arith.addf %403, %404 : vector<1x2xf32>
    %c0_186 = arith.constant 0 : index
    %c0_187 = arith.constant 0 : index
    %406 = vector.load %arg8[%c0_186, %c0_187] : memref<1x2xf32, #tpu.memory_space<vmem>>, vector<1x2xf32>
    tpu.vector_store %arg8[%c0_186, %c0_187], %405 {strides = array<i32>} : memref<1x2xf32, #tpu.memory_space<vmem>>, vector<1x2xf32>,
    return
  }
  func.func @transform_0(%arg0: i32) -> (i32, i32) {
    %c0_i32 = arith.constant 0 : i32
    %c0_i32_0 = arith.constant 0 : i32
    %c0_i32_1 = arith.constant 0 : i32
    return %c0_i32, %c0_i32_0 : i32, i32
  }
  func.func @transform_1(%arg0: i32) -> (i32, i32) {
    %c0_i32 = arith.constant 0 : i32
    %c0_i32_0 = arith.constant 0 : i32
    %c0_i32_1 = arith.constant 0 : i32
    return %c0_i32, %c0_i32_0 : i32, i32
  }
  func.func @transform_2(%arg0: i32) -> (i32, i32, i32) {
    %c0_i32 = arith.constant 0 : i32
    %c0_i32_0 = arith.constant 0 : i32
    %c0_i32_1 = arith.constant 0 : i32
    %c0_i32_2 = arith.constant 0 : i32
    return %c0_i32, %c0_i32_0, %c0_i32_1 : i32, i32, i32
  }
  func.func @transform_3(%arg0: i32) -> (i32, i32, i32) {
    %c0_i32 = arith.constant 0 : i32
    %c0_i32_0 = arith.constant 0 : i32
    %c0_i32_1 = arith.constant 0 : i32
    %c0_i32_2 = arith.constant 0 : i32
    return %c0_i32, %c0_i32_0, %c0_i32_1 : i32, i32, i32
  }
  func.func @transform_4(%arg0: i32) -> (i32, i32, i32) {
    %c0_i32 = arith.constant 0 : i32
    %c0_i32_0 = arith.constant 0 : i32
    %c0_i32_1 = arith.constant 0 : i32
    %c0_i32_2 = arith.constant 0 : i32
    return %c0_i32, %c0_i32_0, %c0_i32_1 : i32, i32, i32
  }
  func.func @transform_5(%arg0: i32) -> (i32, i32) {
    %c0_i32 = arith.constant 0 : i32
    %c0_i32_0 = arith.constant 0 : i32
    %c0_i32_1 = arith.constant 0 : i32
    return %c0_i32, %c0_i32_0 : i32, i32
  }
  func.func @transform_6(%arg0: i32) -> (i32, i32) {
    %c0_i32 = arith.constant 0 : i32
    %c0_i32_0 = arith.constant 0 : i32
    %c0_i32_1 = arith.constant 0 : i32
    return %c0_i32, %c0_i32_0 : i32, i32
  }
  func.func @transform_7(%arg0: i32) -> (i32, i32) {
    %c0_i32 = arith.constant 0 : i32
    %c0_i32_0 = arith.constant 0 : i32
    %c0_i32_1 = arith.constant 0 : i32
    return %c0_i32, %c0_i32_0 : i32, i32
  }
}

</mosaic_0001>

<bundles_post_ra>
// kernel: discriminator_forward.1
= control target key start
LH: loop header
LB: loop body
LE: loop exit
PB: predicated region body
PF: predicated region fallthrough
CT: control target
= control target key end

     0   :  { %s9948_s0 = inlined_call_operand.vmem [shape: f32[3,512], index: 0, kind: input, shape index: {}]   ;;  %s9949_s1 = inlined_call_operand.vmem [shape: s32[3,512], index: 1, kind: input, shape index: {}]   ;;  %s9950_s2 = inlined_call_operand.vmem [shape: f32[9,16,3], index: 2, kind: input, shape index: {}]   ;;  %s9951_s3 = inlined_call_operand.vmem [shape: f32[9,32,16], index: 3, kind: input, shape index: {}]   ;;  %s9952_s4 = inlined_call_operand.vmem [shape: f32[9,32,32], index: 4, kind: input, shape index: {}]   ;;  %s9953_s5 = inlined_call_operand.vmem [shape: f32[32,32], index: 5, kind: input, shape index: {}]   ;;  %s9954_s6 = inlined_call_operand.vmem [shape: f32[32,8], index: 6, kind: input, shape index: {}]   ;;  %s9955_s7 = inlined_call_operand.hbm [shape: f32[1,2], index: 7, kind: output, shape index: {}]  }
   0x1   :  { %v6423_v0 = vld [vmem:[%s9948_s0 + $0x8] sm:$0x77] }
   0x2   :  { %49 = vst [vmem:[#allocation1 + $0x10] ss:$2 sm:$0xff] %v6423_v0 }
   0x3   :  { %12 = vsyncpa [#allocation3], 0  ;;  %41 = vst [vmem:[#allocation1] ss:$2 sm:$0xff] %v6423_v0  ;;  %v6430_v1 = vld [vmem:[%s9948_s0] sm:$0x77] }
   0x4   :  { %s6357_s28 = smov 16   ;;  %s6358_s0 = smov 17   ;;  %v10019_v40 = vmov 0   ;;  %v6504_v46 = vld [vmem:[%s9949_s1 + $0x1] ss:$4 sm:$0xf] }
   0x5   :  { %s6359_s29 = smov 15   ;;  %s6360_s30 = smov 1   ;;  %6307 = vset.pattern.permute.xlu1 %v10019_v40  ;;  %6308 = vset.pattern.permute.xlu2 %v10019_v40  ;;  %v6510_v47 = vld [vmem:[%s9949_s1] ss:$4 sm:$0xf]  ;;  %vm9960_vm0 = vcmp.ge.s32.totalorder %v6504_v46, 1 }
   0x6   :  { %s6361_s8 = smov 127   ;;  %s6362_s9 = smov 113   ;;  %vm71_vm1 = vcmp.ge.s32.totalorder %v6510_v47, 1  ;;  %vm9958_vm3 = vcmask 138240   ;;  %vm9956_vm4 = vcmask 130048   ;;  %v10090_v58 = vmov 0 }
   0x7   :  { %s6363_s10 = smov 112   ;;  %s6365_s11 = smov 111   ;;  %vm73_vm2 = vmand %vm71_vm1, %vm9960_vm0  ;;  %v118_v51 = vsel %vm71_vm1, 1, %v10019_v40  ;;  %v10093_v59 = vmov 0  ;;  %v10096_v61 = vmov 0  ;;  %vm9971_vm8 = vcmask 1042432  }
   0x8   :  { %v6526_v52 = vsel %vm73_vm2, 1, %v10019_v40  ;;  %v120_v53 = vperm.slane %v118_v51, 1  ;;  %v119_v54 = vperm.slane %v118_v51, 0  ;;  %vm9970_vm9 = vcmask 23552   ;;  %s6370_s24 = smov 2   ;;  %s6371_s14 = smov 126  }
   0x9   :  { %v52_v2 = vld.sshfl [vmem:[#allocation1 + $0x10] sm:$0xff pattern:$0x75316420]  ;;  %v53_v3 = vld.sshfl [vmem:[#allocation1 + $0x18] sm:$0xff pattern:$0x75316420] }
   0xa   :  { %96 = vst [vmem:[#allocation1 + $0x10] ss:$2 sm:$0xff] %v6423_v0  ;;  %v42_v4 = vld.sshfl [vmem:[#allocation1 + $0x8] sm:$0xff pattern:$0x75316420]  ;;  %v76_v55 = vperm.slane %v6526_v52, 1 }
   0xb   :  { %47 = vst [vmem:[#allocation1] ss:$2 sm:$0xff] %v6430_v1  ;;  %vm6532_vm5 = vcmp.eq.s32.totalorder %v120_v53, 1  ;;  %vm6536_vm6 = vcmp.eq.s32.totalorder %v119_v54, 1  ;;  %vm9957_vm10 = vcmp.lt.s32.totalorder %v6504_v46, 15  ;;  %vm9959_vm2 = vcmask 121856  }
   0xc   :  { %v10091_v58 = vsel %vm6532_vm5, 4294967295, %v10090_v58  ;;  %v10094_v59 = vsel %vm6536_vm6, 4294967295, %v10093_v59  ;;  %vm6543_vm7 = vcmp.eq.s32.totalorder %v76_v55, 1  ;;  %vm386_vm11 = vmand %vm71_vm1, %vm9957_vm10  ;;  %s6372_s20 = smov 98   ;;  %s6374_s18 = smov 94  }
   0xd   :  { %10092 = vst [vmem:[#allocation5_spill] sm:$0xff] %v10091_v58  ;;  %v10097_v61 = vsel %vm6543_vm7, 4294967295, %v10096_v61 }
   0xe   :  { %10095 = vst [vmem:[#allocation6_spill] sm:$0xff] %v10094_v59 }
   0xf   :  { %10098 = vst [vmem:[#allocation7_spill] sm:$0xff] %v10097_v61 }
  0x11   :  { %v100_v5 = vld.sshfl [vmem:[#allocation1 + $0x18] sm:$0xff pattern:$0x75316420]  ;;  %v99_v8 = vld.sshfl [vmem:[#allocation1 + $0x10] sm:$0xff pattern:$0x75316420] }
  0x12   :  { %107 = vrot.lane.b32.xlu1 %v100_v5, %s6357_s28  ;;  %v50_v6 = vld.sshfl [vmem:[#allocation1] sm:$0xff pattern:$0x75316420]  ;;  %v51_v7 = vld.sshfl [vmem:[#allocation1 + $0x8] sm:$0xff pattern:$0x75316420] }
  0x13   :  { %89 = vst [vmem:[#allocation1] ss:$2 sm:$0xff] %v6423_v0 }
  0x14   :  { %363 = vst [vmem:[#allocation1 + $0x10] ss:$2 sm:$0xff] %v6423_v0 }
  0x1a   :  { %v90_v9 = vld.sshfl [vmem:[#allocation1 + $0x8] sm:$0xff pattern:$0x75316420] }
  0x1b   :  { %94 = vst [vmem:[#allocation1] ss:$2 sm:$0xff] %v6430_v1  ;;  %91 = vrot.lane.b32.xlu2 %v90_v9, %s6357_s28  ;;  %v366_v10 = vld.sshfl [vmem:[#allocation1 + $0x10] sm:$0xff pattern:$0x75316420]  ;;  %v10102_v9 = vmov 0 }
  0x1c   :  { %v367_v11 = vld.sshfl [vmem:[#allocation1 + $0x18] sm:$0xff pattern:$0x75316420] }
  0x1d   :  { %528 = vst [vmem:[#allocation1 + $0x10] ss:$2 sm:$0xff] %v6423_v0 }
  0x22   :  { %v98_v12 = vld.sshfl [vmem:[#allocation1 + $0x8] sm:$0xff pattern:$0x75316420]  ;;  %v97_v13 = vld.sshfl [vmem:[#allocation1] sm:$0xff pattern:$0x75316420] }
  0x23   :  { %103 = vrot.lane.b32.xlu0 %v98_v12, %s6357_s28  ;;  %101 = vrot.lane.b32.xlu1 %v97_v13, %s6357_s28  ;;  %356 = vst [vmem:[#allocation1] ss:$2 sm:$0xff] %v6423_v0 }
  0x24   :  { %56 = vrot.lane.b32.xlu2 %v51_v7, %s6358_s0  ;;  %v531_v15 = vld.sshfl [vmem:[#allocation1 + $0x10] sm:$0xff pattern:$0x75316420]  ;;  %v532_v18 = vld.sshfl [vmem:[#allocation1 + $0x18] sm:$0xff pattern:$0x75316420] }
  0x25   :  { %689 = vst [vmem:[#allocation1 + $0x10] ss:$2 sm:$0xff] %v6423_v0  ;;  %v122_v7 = vperm.slane %v118_v51, 3 }
  0x27   :  { %vm6573_vm13 = vcmp.eq.s32.totalorder %v122_v7, 1 }
  0x28   :  { %v10103_v9 = vsel %vm6573_vm13, 4294967295, %v10102_v9 }
  0x29   :  { %10104 = vst [vmem:[#allocation9_spill] sm:$0xff] %v10103_v9 }
  0x2a   :  { %v357_v14 = vld.sshfl [vmem:[#allocation1 + $0x8] sm:$0xff pattern:$0x75316420] }
  0x2b   :  { %105 = vrot.lane.b32.xlu0 %v99_v8, %s6357_s28  ;;  %60 = vrot.lane.b32.xlu1 %v53_v3, %s6358_s0  ;;  %361 = vst [vmem:[#allocation1] ss:$2 sm:$0xff] %v6430_v1  ;;  %v10099_v8 = vmov 0 }
  0x2c   :  { %54 = vrot.lane.b32.xlu2 %v50_v6, %s6358_s0  ;;  %v6456_v20 = vld.sshfl [vmem:[#allocation1 + $0x10] sm:$0xff pattern:$0x75316420]  ;;  %v6459_v21 = vld.sshfl [vmem:[#allocation1 + $0x18] sm:$0xff pattern:$0x75316420] }
  0x2d   :  { %810 = vst [vmem:[#allocation1 + $0x10] ss:$2 sm:$0xff] %v6423_v0  ;;  %v121_v6 = vperm.slane %v118_v51, 2  ;;  %v88_v51 = vld [vmem:[%s9950_s2 + $0x8] sm:$0xff] }
  0x2f   :  { %vm6569_vm12 = vcmp.eq.s32.totalorder %v121_v6, 1 }
  0x30   :  { %v10100_v8 = vsel %vm6569_vm12, 4294967295, %v10099_v8 }
  0x31   :  { %10101 = vst [vmem:[#allocation8_spill] sm:$0xff] %v10100_v8 }
  0x32   :  { %v365_v16 = vld.sshfl [vmem:[#allocation1 + $0x8] sm:$0xff pattern:$0x75316420]  ;;  %v364_v17 = vld.sshfl [vmem:[#allocation1] sm:$0xff pattern:$0x75316420] }
  0x33   :  { %58 = vrot.lane.b32.xlu0 %v52_v2, %s6358_s0  ;;  %370 = vrot.lane.b32.xlu1 %v365_v16, %s6359_s29  ;;  %521 = vst [vmem:[#allocation1] ss:$2 sm:$0xff] %v6423_v0 }
  0x34   :  { %372 = vrot.lane.b32.xlu2 %v366_v10, %s6359_s29  ;;  %v813_v24 = vld.sshfl [vmem:[#allocation1 + $0x10] sm:$0xff pattern:$0x75316420]  ;;  %v814_v25 = vld.sshfl [vmem:[#allocation1 + $0x18] sm:$0xff pattern:$0x75316420] }
  0x35   :  { %973 = vst [vmem:[#allocation1 + $0x10] ss:$2 sm:$0xff] %v6423_v0 }
  0x3a   :  { %v522_v19 = vld.sshfl [vmem:[#allocation1 + $0x8] sm:$0xff pattern:$0x75316420] }
  0x3b   :  { %43 = vrot.lane.b32.xlu0 %v42_v4, %s6358_s0  ;;  %368 = vrot.lane.b32.xlu1 %v364_v17, %s6359_s29  ;;  %526 = vst [vmem:[#allocation1] ss:$2 sm:$0xff] %v6430_v1  ;;  %v387_v17 = vsel %vm386_vm11, 1, %v10019_v40 }
  0x3c   :  { %358 = vrot.lane.b32.xlu2 %v357_v14, %s6359_s29  ;;  %v976_v28 = vld.sshfl [vmem:[#allocation1 + $0x10] sm:$0xff pattern:$0x75316420]  ;;  %v977_v29 = vld.sshfl [vmem:[#allocation1 + $0x18] sm:$0xff pattern:$0x75316420] }
  0x3d   :  { %1138 = vst [vmem:[#allocation1 + $0x10] ss:$2 sm:$0xff] %v6423_v0  ;;  %v5601_v14 = vld [vmem:[%s9950_s2 + $0x18] sm:$0xff] }
  0x42   :  { %v530_v22 = vld.sshfl [vmem:[#allocation1 + $0x8] sm:$0xff pattern:$0x75316420]  ;;  %v529_v23 = vld.sshfl [vmem:[#allocation1] sm:$0xff pattern:$0x75316420] }
  0x43   :  { %374 = vrot.lane.b32.xlu0 %v367_v11, %s6359_s29  ;;  %537 = vrot.lane.b32.xlu1 %v531_v15, %s6360_s30  ;;  %687 = vst [vmem:[#allocation1] ss:$2 sm:$0xff] %v6430_v1 }
  0x44   :  { %539 = vrot.lane.b32.xlu2 %v532_v18, %s6360_s30  ;;  %v1141_v35 = vld.sshfl [vmem:[#allocation1 + $0x10] sm:$0xff pattern:$0x75316420]  ;;  %v1142_v36 = vld.sshfl [vmem:[#allocation1 + $0x18] sm:$0xff pattern:$0x75316420] }
  0x45   :  { %1301 = vst [vmem:[#allocation1 + $0x10] ss:$2 sm:$0xff] %v6423_v0  ;;  %v77_v18 = vperm.slane %v6526_v52, 2 }
  0x47   :  { %vm6595_vm14 = vcmp.eq.s32.totalorder %v77_v18, 1 }
  0x4a   :  { %v6467_v26 = vld.sshfl [vmem:[#allocation1] sm:$0xff pattern:$0x75316420]  ;;  %v6469_v27 = vld.sshfl [vmem:[#allocation1 + $0x8] sm:$0xff pattern:$0x75316420] }
  0x4b   :  { %535 = vrot.lane.b32.xlu0 %v530_v22, %s6360_s30  ;;  %808 = vst [vmem:[#allocation1] ss:$2 sm:$0xff] %v6430_v1  ;;  %523 = vrot.lane.b32.xlu1 %v522_v19, %s6360_s30  ;;  %v78_v19 = vperm.slane %v6526_v52, 3 }
  0x4c   :  { %819 = vrot.lane.b32.xlu2 %v813_v24, %s6361_s8  ;;  %v1305_v43 = vld.sshfl [vmem:[#allocation1 + $0x18] sm:$0xff pattern:$0x75316420]  ;;  %v1304_v57 = vld.sshfl [vmem:[#allocation1 + $0x10] sm:$0xff pattern:$0x75316420] }
  0x4d   :  { %v10105_v24 = vmov 0  ;;  %vm6599_vm15 = vcmp.eq.s32.totalorder %v78_v19, 1 }
  0x4e   :  { %v10106_v24 = vsel %vm6595_vm14, 4294967295, %v10105_v24 }
  0x4f   :  { %10107 = vst [vmem:[#allocation10_spill] sm:$0xff] %v10106_v24 }
  0x52   :  { %v811_v30 = vld.sshfl [vmem:[#allocation1] sm:$0xff pattern:$0x75316420]  ;;  %v812_v31 = vld.sshfl [vmem:[#allocation1 + $0x8] sm:$0xff pattern:$0x75316420] }
  0x53   :  { %533 = vrot.lane.b32.xlu0 %v529_v23, %s6360_s30  ;;  %831 = vst [vmem:[#allocation1] ss:$2 sm:$0xff] %v6430_v1  ;;  %v390_v23 = vperm.slane %v387_v17, 2 }
  0x54   :  { %817 = vrot.lane.b32.xlu2 %v812_v31, %s6361_s8 }
  0x55   :  { %vm6603_vm1 = vcmp.eq.s32.totalorder %v390_v23, 1 }
  0x5a   :  { %v832_v32 = vld.sshfl [vmem:[#allocation1] sm:$0xff pattern:$0x75316420] }
  0x5b   :  { %821 = vrot.lane.b32.xlu0 %v814_v25, %s6361_s8  ;;  %833 = vrot.lane.b32.xlu1 %v832_v32, %s6361_s8  ;;  %971 = vst [vmem:[#allocation1] ss:$2 sm:$0xff] %v6430_v1  ;;  %v10108_v25 = vmov 0  ;;  %v87_v32 = vld [vmem:[%s9950_s2] sm:$0xff] }
  0x5c   :  { %984 = vrot.lane.b32.xlu2 %v977_v29, %s6362_s9  ;;  %v10109_v25 = vsel %vm6599_vm15, 4294967295, %v10108_v25 }
  0x5d   :  { %10110 = vst [vmem:[#allocation11_spill] sm:$0xff] %v10109_v25 }
  0x62   :  { %v975_v33 = vld.sshfl [vmem:[#allocation1 + $0x8] sm:$0xff pattern:$0x75316420]  ;;  %v974_v34 = vld.sshfl [vmem:[#allocation1] sm:$0xff pattern:$0x75316420] }
  0x63   :  { %815 = vrot.lane.b32.xlu0 %v811_v30, %s6361_s8  ;;  %982 = vrot.lane.b32.xlu1 %v976_v28, %s6362_s9  ;;  %994 = vst [vmem:[#allocation1] ss:$2 sm:$0xff] %v6430_v1  ;;  %v10111_v28 = vmov 0 }
  0x64   :  { %978 = vrot.lane.b32.xlu2 %v974_v34, %s6362_s9  ;;  %v10112_v28 = vsel %vm6603_vm1, 4294967295, %v10111_v28 }
  0x65   :  { %10113 = vst [vmem:[#allocation12_spill] sm:$0xff] %v10112_v28 }
  0x6a   :  { %v995_v37 = vld.sshfl [vmem:[#allocation1] sm:$0xff pattern:$0x75316420] }
  0x6b   :  { %980 = vrot.lane.b32.xlu1 %v975_v33, %s6362_s9  ;;  %996 = vrot.lane.b32.xlu0 %v995_v37, %s6362_s9  ;;  %1136 = vst [vmem:[#allocation1] ss:$2 sm:$0xff] %v6430_v1 }
  0x72   :  { %v1140_v38 = vld.sshfl [vmem:[#allocation1 + $0x8] sm:$0xff pattern:$0x75316420]  ;;  %v1139_v39 = vld.sshfl [vmem:[#allocation1] sm:$0xff pattern:$0x75316420] }
  0x73   :  { %1147 = vrot.lane.b32.xlu0 %v1141_v35, %s6363_s10  ;;  %1149 = vrot.lane.b32.xlu1 %v1142_v36, %s6363_s10  ;;  %1159 = vst [vmem:[#allocation1] ss:$2 sm:$0xff] %v6430_v1 }
  0x75   :  { %v92_v42 = vpop.permute.xlu2 %91 }
  0x7a   :  { %v1160_v41 = vld.sshfl [vmem:[#allocation1] sm:$0xff pattern:$0x75316420] }
  0x7b   :  { %1145 = vrot.lane.b32.xlu0 %v1140_v38, %s6363_s10  ;;  %1143 = vrot.lane.b32.xlu1 %v1139_v39, %s6363_s10  ;;  %1299 = vst [vmem:[#allocation1] ss:$2 sm:$0xff] %v6430_v1  ;;  %v75_v38 = vperm.slane %v6526_v52, 0  ;;  %v389_v39 = vperm.slane %v387_v17, 1 }
  0x7c   :  { %1161 = vrot.lane.b32.xlu2 %v1160_v41, %s6363_s10  ;;  %v388_v41 = vperm.slane %v387_v17, 0 }
  0x7d   :  { %vm6627_vm11 = vcmp.eq.s32.totalorder %v75_v38, 1 }
  0x7e   :  { %v6512_v48 = vpop.permute.xlu2 %56  ;;  %vm6635_vm10 = vcmp.eq.s32.totalorder %v388_v41, 1 }
  0x82   :  { %v1302_v44 = vld.sshfl [vmem:[#allocation1] sm:$0xff pattern:$0x75316420]  ;;  %v1303_v45 = vld.sshfl [vmem:[#allocation1 + $0x8] sm:$0xff pattern:$0x75316420] }
  0x83   :  { %1312 = vrot.lane.b32.xlu0 %v1305_v43, %s6365_s11  ;;  %1322 = vst [vmem:[#allocation1] ss:$2 sm:$0xff] %v6430_v1  ;;  %v5600_v1 = vld [vmem:[%s9950_s2 + $0x10] sm:$0xff]  ;;  %v10114_v43 = vmov 0 }
  0x84   :  { %v108_v49 = vpop.permute.xlu1 %107  ;;  %1310 = vrot.lane.b32.xlu2 %v1304_v57, %s6365_s11  ;;  %v10115_v43 = vsel %vm6627_vm11, 4294967295, %v10114_v43  ;;  %v391_v57 = vperm.slane %v387_v17, 3 }
  0x85   :  { %10116 = vst [vmem:[#allocation13_spill] sm:$0xff] %v10115_v43 }
  0x86   :  { %v6529_v56 = vpop.permute.xlu2 %54 }
  0x87   :  { %v63_v60 = vsel %vm9958_vm3, %v6529_v56, %v6512_v48 }
  0x88   :  { %v84_v5 = vsel %vm6543_vm7, %v63_v60, 0.0  ;;  %v550_v60 = vsel %vm9960_vm0, 1, %v10019_v40 }
  0x89   :  { %v552_v18 = vperm.slane %v550_v60, 1  ;;  %v551_v19 = vperm.slane %v550_v60, 0 }
  0x8a   :  { %v1323_v50 = vld.sshfl [vmem:[#allocation1] sm:$0xff pattern:$0x75316420] }
  0x8b   :  { %1306 = vrot.lane.b32.xlu0 %v1302_v44, %s6365_s11  ;;  %1324 = vrot.lane.b32.xlu1 %v1323_v50, %s6365_s11  ;;  %v10117_v44 = vmov 0 }
  0x8c   :  { %1308 = vrot.lane.b32.xlu2 %v1303_v45, %s6365_s11 }
  0x8e   :  { %v373_v22 = vpop.permute.xlu2 %372 }
  0x95   :  { %v104_v62 = vpop.permute.xlu0 %103  ;;  %v102_v63 = vpop.permute.xlu1 %101 }
  0x96   :  { %v110_v0 = vsel %vm9956_vm4, %v102_v63, %v104_v62  ;;  %v117_v2 = vsel %vm9956_vm4, %v92_v42, %v102_v63  ;;  %v359_v42 = vpop.permute.xlu2 %358 }
  0x97   :  { %v128_v3 = vsel %vm6532_vm5, %v110_v0, 0.0  ;;  %v127_v4 = vsel %vm6536_vm6, %v117_v2, 0.0  ;;  %v10123_v0 = vmov 0 }
  0x98   :  { %5605 = vmatpush.msk.msra.mxu1 %vm9971_vm8, %v128_v3  ;;  %5602 = vmatpush.msk.msra.mxu0 %vm9971_vm8, %v127_v4  ;;  %v10126_v3 = vmov 0 }
  0x99   :  { %5606 = vmatmul.msk.f32.vlgmr.msra.gmra.mxu1 %vm9970_vm9, %v5600_v1  ;;  %5603 = vmatmul.msk.f32.vlgmr.msra.gmra.mxu0 %vm9970_vm9, %v5600_v1 }
  0x9a   :  { %5617 = vmatpush.msk.msrb.mxu1 %vm9971_vm8, %v84_v5  ;;  %v5626_v5 = vld [vmem:[%s9950_s2 + $0x20] sm:$0xff] }
  0x9d   :  { %v106_v10 = vpop.permute.xlu0 %105  ;;  %v61_v11 = vpop.permute.xlu1 %60 }
  0x9e   :  { %v111_v12 = vsel %vm9956_vm4, %v104_v62, %v106_v10  ;;  %v112_v13 = vsel %vm9956_vm4, %v106_v10, %v108_v49  ;;  %vm6631_vm4 = vcmp.eq.s32.totalorder %v389_v39, 1  ;;  %v10120_v49 = vmov 0  ;;  %v540_v63 = vpop.permute.xlu2 %539 }
  0x9f   :  { %v129_v15 = vsel %vm6569_vm12, %v111_v12, 0.0  ;;  %v130_v16 = vsel %vm6573_vm13, %v112_v13, 0.0  ;;  %v10118_v44 = vsel %vm6631_vm4, 4294967295, %v10117_v44  ;;  %v10121_v49 = vsel %vm6635_vm10, 4294967295, %v10120_v49 }
  0xa0   :  { %5608 = vmatpush.msk.msra.mxu2 %vm9971_vm8, %v129_v15  ;;  %5611 = vmatpush.msk.msra.mxu3 %vm9971_vm8, %v130_v16  ;;  %10119 = vst [vmem:[#allocation14_spill] sm:$0xff] %v10118_v44  ;;  %v554_v62 = vperm.slane %v550_v60, 3  ;;  %v553_v10 = vperm.slane %v550_v60, 2  ;;  %v10130_v13 = vmov 0  ;;  %v5627_v15 = vld [vmem:[%s9950_s2 + $0x28] sm:$0xff] }
  0xa1   :  { %5607 = vmatmul.msk.f32.gmra.mxu1 %vm9970_vm9, %v5601_v14  ;;  %5609 = vmatmul.msk.f32.vlgmr.msra.gmra.mxu2 %vm9970_vm9, %v5600_v1  ;;  %10122 = vst [vmem:[#allocation15_spill] sm:$0xff] %v10121_v49 }
  0xa2   :  { %5612 = vmatmul.msk.f32.vlgmr.msra.gmra.mxu3 %vm9970_vm9, %v5600_v1  ;;  %5604 = vmatmul.msk.f32.gmra.mxu0 %vm9970_vm9, %v5601_v14  ;;  %vm6666_vm0 = vcmp.eq.s32.totalorder %v554_v62, 1 }
  0xa3   :  { %v10127_v3 = vsel %vm6666_vm0, 4294967295, %v10126_v3 }
  0xa4   :  { %10128 = vst [vmem:[#allocation17_spill] sm:$0xff] %v10127_v3 }
  0xa5   :  { %v59_v29 = vpop.permute.xlu0 %58  ;;  %v371_v30 = vpop.permute.xlu1 %370 }
  0xa6   :  { %v65_v31 = vsel %vm9958_vm3, %v59_v29, %v61_v11  ;;  %v64_v33 = vsel %vm9958_vm3, %v6512_v48, %v59_v29  ;;  %v378_v34 = vsel %vm9959_vm2, %v371_v30, %v373_v22  ;;  %v820_v12 = vpop.permute.xlu2 %819 }
  0xa7   :  { %v85_v35 = vsel %vm6595_vm14, %v64_v33, 0.0  ;;  %v86_v36 = vsel %vm6599_vm15, %v65_v31, 0.0  ;;  %v398_v37 = vsel %vm6603_vm1, %v378_v34, 0.0  ;;  %vm10129_vm1 = vcmask 121856  }
  0xa8   :  { %5620 = vmatpush.msk.msrb.mxu2 %vm9971_vm8, %v85_v35  ;;  %5623 = vmatpush.msk.msrb.mxu3 %vm9971_vm8, %v86_v36  ;;  %v10134_v31 = vmov 0  ;;  %v10142_v36 = vmov 0 }
  0xa9   :  { %5610 = vmatmul.msk.f32.gmra.mxu2 %vm9970_vm9, %v5601_v14  ;;  %5618 = vmatmul.msk.f32.vlgmr.msrb.gmra.mxu1 %vm9970_vm9, %v87_v32 }
  0xaa   :  { %5613 = vmatmul.msk.f32.gmra.mxu3 %vm9970_vm9, %v5601_v14  ;;  %5634 = vmatpush.msk.msra.mxu2 %vm9971_vm8, %v398_v37 }
  0xad   :  { %v44_v45 = vpop.permute.xlu0 %43  ;;  %v369_v48 = vpop.permute.xlu1 %368 }
  0xae   :  { %v70_v50 = vsel %vm9958_vm3, %v44_v45, %v6529_v56  ;;  %v377_v52 = vsel %vm9959_vm2, %v369_v48, %v371_v30  ;;  %v384_v53 = vsel %vm9959_vm2, %v359_v42, %v369_v48  ;;  %vm6662_vm3 = vcmp.eq.s32.totalorder %v391_v57, 1  ;;  %v818_v29 = vpop.permute.xlu2 %817 }
  0xaf   :  { %v83_v54 = vsel %vm6627_vm11, %v70_v50, 0.0  ;;  %v397_v55 = vsel %vm6631_vm4, %v377_v52, 0.0  ;;  %v396_v56 = vsel %vm6635_vm10, %v384_v53, 0.0  ;;  %v10124_v0 = vsel %vm6662_vm3, 4294967295, %v10123_v0  ;;  %v5641_v52 = vld [vmem:[%s9950_s2 + $0x38] sm:$0xff] }
  0xb0   :  { %5614 = vmatpush.msk.msrb.mxu0 %vm9971_vm8, %v83_v54  ;;  %5631 = vmatpush.msk.msra.mxu1 %vm9971_vm8, %v397_v55  ;;  %10125 = vst [vmem:[#allocation16_spill] sm:$0xff] %v10124_v0  ;;  %vm9965_vm2 = vcmask 7168   ;;  %vm10145_vm4 = vcmask 1042432   ;;  %vm10147_vm10 = vcmask 23552   ;;  %v10153_v48 = vmov 0 }
  0xb1   :  { %5615 = vmatmul.msk.f32.vlgmr.msrb.gmra.mxu0 %vm9970_vm9, %v87_v32  ;;  %5619 = vmatmul.msk.f32.gmra.mxu1 %vm9970_vm9, %v88_v51  ;;  %vm10148_vm14 = vmmov %vm10147_vm10 }
  0xb2   :  { %5621 = vmatmul.msk.f32.vlgmr.msrb.gmra.mxu2 %vm9970_vm9, %v87_v32  ;;  %5624 = vmatmul.msk.f32.vlgmr.msrb.gmra.mxu3 %vm9970_vm9, %v87_v32  ;;  %v10137_v32 = vmov 0 }
  0xb3   :  { %5628 = vmatpush.msk.msra.mxu0 %vm9971_vm8, %v396_v56  ;;  %v10167_v56 = vmov 0 }
  0xb5   :  { %v375_v1 = vpop.permute.xlu0 %374  ;;  %v538_v2 = vpop.permute.xlu1 %537 }
  0xb6   :  { %v379_v4 = vsel %vm10129_vm1, %v373_v22, %v375_v1  ;;  %v544_v6 = vsel %vm9965_vm2, %v538_v2, %v540_v63  ;;  %vm6685_vm1 = vcmp.eq.s32.totalorder %v553_v10, 1  ;;  %v985_v57 = vpop.permute.xlu2 %984  ;;  %v5654_v1 = vld [vmem:[%s9950_s2 + $0x40] sm:$0xff] }
  0xb7   :  { %v399_v7 = vsel %vm6662_vm3, %v379_v4, 0.0  ;;  %v562_v11 = vsel %vm6666_vm0, %v544_v6, 0.0  ;;  %v10131_v13 = vsel %vm6685_vm1, 4294967295, %v10130_v13  ;;  %vm10133_vm0 = vcmp.lt.s32.totalorder %v6504_v46, 15 }
  0xb8   :  { %5637 = vmatpush.msk.msra.mxu3 %vm9971_vm8, %v399_v7  ;;  %10132 = vst [vmem:[#allocation18_spill] sm:$0xff] %v10131_v13  ;;  %v837_v22 = vsel %vm10133_vm0, 1, %v10019_v40  ;;  %vm6711_vm3 = vcmp.eq.s32.totalorder %v551_v19, 1  ;;  %vm10140_vm0 = vcmask 7168   ;;  %v5655_v19 = vld [vmem:[%s9950_s2 + $0x48] sm:$0xff] }
  0xb9   :  { %5616 = vmatmul.msk.f32.gmra.mxu0 %vm9970_vm9, %v88_v51  ;;  %5632 = vmatmul.msk.f32.vlgmr.msra.gmra.mxu1 %vm9970_vm9, %v5626_v5  ;;  %v839_v30 = vperm.slane %v837_v22, 1  ;;  %v10138_v32 = vsel %vm6711_vm3, 4294967295, %v10137_v32  ;;  %v840_v39 = vperm.slane %v837_v22, 2  ;;  %v841_v42 = vperm.slane %v837_v22, 3 }
  0xba   :  { %5622 = vmatmul.msk.f32.gmra.mxu2 %vm9970_vm9, %v88_v51  ;;  %5625 = vmatmul.msk.f32.gmra.mxu3 %vm9970_vm9, %v88_v51  ;;  %10139 = vst [vmem:[#allocation20_spill] sm:$0xff] %v10138_v32  ;;  %v10156_v51 = vmov 0  ;;  %v838_v55 = vperm.slane %v837_v22, 0 }
  0xbb   :  { %5651 = vmatpush.msk.msrb.mxu3 %vm9971_vm8, %v562_v11 }
  0xbc   :  { %vm6770_vm7 = vcmp.eq.s32.totalorder %v838_v55, 1 }
  0xbd   :  { %v536_v14 = vpop.permute.xlu0 %535  ;;  %v524_v23 = vpop.permute.xlu1 %523  ;;  %v10168_v56 = vsel %vm6770_vm7, 4294967295, %v10167_v56 }
  0xbe   :  { %v543_v16 = vsel %vm9965_vm2, %v536_v14, %v538_v2  ;;  %vm9978_vm2 = vcmask 1039360   ;;  %10169 = vst [vmem:[#allocation24_spill] sm:$0xff] %v10168_v56  ;;  %v979_v10 = vpop.permute.xlu2 %978 }
  0xbf   :  { %v561_v17 = vsel %vm6685_vm1, %v543_v16, 0.0  ;;  %vm6707_vm1 = vcmp.eq.s32.totalorder %v552_v18, 1  ;;  %v825_v35 = vsel %vm9978_vm2, %v818_v29, %v820_v12  ;;  %v10182_v18 = vmov 0 }
  0xc0   :  { %5648 = vmatpush.msk.msrb.mxu2 %vm9971_vm8, %v561_v17  ;;  %v10135_v31 = vsel %vm6707_vm1, 4294967295, %v10134_v31 }
  0xc1   :  { %5629 = vmatmul.msk.f32.vlgmr.msra.gmra.mxu0 %vm9970_vm9, %v5626_v5  ;;  %5633 = vmatmul.msk.f32.gmra.mxu1 %vm9970_vm9, %v5627_v15  ;;  %10136 = vst [vmem:[#allocation19_spill] sm:$0xff] %v10135_v31 }
  0xc2   :  { %5635 = vmatmul.msk.f32.vlgmr.msra.gmra.mxu2 %vm9970_vm9, %v5626_v5  ;;  %5638 = vmatmul.msk.f32.vlgmr.msra.gmra.mxu3 %vm9970_vm9, %v5626_v5  ;;  %vm10141_vm9 = vmmov %vm10140_vm0 }
  0xc3   :  { %5662 = vmatpush.msk.msra.mxu2 %vm9971_vm8, %v6456_v20  ;;  %5665 = vmatpush.msk.msra.mxu3 %vm9971_vm8, %v6459_v21  ;;  %v5640_v20 = vld [vmem:[%s9950_s2 + $0x30] sm:$0xff]  ;;  %vm6721_vm8 = vcmp.eq.s32.totalorder %v839_v30, 1 }
  0xc4   :  { %v10143_v36 = vsel %vm6721_vm8, 4294967295, %v10142_v36  ;;  %v847_v41 = vsel %vm6721_vm8, %v825_v35, 0.0 }
  0xc5   :  { %v534_v33 = vpop.permute.xlu0 %533  ;;  %10144 = vst [vmem:[#allocation21_spill] sm:$0xff] %v10143_v36 }
  0xc6   :  { %v542_v34 = vsel %vm10140_vm0, %v534_v33, %v536_v14  ;;  %v549_v21 = vsel %vm10141_vm9, %v524_v23, %v534_v33  ;;  %vm10146_vm0 = vmmov %vm10145_vm4 }
  0xc7   :  { %v560_v37 = vsel %vm6707_vm1, %v542_v34, 0.0  ;;  %v559_v38 = vsel %vm6711_vm3, %v549_v21, 0.0  ;;  %vm10149_vm9 = vmmov %vm10147_vm10  ;;  %vm10164_vm3 = vcmask 1042432  }
  0xc8   :  { %5645 = vmatpush.msk.msrb.mxu1 %vm10145_vm4, %v560_v37  ;;  %5642 = vmatpush.msk.msrb.mxu0 %vm10146_vm0, %v559_v38  ;;  %vm10150_vm2 = vmmov %vm10149_vm9 }
  0xc9   :  { %5630 = vmatmul.msk.f32.gmra.mxu0 %vm10147_vm10, %v5627_v15  ;;  %5646 = vmatmul.msk.f32.vlgmr.msrb.gmra.mxu1 %vm10148_vm14, %v5640_v20  ;;  %vm10151_vm1 = vmmov %vm10146_vm0  ;;  %vm6742_vm10 = vcmp.eq.s32.totalorder %v840_v39, 1  ;;  %vm6746_vm14 = vcmp.eq.s32.totalorder %v841_v42, 1 }
  0xca   :  { %5636 = vmatmul.msk.f32.gmra.mxu2 %vm10149_vm9, %v5627_v15  ;;  %5639 = vmatmul.msk.f32.gmra.mxu3 %vm10150_vm2, %v5627_v15  ;;  %vm10152_vm4 = vmmov %vm10146_vm0  ;;  %v10154_v48 = vsel %vm6742_vm10, 4294967295, %v10153_v48  ;;  %v10157_v51 = vsel %vm6746_vm14, 4294967295, %v10156_v51  ;;  %vm10159_vm2 = vcmask 1039360   ;;  %v10179_v15 = vmov 0 }
  0xcb   :  { %5659 = vmatpush.msk.msra.mxu1 %vm10151_vm1, %v6469_v27  ;;  %5656 = vmatpush.msk.msra.mxu0 %vm10152_vm4, %v6467_v26  ;;  %10155 = vst [vmem:[#allocation22_spill] sm:$0xff] %v10154_v48  ;;  %vm10160_vm1 = vmmov %vm10159_vm2 }
  0xcc   :  { %10158 = vst [vmem:[#allocation23_spill] sm:$0xff] %v10157_v51  ;;  %vm10161_vm4 = vmmov %vm10149_vm9 }
  0xcd   :  { %5673 = vmatpush.msk.msrb.mxu1 %vm10146_vm0, %v847_v41  ;;  %v822_v45 = vpop.permute.xlu0 %821  ;;  %v834_v50 = vpop.permute.xlu1 %833  ;;  %vm10162_vm0 = vmmov %vm10161_vm4  ;;  %v5668_v41 = vld [vmem:[%s9950_s2 + $0x50] sm:$0xff] }
  0xce   :  { %v826_v27 = vsel %vm10159_vm2, %v820_v12, %v822_v45  ;;  %v836_v26 = vsel %vm10160_vm1, %v822_v45, %v834_v50  ;;  %vm10163_vm8 = vmmov %vm10162_vm0  ;;  %vm9991_vm2 = vcmp.lt.s32.totalorder %v6510_v47, 15  ;;  %v10176_v12 = vmov 0 }
  0xcf   :  { %v848_v53 = vsel %vm6742_vm10, %v826_v27, 0.0  ;;  %v849_v54 = vsel %vm6746_vm14, %v836_v26, 0.0  ;;  %vm10165_vm1 = vmmov %vm10164_vm3  ;;  %vm10166_vm10 = vcmp.ge.s32.totalorder %v6504_v46, 1  ;;  %v10199_v27 = vmov 0 }
  0xd0   :  { %vm1001_vm14 = vmand %vm9991_vm2, %vm10166_vm10 }
  0xd1   :  { %5643 = vmatmul.msk.f32.vlgmr.msrb.gmra.mxu0 %vm10149_vm9, %v5640_v20  ;;  %5647 = vmatmul.msk.f32.gmra.mxu1 %vm10161_vm4, %v5641_v52  ;;  %v1002_v63 = vsel %vm1001_vm14, 1, %v10019_v40  ;;  %vm10172_vm10 = vmmov %vm10162_vm0 }
  0xd2   :  { %5649 = vmatmul.msk.f32.vlgmr.msrb.gmra.mxu2 %vm10162_vm0, %v5640_v20  ;;  %5652 = vmatmul.msk.f32.vlgmr.msrb.gmra.mxu3 %vm10163_vm8, %v5640_v20  ;;  %vm10171_vm8 = vmmov %vm10165_vm1  ;;  %v1004_v5 = vperm.slane %v1002_v63, 1  ;;  %v1005_v6 = vperm.slane %v1002_v63, 2  ;;  %v1006_v7 = vperm.slane %v1002_v63, 3  ;;  %v1003_v11 = vperm.slane %v1002_v63, 0 }
  0xd3   :  { %5676 = vmatpush.msk.msrb.mxu2 %vm10164_vm3, %v848_v53  ;;  %5679 = vmatpush.msk.msrb.mxu3 %vm10165_vm1, %v849_v54  ;;  %vm10170_vm3 = vcmask 1039360   ;;  %vm10173_vm9 = vmmov %vm10162_vm0  ;;  %v10202_v53 = vmov 0 }
  0xd4   :  { %vm10174_vm4 = vmmov %vm10162_vm0  ;;  %vm6786_vm1 = vcmp.eq.s32.totalorder %v1004_v5, 1 }
  0xd5   :  { %v816_v60 = vpop.permute.xlu0 %815  ;;  %v983_v62 = vpop.permute.xlu1 %982  ;;  %vm10175_vm14 = vmmov %vm10162_vm0  ;;  %vm9992_vm0 = vcmask 924672   ;;  %v10177_v12 = vsel %vm6786_vm1, 4294967295, %v10176_v12 }
  0xd6   :  { %v824_v2 = vsel %vm10170_vm3, %v816_v60, %v818_v29  ;;  %10178 = vst [vmem:[#allocation25_spill] sm:$0xff] %v10177_v12  ;;  %v989_v14 = vsel %vm9992_vm0, %v983_v62, %v985_v57  ;;  %vm6791_vm3 = vcmp.eq.s32.totalorder %v1005_v6, 1  ;;  %v10185_v29 = vmov 0  ;;  %vm10190_vm2 = vmmov %vm10174_vm4  ;;  %v1162_v35 = vpop.permute.xlu2 %1161  ;;  %v5669_v60 = vld [vmem:[%s9950_s2 + $0x58] sm:$0xff] }
  0xd7   :  { %v846_v4 = vsel %vm6770_vm7, %v824_v2, 0.0  ;;  %v10180_v15 = vsel %vm6791_vm3, 4294967295, %v10179_v15  ;;  %v1013_v34 = vsel %vm6791_vm3, %v989_v14, 0.0 }
  0xd8   :  { %5670 = vmatpush.msk.msrb.mxu0 %vm10171_vm8, %v846_v4  ;;  %10181 = vst [vmem:[#allocation26_spill] sm:$0xff] %v10180_v15  ;;  %vm6795_vm8 = vcmp.eq.s32.totalorder %v1003_v11, 1 }
  0xd9   :  { %5644 = vmatmul.msk.f32.gmra.mxu0 %vm10172_vm10, %v5641_v52  ;;  %5660 = vmatmul.msk.f32.vlgmr.msra.gmra.mxu1 %vm10173_vm9, %v5654_v1  ;;  %v10183_v18 = vsel %vm6795_vm8, 4294967295, %v10182_v18  ;;  %vm6804_vm10 = vcmp.eq.s32.totalorder %v1006_v7, 1  ;;  %vm10188_vm9 = vcmask 1042432  }
  0xda   :  { %5650 = vmatmul.msk.f32.gmra.mxu2 %vm10174_vm4, %v5641_v52  ;;  %5653 = vmatmul.msk.f32.gmra.mxu3 %vm10175_vm14, %v5641_v52  ;;  %10184 = vst [vmem:[#allocation27_spill] sm:$0xff] %v10183_v18  ;;  %v10186_v29 = vsel %vm6804_vm10, 4294967295, %v10185_v29  ;;  %vm10189_vm14 = vmmov %vm10174_vm4 }
  0xdb   :  { %10187 = vst [vmem:[#allocation28_spill] sm:$0xff] %v10186_v29 }
  0xdd   :  { %v981_v16 = vpop.permute.xlu1 %980  ;;  %v997_v17 = vpop.permute.xlu0 %996 }
  0xde   :  { %v988_v22 = vsel %vm9992_vm0, %v981_v16, %v983_v62  ;;  %v999_v23 = vsel %vm9992_vm0, %v985_v57, %v997_v17  ;;  %v987_v30 = vsel %vm9992_vm0, %v979_v10, %v981_v16  ;;  %vm10191_vm0 = vmmov %vm10190_vm2  ;;  %v10205_v57 = vmov 0  ;;  %v1311_v4 = vpop.permute.xlu2 %1310  ;;  %v5682_v17 = vld [vmem:[%s9950_s2 + $0x60] sm:$0xff] }
  0xdf   :  { %v1012_v33 = vsel %vm6786_vm1, %v988_v22, 0.0  ;;  %v1011_v20 = vsel %vm6795_vm8, %v987_v30, 0.0  ;;  %v1014_v21 = vsel %vm6804_vm10, %v999_v23, 0.0  ;;  %vm10192_vm1 = vmmov %vm10188_vm9 }
  0xe0   :  { %5687 = vmatpush.msk.msra.mxu1 %vm10188_vm9, %v1012_v33  ;;  %vm10193_vm7 = vmmov %vm10192_vm1  ;;  %vm10195_vm9 = vcmp.lt.s32.totalorder %v6510_v47, 15 }
  0xe1   :  { %5657 = vmatmul.msk.f32.vlgmr.msra.gmra.mxu0 %vm10174_vm4, %v5654_v1  ;;  %5661 = vmatmul.msk.f32.gmra.mxu1 %vm10189_vm14, %v5655_v19  ;;  %vm10194_vm3 = vmmov %vm10192_vm1  ;;  %v1165_v39 = vsel %vm10195_vm9, 1, %v10019_v40 }
  0xe2   :  { %5663 = vmatmul.msk.f32.vlgmr.msra.gmra.mxu2 %vm10190_vm2, %v5654_v1  ;;  %5666 = vmatmul.msk.f32.vlgmr.msra.gmra.mxu3 %vm10191_vm0, %v5654_v1  ;;  %v1167_v42 = vperm.slane %v1165_v39, 1  ;;  %vm10196_vm2 = vmmov %vm10191_vm0  ;;  %v1168_v45 = vperm.slane %v1165_v39, 2  ;;  %v1169_v50 = vperm.slane %v1165_v39, 3  ;;  %v1166_v52 = vperm.slane %v1165_v39, 0 }
  0xe3   :  { %5684 = vmatpush.msk.msra.mxu0 %vm10192_vm1, %v1011_v20  ;;  %5690 = vmatpush.msk.msra.mxu2 %vm10193_vm7, %v1013_v34  ;;  %vm10197_vm7 = vmmov %vm10191_vm0  ;;  %v10208_v1 = vmov 0  ;;  %v10226_v20 = vmov 0 }
  0xe4   :  { %5693 = vmatpush.msk.msra.mxu3 %vm10194_vm3, %v1014_v21  ;;  %vm10198_vm1 = vmmov %vm10191_vm0  ;;  %vm9999_vm3 = vcmask 916480   ;;  %vm6835_vm4 = vcmp.eq.s32.totalorder %v1167_v42, 1  ;;  %vm6840_vm14 = vcmp.eq.s32.totalorder %v1168_v45, 1  ;;  %vm6844_vm9 = vcmp.eq.s32.totalorder %v1166_v52, 1 }
  0xe5   :  { %v1148_v37 = vpop.permute.xlu0 %1147  ;;  %v1150_v38 = vpop.permute.xlu1 %1149  ;;  %v10200_v27 = vsel %vm6835_vm4, 4294967295, %v10199_v27  ;;  %v10203_v53 = vsel %vm6840_vm14, 4294967295, %v10202_v53  ;;  %v10206_v57 = vsel %vm6844_vm9, 4294967295, %v10205_v57  ;;  %vm10214_vm8 = vmmov %vm10198_vm1 }
  0xe6   :  { %10201 = vst [vmem:[#allocation29_spill] sm:$0xff] %v10200_v27  ;;  %v1154_v26 = vsel %vm9999_vm3, %v1148_v37, %v1150_v38  ;;  %v1164_v63 = vsel %vm9999_vm3, %v1150_v38, %v1162_v35  ;;  %v10229_v35 = vmov 0 }
  0xe7   :  { %10204 = vst [vmem:[#allocation30_spill] sm:$0xff] %v10203_v53  ;;  %v1176_v6 = vsel %vm6840_vm14, %v1154_v26, 0.0  ;;  %vm10216_vm14 = vcmp.lt.s32.totalorder %v6510_v47, 15  ;;  %v5696_v26 = vld [vmem:[%s9950_s2 + $0x70] sm:$0xff] }
  0xe8   :  { %10207 = vst [vmem:[#allocation31_spill] sm:$0xff] %v10206_v57 }
  0xe9   :  { %5658 = vmatmul.msk.f32.gmra.mxu0 %vm10196_vm2, %v5655_v19  ;;  %5674 = vmatmul.msk.f32.vlgmr.msrb.gmra.mxu1 %vm10191_vm0, %v5668_v41  ;;  %vm6853_vm2 = vcmp.eq.s32.totalorder %v1169_v50, 1  ;;  %vm10211_vm0 = vcmask 1042432  }
  0xea   :  { %5664 = vmatmul.msk.f32.gmra.mxu2 %vm10197_vm7, %v5655_v19  ;;  %5667 = vmatmul.msk.f32.gmra.mxu3 %vm10198_vm1, %v5655_v19  ;;  %v10209_v1 = vsel %vm6853_vm2, 4294967295, %v10208_v1  ;;  %vm10212_vm7 = vmmov %vm10198_vm1  ;;  %v1177_v10 = vsel %vm6853_vm2, %v1164_v63, 0.0  ;;  %v1309_v19 = vpop.permute.xlu2 %1308 }
  0xeb   :  { %10210 = vst [vmem:[#allocation32_spill] sm:$0xff] %v10209_v1  ;;  %vm10217_vm11 = vmmov %vm10211_vm0 }
  0xed   :  { %v1146_v54 = vpop.permute.xlu0 %1145  ;;  %v1144_v55 = vpop.permute.xlu1 %1143 }
  0xee   :  { %v1153_v62 = vsel %vm9999_vm3, %v1146_v54, %v1148_v37  ;;  %v1152_v2 = vsel %vm9999_vm3, %v1144_v55, %v1146_v54  ;;  %vm10213_vm3 = vmmov %vm10198_vm1  ;;  %v5683_v37 = vld [vmem:[%s9950_s2 + $0x68] sm:$0xff]  ;;  %v5697_v55 = vld [vmem:[%s9950_s2 + $0x78] sm:$0xff] }
  0xef   :  { %v1175_v5 = vsel %vm6835_vm4, %v1153_v62, 0.0  ;;  %v1174_v7 = vsel %vm6844_vm9, %v1152_v2, 0.0  ;;  %vm10215_vm4 = vcmp.lt.s32.totalorder %v6504_v46, 15  ;;  %v10219_v46 = vmov 0  ;;  %v34_v54 = vld [vmem:[%s9954_s6 + $0x8] sm:$0xff]  ;;  %v5710_v62 = vld [vmem:[%s9950_s2 + $0x80] sm:$0xff] }
  0xf0   :  { %5701 = vmatpush.msk.msrb.mxu1 %vm10211_vm0, %v1175_v5  ;;  %vm1328_vm10 = vmand %vm10216_vm14, %vm10215_vm4  ;;  %1470 = vperm.xlu1 %6307, %v34_v54   ;;  %v33_v5 = vld [vmem:[%s9954_s6] sm:$0xff] }
  0xf1   :  { %5671 = vmatmul.msk.f32.vlgmr.msrb.gmra.mxu0 %vm10212_vm7, %v5668_v41  ;;  %5675 = vmatmul.msk.f32.gmra.mxu1 %vm10198_vm1, %v5669_v60  ;;  %v1329_v11 = vsel %vm1328_vm10, 1, %v10019_v40  ;;  %vm10218_vm7 = vmmov %vm10211_vm0  ;;  %vm10012_vm1 = vcmask 908288  }
  0xf2   :  { %5677 = vmatmul.msk.f32.vlgmr.msrb.gmra.mxu2 %vm10213_vm3, %v5668_v41  ;;  %5680 = vmatmul.msk.f32.vlgmr.msrb.gmra.mxu3 %vm10214_vm8, %v5668_v41  ;;  %v1331_v14 = vperm.slane %v1329_v11, 1  ;;  %v1316_v47 = vsel %vm10012_vm1, %v1309_v19, %v1311_v4  ;;  %vm10223_vm10 = vmmov %vm10213_vm3  ;;  %v1332_v23 = vperm.slane %v1329_v11, 2  ;;  %v1330_v30 = vperm.slane %v1329_v11, 0 }
  0xf3   :  { %5698 = vmatpush.msk.msrb.mxu0 %vm10211_vm0, %v1174_v7  ;;  %5704 = vmatpush.msk.msrb.mxu2 %vm10217_vm11, %v1176_v6  ;;  %vm10222_vm11 = vmmov %vm10213_vm3  ;;  %v1333_v33 = vperm.slane %v1329_v11, 3  ;;  %v10232_v41 = vmov 0 }
  0xf4   :  { %5707 = vmatpush.msk.msrb.mxu3 %vm10218_vm7, %v1177_v10  ;;  %vm6882_vm8 = vcmp.eq.s32.totalorder %v1331_v14, 1  ;;  %vm10224_vm4 = vmmov %vm10213_vm3  ;;  %vm6899_vm7 = vcmp.eq.s32.totalorder %v1330_v30, 1  ;;  %1465 = vperm.xlu2 %6308, %v33_v5  }
  0xf5   :  { %v1313_v16 = vpop.permute.xlu0 %1312  ;;  %v10220_v46 = vsel %vm6882_vm8, 4294967295, %v10219_v46  ;;  %v1339_v22 = vsel %vm6882_vm8, %v1316_v47, 0.0  ;;  %vm10225_vm14 = vmmov %vm10211_vm0  ;;  %vm6895_vm0 = vcmp.eq.s32.totalorder %v1332_v23, 1  ;;  %v10230_v35 = vsel %vm6899_vm7, 4294967295, %v10229_v35 }
  0xf6   :  { %10221 = vst [vmem:[#allocation33_spill] sm:$0xff] %v10220_v46  ;;  %v1317_v34 = vsel %vm10012_vm1, %v1311_v4, %v1313_v16  ;;  %v10227_v20 = vsel %vm6895_vm0, 4294967295, %v10226_v20  ;;  %vm10238_vm8 = vcmask 1042432   ;;  %v5711_v4 = vld [vmem:[%s9950_s2 + $0x88] sm:$0xff] }
  0xf7   :  { %10228 = vst [vmem:[#allocation34_spill] sm:$0xff] %v10227_v20  ;;  %v1340_v45 = vsel %vm6895_vm0, %v1317_v34, 0.0 }
  0xf8   :  { %10231 = vst [vmem:[#allocation35_spill] sm:$0xff] %v10230_v35 }
  0xf9   :  { %5672 = vmatmul.msk.f32.gmra.mxu0 %vm10222_vm11, %v5669_v60  ;;  %5688 = vmatmul.msk.f32.vlgmr.msra.gmra.mxu1 %vm10223_vm10, %v5682_v17  ;;  %vm6907_vm11 = vcmp.eq.s32.totalorder %v1333_v33, 1  ;;  %vm10235_vm10 = vmmov %vm10213_vm3 }
  0xfa   :  { %5678 = vmatmul.msk.f32.gmra.mxu2 %vm10213_vm3, %v5669_v60  ;;  %5681 = vmatmul.msk.f32.gmra.mxu3 %vm10224_vm4, %v5669_v60  ;;  %v10233_v41 = vsel %vm6907_vm11, 4294967295, %v10232_v41  ;;  %vm10236_vm4 = vmmov %vm10213_vm3 }
  0xfb   :  { %5715 = vmatpush.msk.msra.mxu1 %vm10225_vm14, %v1339_v22  ;;  %10234 = vst [vmem:[#allocation36_spill] sm:$0xff] %v10233_v41  ;;  %vm10237_vm14 = vmmov %vm10213_vm3 }
  0xfd   :  { %v1307_v21 = vpop.permute.xlu0 %1306  ;;  %v1325_v39 = vpop.permute.xlu1 %1324 }
  0xfe   :  { %v1315_v38 = vsel %vm10012_vm1, %v1307_v21, %v1309_v19  ;;  %v1327_v42 = vsel %vm10012_vm1, %v1313_v16, %v1325_v39  ;;  %vm10239_vm1 = vmmov %vm10238_vm8 }
  0xff   :  { %v1338_v50 = vsel %vm6899_vm7, %v1315_v38, 0.0  ;;  %v1341_v52 = vsel %vm6907_vm11, %v1327_v42, 0.0  ;;  %vm10240_vm9 = vmmov %vm10239_vm1 }
 0x100   :  { %vm10242_vm7 = vmmov %vm10213_vm3 }
 0x101   :  { %5685 = vmatmul.msk.f32.vlgmr.msra.gmra.mxu0 %vm10235_vm10, %v5682_v17  ;;  %5689 = vmatmul.msk.f32.gmra.mxu1 %vm10213_vm3, %v5683_v37  ;;  %vm10241_vm10 = vmmov %vm10213_vm3 }
 0x102   :  { %5691 = vmatmul.msk.f32.vlgmr.msra.gmra.mxu2 %vm10236_vm4, %v5682_v17  ;;  %5694 = vmatmul.msk.f32.vlgmr.msra.gmra.mxu3 %vm10237_vm14, %v5682_v17  ;;  %vm10243_vm11 = vmmov %vm10213_vm3 }
 0x103   :  { %5712 = vmatpush.msk.msra.mxu0 %vm10238_vm8, %v1338_v50  ;;  %5718 = vmatpush.msk.msra.mxu2 %vm10239_vm1, %v1340_v45  ;;  %vm10245_vm1 = vmmov %vm10213_vm3 }
 0x104   :  { %5721 = vmatpush.msk.msra.mxu3 %vm10240_vm9, %v1341_v52  ;;  %vm10244_vm9 = vmmov %vm10213_vm3 }
 0x105   :  { %vm10246_vm8 = vmmov %vm10245_vm1 }
 0x106   :  { %vm10247_vm4 = vmmov %vm10245_vm1 }
 0x107   :  { %vm10250_vm14 = vmmov %vm10245_vm1 }
 0x109   :  { %5686 = vmatmul.msk.f32.gmra.mxu0 %vm10241_vm10, %v5683_v37  ;;  %5702 = vmatmul.msk.f32.vlgmr.msrb.gmra.mxu1 %vm10213_vm3, %v5696_v26  ;;  %vm10251_vm10 = vmmov %vm10245_vm1 }
 0x10a   :  { %5692 = vmatmul.msk.f32.gmra.mxu2 %vm10242_vm7, %v5683_v37  ;;  %5695 = vmatmul.msk.f32.gmra.mxu3 %vm10243_vm11, %v5683_v37  ;;  %vm10248_vm7 = vmmov %vm10245_vm1 }
 0x10b   :  { %vm10249_vm11 = vmmov %vm10245_vm1 }
 0x10c   :  { %vm10252_vm3 = vmmov %vm10245_vm1 }
 0x111   :  { %5699 = vmatmul.msk.f32.vlgmr.msrb.gmra.mxu0 %vm10244_vm9, %v5696_v26  ;;  %5703 = vmatmul.msk.f32.gmra.mxu1 %vm10245_vm1, %v5697_v55  ;;  %vm10253_vm9 = vmmov %vm10245_vm1 }
 0x112   :  { %5705 = vmatmul.msk.f32.vlgmr.msrb.gmra.mxu2 %vm10246_vm8, %v5696_v26  ;;  %5708 = vmatmul.msk.f32.vlgmr.msrb.gmra.mxu3 %vm10247_vm4, %v5696_v26  ;;  %vm10254_vm8 = vmmov %vm10245_vm1 }
 0x113   :  { %vm10255_vm4 = vmmov %vm10245_vm1 }
 0x116   :  { %v6942_v60 = vpop.f32.mrf.mxu1  ;;  %v6951_v63 = vpop.f32.mrf.mxu0 }
 0x119   :  { %5700 = vmatmul.msk.f32.gmra.mxu0 %vm10248_vm7, %v5697_v55  ;;  %5716 = vmatmul.msk.f32.vlgmr.msra.gmra.mxu1 %vm10249_vm11, %v5710_v62  ;;  %vm10256_vm7 = vmmov %vm10245_vm1 }
 0x11a   :  { %5706 = vmatmul.msk.f32.gmra.mxu2 %vm10250_vm14, %v5697_v55  ;;  %5709 = vmatmul.msk.f32.gmra.mxu3 %vm10251_vm10, %v5697_v55  ;;  %vm10257_vm11 = vmmov %vm10245_vm1  ;;  %vm10272_vm14 = vcmask 130048  }
 0x11b   :  { %vm10274_vm10 = vmmov %vm10272_vm14 }
 0x11e   :  { %v6953_v2 = vpop.f32.mrf.mxu1 }
 0x11f   :  { %v6967_v7 = vpop.f32.mrf.mxu0 }
 0x121   :  { %5713 = vmatmul.msk.f32.vlgmr.msra.gmra.mxu0 %vm10252_vm3, %v5710_v62  ;;  %5717 = vmatmul.msk.f32.gmra.mxu1 %vm10253_vm9, %v5711_v4  ;;  %vm10275_vm3 = vmmov %vm10274_vm10 }
 0x122   :  { %5719 = vmatmul.msk.f32.vlgmr.msra.gmra.mxu2 %vm10245_vm1, %v5710_v62  ;;  %5722 = vmatmul.msk.f32.vlgmr.msra.gmra.mxu3 %vm10254_vm8, %v5710_v62  ;;  %vm10277_vm9 = vmmov %vm10275_vm3  ;;  %vm10279_vm1 = vcmask 138240  }
 0x123   :  { %vm10280_vm8 = vmmov %vm10275_vm3 }
 0x124   :  { %v6965_v6 = vpop.f32.mrf.mxu2 }
 0x125   :  { %v6969_v10 = vpop.f32.mrf.mxu3 }
 0x126   :  { %v304_v11 = vpop.f32.mrf.mxu1 }
 0x127   :  { %v305_v49 = vadd.f32 %v304_v11, %v6942_v60 }
 0x129   :  { %5714 = vmatmul.msk.f32.gmra.mxu0 %vm10255_vm4, %v5711_v4  ;;  %vm10281_vm4 = vmmov %vm10275_vm3 }
 0x12a   :  { %5720 = vmatmul.msk.f32.gmra.mxu2 %vm10256_vm7, %v5711_v4  ;;  %5723 = vmatmul.msk.f32.gmra.mxu3 %vm10257_vm11, %v5711_v4  ;;  %vm10284_vm7 = vmmov %vm10275_vm3 }
 0x12b   :  { %vm10285_vm11 = vmmov %vm10275_vm3 }
 0x12c   :  { %v6974_v14 = vpop.f32.mrf.mxu2 }
 0x12d   :  { %v6976_v16 = vpop.f32.mrf.mxu3 }
 0x12e   :  { %v281_v17 = vpop.f32.mrf.mxu0  ;;  %v307_v19 = vpop.f32.mrf.mxu1 }
 0x12f   :  { %v308_v8 = vadd.f32 %v307_v19, %v6953_v2 }
 0x135   :  { %v6978_v47 = vpop.f32.mrf.mxu2  ;;  %v6980_v22 = vpop.f32.mrf.mxu3 }
 0x136   :  { %v6982_v23 = vpop.f32.mrf.mxu0  ;;  %v461_v30 = vpop.f32.mrf.mxu1 }
 0x137   :  { %v514_v24 = vadd.f32 %v461_v30, %v305_v49 }
 0x13d   :  { %v6984_v33 = vpop.f32.mrf.mxu2  ;;  %v6986_v34 = vpop.f32.mrf.mxu3 }
 0x13e   :  { %v438_v21 = vpop.f32.mrf.mxu0  ;;  %v464_v37 = vpop.f32.mrf.mxu1 }
 0x145   :  { %v6988_v38 = vpop.f32.mrf.mxu2  ;;  %v507_v39 = vpop.f32.mrf.mxu3 }
 0x146   :  { %v6990_v42 = vpop.f32.mrf.mxu0  ;;  %v624_v45 = vpop.f32.mrf.mxu1 }
 0x147   :  { %v677_v61 = vadd.f32 %v624_v45, %v514_v24 }
 0x14d   :  { %v6992_v50 = vpop.f32.mrf.mxu2  ;;  %v6994_v52 = vpop.f32.mrf.mxu3 }
 0x14e   :  { %v601_v26 = vpop.f32.mrf.mxu0  ;;  %v627_v54 = vpop.f32.mrf.mxu1 }
 0x155   :  { %v6996_v55 = vpop.f32.mrf.mxu2  ;;  %v670_v62 = vpop.f32.mrf.mxu3 }
 0x156   :  { %v6998_v4 = vpop.f32.mrf.mxu0  ;;  %v748_v5 = vpop.f32.mrf.mxu1 }
 0x157   :  { %v801_v9 = vadd.f32 %v748_v5, %v677_v61 }
 0x15d   :  { %v7000_v40 = vpop.f32.mrf.mxu2  ;;  %v7002_v46 = vpop.f32.mrf.mxu3 }
 0x15e   :  { %v725_v35 = vpop.f32.mrf.mxu0  ;;  %v751_v41 = vpop.f32.mrf.mxu1 }
 0x165   :  { %v7004_v20 = vpop.f32.mrf.mxu2  ;;  %v794_v27 = vpop.f32.mrf.mxu3 }
 0x166   :  { %10258 = vst [vmem:[#allocation37_spill] sm:$0xff] %v7004_v20  ;;  %v7006_v57 = vpop.f32.mrf.mxu0  ;;  %v911_v1 = vpop.f32.mrf.mxu1 }
 0x167   :  { %10259 = vst [vmem:[#allocation38_spill] sm:$0xff] %v7006_v57  ;;  %v7030_v57 = vpop.permute.xlu2 %1465 }
 0x16d   :  { %v7008_v53 = vpop.f32.mrf.mxu2  ;;  %v7010_v12 = vpop.f32.mrf.mxu3  ;;  %v10265_v5 = vld [vmem:[#allocation37_spill] sm:$0xff] }
 0x16e   :  { %v888_v18 = vpop.f32.mrf.mxu0  ;;  %v914_v29 = vpop.f32.mrf.mxu1 }
 0x175   :  { %v7012_v15 = vpop.f32.mrf.mxu2  ;;  %v957_v36 = vpop.f32.mrf.mxu3 }
 0x176   :  { %10260 = vst [vmem:[#allocation39_spill] sm:$0xff] %v7012_v15  ;;  %v7014_v56 = vpop.f32.mrf.mxu0  ;;  %v1076_v51 = vpop.f32.mrf.mxu1  ;;  %v518_v15 = vadd.f32 %v464_v37, %v308_v8 }
 0x177   :  { %10261 = vst [vmem:[#allocation40_spill] sm:$0xff] %v7014_v56  ;;  %v964_v56 = vadd.f32 %v911_v1, %v801_v9  ;;  %v351_v9 = vadd.f32 %v6980_v22, %v6969_v10 }
 0x178   :  { %v681_v20 = vadd.f32 %v627_v54, %v518_v15 }
 0x179   :  { %v516_v1 = vadd.f32 %v507_v39, %v351_v9 }
 0x17d   :  { %v7016_v48 = vpop.f32.mrf.mxu2  ;;  %v7018_v31 = vpop.f32.mrf.mxu3 }
 0x17e   :  { %v1053_v32 = vpop.f32.mrf.mxu0  ;;  %v1079_v3 = vpop.f32.mrf.mxu1  ;;  %v10269_v9 = vld [vmem:[#allocation40_spill] sm:$0xff] }
 0x185   :  { %v7020_v13 = vpop.f32.mrf.mxu2  ;;  %v1122_v0 = vpop.f32.mrf.mxu3 }
 0x186   :  { %10262 = vst [vmem:[#allocation41_spill] sm:$0xff] %v7020_v13  ;;  %v7022_v28 = vpop.f32.mrf.mxu0  ;;  %v1239_v44 = vpop.f32.mrf.mxu1  ;;  %v1129_v13 = vadd.f32 %v1076_v51, %v964_v56 }
 0x187   :  { %10263 = vst [vmem:[#allocation42_spill] sm:$0xff] %v7022_v28  ;;  %v282_v28 = vadd.f32 %v281_v17, %v6951_v63 }
 0x188   :  { %v1292_v60 = vadd.f32 %v1239_v44, %v1129_v13  ;;  %v679_v13 = vadd.f32 %v670_v62, %v516_v1 }
 0x189   :  { %v513_v45 = vadd.f32 %v438_v21, %v282_v28  ;;  %v331_v28 = vadd.f32 %v6984_v33, %v6974_v14 }
 0x18b   :  { %v676_v8 = vadd.f32 %v601_v26, %v513_v45  ;;  %v519_v39 = vadd.f32 %v6992_v50, %v331_v28 }
 0x18d   :  { %v7025_v43 = vpop.f32.mrf.mxu2  ;;  %v7027_v58 = vpop.f32.mrf.mxu3  ;;  %v800_v63 = vadd.f32 %v725_v35, %v676_v8 }
 0x18e   :  { %10264 = vst [vmem:[#allocation43_spill] sm:$0xff] %v7027_v58  ;;  %v1216_v59 = vpop.f32.mrf.mxu0  ;;  %v1242_v25 = vpop.f32.mrf.mxu1  ;;  %v805_v58 = vadd.f32 %v751_v41, %v681_v20  ;;  %v803_v20 = vadd.f32 %v794_v27, %v679_v13 }
 0x18f   :  { %v963_v2 = vadd.f32 %v888_v18, %v800_v63  ;;  %v10271_v63 = vld [vmem:[#allocation42_spill] sm:$0xff] }
 0x190   :  { %v968_v51 = vadd.f32 %v914_v29, %v805_v58  ;;  %v7046_v29 = vpop.permute.xlu1 %1470  ;;  %v966_v10 = vadd.f32 %v957_v36, %v803_v20  ;;  %v682_v36 = vadd.f32 %v7000_v40, %v519_v39 }
 0x191   :  { %v1128_v41 = vadd.f32 %v1053_v32, %v963_v2  ;;  %v285_v32 = vadd.f32 %v6982_v23, %v6967_v7 }
 0x192   :  { %v1133_v15 = vadd.f32 %v1079_v3, %v968_v51  ;;  %v354_v3 = vadd.f32 %v6986_v34, %v6976_v16  ;;  %v1131_v14 = vadd.f32 %v1122_v0, %v966_v10  ;;  %v806_v50 = vadd.f32 %v7008_v53, %v682_v36 }
 0x193   :  { %v1291_v22 = vadd.f32 %v1216_v59, %v1128_v41  ;;  %v517_v0 = vadd.f32 %v6990_v42, %v285_v32  ;;  %v10266_v42 = vld [vmem:[#allocation38_spill] sm:$0xff] }
 0x194   :  { %v1296_v17 = vadd.f32 %v1242_v25, %v1133_v15  ;;  %v328_v25 = vadd.f32 %v6978_v47, %v6965_v6  ;;  %v520_v27 = vadd.f32 %v6994_v52, %v354_v3  ;;  %v969_v23 = vadd.f32 %v7016_v48, %v806_v50 }
 0x195   :  { %v7033_v49 = vpop.f32.mrf.mxu2  ;;  %v1285_v24 = vpop.f32.mrf.mxu3 }
 0x196   :  { %v7035_v11 = vpop.f32.mrf.mxu0  ;;  %v1403_v30 = vpop.f32.mrf.mxu1  ;;  %v683_v16 = vadd.f32 %v7002_v46, %v520_v27  ;;  %v1294_v34 = vadd.f32 %v1285_v24, %v1131_v14  ;;  %v515_v59 = vadd.f32 %v6988_v38, %v328_v25  ;;  %v680_v46 = vadd.f32 %v6998_v4, %v517_v0  ;;  %v5724_v14 = vld [vmem:[%s9951_s3 + $0x20] sm:$0xff] }
 0x197   :  { %v1456_v61 = vadd.f32 %v1403_v30, %v1292_v60  ;;  %v1134_v53 = vadd.f32 %v7025_v43, %v969_v23  ;;  %v10270_v43 = vld [vmem:[#allocation41_spill] sm:$0xff] }
 0x198   :  { %v807_v52 = vadd.f32 %v7010_v12, %v683_v16  ;;  %v678_v7 = vadd.f32 %v6996_v55, %v515_v59  ;;  %v804_v24 = vadd.f32 %v10266_v42, %v680_v46  ;;  %v10267_v12 = vld [vmem:[#allocation43_spill] sm:$0xff]  ;;  %v5725_v16 = vld [vmem:[%s9951_s3 + $0x28] sm:$0xff] }
 0x199   :  { %v1474_v56 = vadd.f32 %v7030_v57, %v1456_v61  ;;  %v10268_v61 = vld [vmem:[#allocation39_spill] sm:$0xff] }
 0x19a   :  { %v970_v38 = vadd.f32 %v7018_v31, %v807_v52  ;;  %v802_v60 = vadd.f32 %v10265_v5, %v678_v7  ;;  %v967_v48 = vadd.f32 %v10269_v9, %v804_v24  ;;  %v5776_v7 = vld [vmem:[%s9951_s3 + $0x40] sm:$0xff]  ;;  %v5778_v5 = vld [vmem:[%s9951_s3 + $0x50] sm:$0xff] }
 0x19b   :  { %v7040_v44 = vmax.f32 %v1474_v56, 0.0 }
 0x19c   :  { %v1135_v30 = vadd.f32 %v10267_v12, %v970_v38  ;;  %v965_v4 = vadd.f32 %v10268_v61, %v802_v60  ;;  %v1132_v15 = vadd.f32 %v10271_v63, %v967_v48  ;;  %v10294_v61 = vld [vmem:[#allocation13_spill] sm:$0xff]  ;;  %v1539_v63 = vld [vmem:[%s9951_s3] sm:$0xff] }
 0x19d   :  { %v1265_v19 = vpop.f32.mrf.mxu2  ;;  %v1288_v37 = vpop.f32.mrf.mxu3  ;;  %1551 = vrot.lane.b32.xlu1 %v7040_v44, %s6357_s28 }
 0x19e   :  { %v1406_v58 = vpop.f32.mrf.mxu1  ;;  %v1380_v18 = vpop.f32.mrf.mxu0  ;;  %v1297_v8 = vadd.f32 %v1265_v19, %v1134_v53  ;;  %v1298_v31 = vadd.f32 %v1288_v37, %v1135_v30  ;;  %v1130_v1 = vadd.f32 %v10270_v43, %v965_v4  ;;  %v1295_v19 = vadd.f32 %v7035_v11, %v1132_v15  ;;  %v5727_v30 = vld [vmem:[%s9951_s3 + $0x38] sm:$0xff] }
 0x19f   :  { %v1460_v35 = vadd.f32 %v1406_v58, %v1296_v17  ;;  %v1455_v33 = vadd.f32 %v1380_v18, %v1291_v22 }
 0x1a0   :  { %v1293_v28 = vadd.f32 %v7033_v49, %v1130_v1 }
 0x1a1   :  { %v1478_v21 = vadd.f32 %v7046_v29, %v1460_v35  ;;  %v1473_v40 = vadd.f32 %v7030_v57, %v1455_v33 }
 0x1a3   :  { %v7055_v26 = vmax.f32 %v1478_v21, 0.0  ;;  %v7079_v55 = vmax.f32 %v1473_v40, 0.0 }
 0x1a5   :  { %v1426_v6 = vpop.f32.mrf.mxu2  ;;  %v1449_v47 = vpop.f32.mrf.mxu3  ;;  %1557 = vrot.lane.b32.xlu1 %v7055_v26, %s6357_s28 }
 0x1a6   :  { %v1458_v54 = vadd.f32 %v1449_v47, %v1294_v34  ;;  %v1383_v17 = vpop.f32.mrf.mxu0  ;;  %v1457_v58 = vadd.f32 %v1426_v6, %v1293_v28  ;;  %v1540_v28 = vld [vmem:[%s9951_s3 + $0x8] sm:$0xff] }
 0x1a7   :  { %v1459_v41 = vadd.f32 %v1383_v17, %v1295_v19 }
 0x1a8   :  { %v1476_v62 = vadd.f32 %v7030_v57, %v1458_v54  ;;  %v1475_v49 = vadd.f32 %v7030_v57, %v1457_v58  ;;  %v5726_v54 = vld [vmem:[%s9951_s3 + $0x30] sm:$0xff] }
 0x1a9   :  { %v1477_v11 = vadd.f32 %v7046_v29, %v1459_v41 }
 0x1aa   :  { %v7077_v45 = vmax.f32 %v1476_v62, 0.0  ;;  %v7105_v10 = vmax.f32 %v1475_v49, 0.0  ;;  %v10315_v49 = vld [vmem:[#allocation15_spill] sm:$0xff] }
 0x1ab   :  { %v7107_v18 = vmax.f32 %v1477_v11, 0.0  ;;  %v10317_v11 = vld [vmem:[#allocation14_spill] sm:$0xff] }
 0x1ac   :  { %1543 = vrot.lane.b32.xlu0 %v7077_v45, %s6357_s28 }
 0x1ad   :  { %v1429_v51 = vpop.f32.mrf.mxu2  ;;  %v1452_v56 = vpop.f32.mrf.mxu3  ;;  %1549 = vrot.lane.b32.xlu1 %v7079_v55, %s6357_s28 }
 0x1ae   :  { %v1461_v13 = vadd.f32 %v1429_v51, %v1297_v8  ;;  %v1462_v2 = vadd.f32 %v1452_v56, %v1298_v31  ;;  %v10299_v51 = vld [vmem:[#allocation7_spill] sm:$0xff]  ;;  %v10301_v56 = vld [vmem:[#allocation10_spill] sm:$0xff] }
 0x1b0   :  { %v1479_v37 = vadd.f32 %v7046_v29, %v1461_v13  ;;  %v1480_v20 = vadd.f32 %v7046_v29, %v1462_v2 }
 0x1b2   :  { %v7093_v35 = vmax.f32 %v1479_v37, 0.0  ;;  %v7095_v3 = vmax.f32 %v1480_v20, 0.0 }
 0x1b4   :  { %1545 = vrot.lane.b32.xlu0 %v7095_v3, %s6357_s28  ;;  %1559 = vrot.lane.b32.xlu2 %v7093_v35, %s6357_s28 }
 0x1b5   :  { %1513 = vrot.lane.b32.xlu1 %v7093_v35, %s6358_s0 }
 0x1bc   :  { %1553 = vrot.lane.b32.xlu2 %v7105_v10, %s6357_s28  ;;  %1555 = vrot.lane.b32.xlu0 %v7107_v18, %s6357_s28 }
 0x1bd   :  { %1507 = vrot.lane.b32.xlu1 %v7105_v10, %s6358_s0 }
 0x1c4   :  { %1493 = vrot.lane.b32.xlu2 %v7095_v3, %s6358_s0  ;;  %1511 = vrot.lane.b32.xlu0 %v7055_v26, %s6358_s0 }
 0x1c5   :  { %1848 = vrot.lane.b32.xlu1 %v7095_v3, %s6359_s29 }
 0x1cc   :  { %1491 = vrot.lane.b32.xlu2 %v7077_v45, %s6358_s0  ;;  %1505 = vrot.lane.b32.xlu0 %v7040_v44, %s6358_s0 }
 0x1cd   :  { %1846 = vrot.lane.b32.xlu1 %v7077_v45, %s6359_s29 }
 0x1d4   :  { %1509 = vrot.lane.b32.xlu2 %v7107_v18, %s6358_s0  ;;  %1503 = vrot.lane.b32.xlu0 %v7079_v55, %s6358_s0 }
 0x1d5   :  { %1858 = vrot.lane.b32.xlu1 %v7107_v18, %s6359_s29 }
 0x1dc   :  { %1860 = vrot.lane.b32.xlu2 %v7055_v26, %s6359_s29  ;;  %1862 = vrot.lane.b32.xlu0 %v7093_v35, %s6359_s29 }
 0x1dd   :  { %2051 = vrot.lane.b32.xlu1 %v7055_v26, %s6360_s30 }
 0x1e4   :  { %1854 = vrot.lane.b32.xlu2 %v7040_v44, %s6359_s29  ;;  %1856 = vrot.lane.b32.xlu0 %v7105_v10, %s6359_s29 }
 0x1e5   :  { %2045 = vrot.lane.b32.xlu1 %v7040_v44, %s6360_s30 }
 0x1ec   :  { %1852 = vrot.lane.b32.xlu2 %v7079_v55, %s6359_s29  ;;  %2039 = vrot.lane.b32.xlu0 %v7095_v3, %s6360_s30 }
 0x1ed   :  { %2043 = vrot.lane.b32.xlu1 %v7079_v55, %s6360_s30 }
 0x1f4   :  { %2053 = vrot.lane.b32.xlu2 %v7093_v35, %s6360_s30  ;;  %2037 = vrot.lane.b32.xlu0 %v7077_v45, %s6360_s30 }
 0x1f5   :  { %2391 = vrot.lane.b32.xlu1 %v7095_v3, %s6361_s8 }
 0x1fc   :  { %2047 = vrot.lane.b32.xlu2 %v7105_v10, %s6360_s30  ;;  %2049 = vrot.lane.b32.xlu0 %v7107_v18, %s6360_s30 }
 0x1fd   :  { %2383 = vrot.lane.b32.xlu1 %v7077_v45, %s6361_s8 }
 0x204   :  { %2385 = vrot.lane.b32.xlu2 %v7107_v18, %s6361_s8  ;;  %2381 = vrot.lane.b32.xlu0 %v7105_v10, %s6361_s8 }
 0x205   :  { %2576 = vrot.lane.b32.xlu1 %v7107_v18, %s6362_s9 }
 0x20c   :  { %2377 = vrot.lane.b32.xlu2 %v7079_v55, %s6361_s8  ;;  %2389 = vrot.lane.b32.xlu0 %v7093_v35, %s6361_s8 }
 0x20d   :  { %2568 = vrot.lane.b32.xlu1 %v7079_v55, %s6362_s9 }
 0x20e   :  { %v1560_v57 = vpop.permute.xlu2 %1559 }
 0x20f   :  { %v1552_v29 = vpop.permute.xlu1 %1551 }
 0x214   :  { %2387 = vrot.lane.b32.xlu2 %v7055_v26, %s6361_s8  ;;  %2379 = vrot.lane.b32.xlu0 %v7040_v44, %s6361_s8  ;;  %s6368_s8 = smov 34  }
 0x215   :  { %2578 = vrot.lane.b32.xlu1 %v7055_v26, %s6362_s9 }
 0x216   :  { %v1554_v25 = vpop.permute.xlu2 %1553 }
 0x217   :  { %v1558_v22 = vpop.permute.xlu1 %1557  ;;  %v1562_v27 = vsel %vm10274_vm10, %v1552_v29, %v1554_v25  ;;  %vm10289_vm10 = vmmov %vm10275_vm3 }
 0x218   :  { %v1565_v21 = vsel %vm10272_vm14, %v1558_v22, %v1560_v57  ;;  %vm10288_vm14 = vmmov %vm10279_vm1 }
 0x219   :  { %5740 = vmatpush.msk.msrb.mxu2 %vm6569_vm12, %v1565_v21  ;;  %v1541_v21 = vld [vmem:[%s9951_s3 + $0x10] sm:$0xff] }
 0x21b   :  { %5741 = vmatpush.msk.msrb.mxu2 %vm6569_vm12, %v1562_v27  ;;  %vm10276_vm12 = vmmov %vm10275_vm3 }
 0x21c   :  { %2572 = vrot.lane.b32.xlu2 %v7105_v10, %s6362_s9  ;;  %2582 = vrot.lane.b32.xlu0 %v7095_v3, %s6362_s9 }
 0x21d   :  { %2763 = vrot.lane.b32.xlu1 %v7105_v10, %s6363_s10  ;;  %5742 = vmatmul.msk.f32.vlgmr.msrb.gmra.mxu2 %vm10275_vm3, %v5724_v14 }
 0x21e   :  { %v1544_v33 = vpop.permute.xlu0 %1543  ;;  %v1494_v32 = vpop.permute.xlu2 %1493 }
 0x21f   :  { %v1550_v36 = vpop.permute.xlu1 %1549  ;;  %v1563_v52 = vsel %vm10280_vm8, %v1554_v25, %v1544_v33 }
 0x220   :  { %v1575_v24 = vsel %vm10289_vm10, %v1544_v33, %v1550_v36  ;;  %v1561_v53 = vsel %vm10275_vm3, %v1550_v36, %v1552_v29  ;;  %v10326_v33 = vld [vmem:[#allocation12_spill] sm:$0xff] }
 0x224   :  { %2580 = vrot.lane.b32.xlu2 %v7093_v35, %s6362_s9  ;;  %2574 = vrot.lane.b32.xlu0 %v7077_v45, %s6362_s9 }
 0x225   :  { %2771 = vrot.lane.b32.xlu1 %v7093_v35, %s6363_s10  ;;  %5743 = vmatmul.msk.f32.gmra.mxu2 %vm10276_vm12, %v5725_v16  ;;  %vm10290_vm12 = vmmov %vm10279_vm1 }
 0x226   :  { %v1546_v34 = vpop.permute.xlu0 %1545  ;;  %v7207_v59 = vpop.permute.xlu2 %1491 }
 0x227   :  { %v1566_v6 = vsel %vm10277_vm9, %v1560_v57, %v1546_v34  ;;  %v1514_v47 = vpop.permute.xlu1 %1513  ;;  %vm10291_vm9 = vmmov %vm10275_vm3 }
 0x228   :  { %5746 = vmatpush.msk.msrb.mxu3 %vm6573_vm13, %v1566_v6  ;;  %v1520_v50 = vsel %vm10279_vm1, %v1514_v47, %v1494_v32  ;;  %vm10292_vm1 = vmmov %vm10275_vm3 }
 0x229   :  { %vm10293_vm8 = vmmov %vm10292_vm1 }
 0x22a   :  { %5747 = vmatpush.msk.msrb.mxu3 %vm6573_vm13, %v1563_v52  ;;  %vm10283_vm13 = vmmov %vm10275_vm3  ;;  %v10339_v52 = vld [vmem:[#allocation18_spill] sm:$0xff] }
 0x22b   :  { %5748 = vmatmul.msk.f32.vlgmr.msrb.gmra.mxu3 %vm10281_vm4, %v5724_v14  ;;  %vm10305_vm10 = vmmov %vm10292_vm1 }
 0x22c   :  { %5770 = vmatpush.msk.msra.mxu3 %vm6599_vm15, %v1520_v50  ;;  %2570 = vrot.lane.b32.xlu2 %v7040_v44, %s6362_s9  ;;  %s6369_s9 = smov 30  }
 0x22d   :  { %2767 = vrot.lane.b32.xlu0 %v7107_v18, %s6363_s10  ;;  %2761 = vrot.lane.b32.xlu1 %v7040_v44, %s6363_s10 }
 0x22e   :  { %v1510_v40 = vpop.permute.xlu2 %1509  ;;  %v1556_v46 = vpop.permute.xlu0 %1555  ;;  %5744 = vmatmul.msk.f32.gmra.mxu2 %vm10283_vm13, %v5726_v54  ;;  %vm10300_vm13 = vnez %v10299_v51 }
 0x22f   :  { %v1564_v23 = vsel %vm10284_vm7, %v1556_v46, %v1558_v22  ;;  %v1576_v38 = vsel %vm10285_vm11, %v1546_v34, %v1556_v46  ;;  %v1508_v62 = vpop.permute.xlu1 %1507  ;;  %v1530_v12 = vsel %vm10290_vm12, %v1494_v32, %v1510_v40  ;;  %vm10302_vm7 = vnez %v10301_v56  ;;  %vm10303_vm11 = vmmov %vm10292_vm1  ;;  %v10328_v32 = vld [vmem:[#allocation16_spill] sm:$0xff]  ;;  %v10345_v46 = vld [vmem:[#allocation17_spill] sm:$0xff] }
 0x230   :  { %5728 = vmatpush.msk.msrb.mxu0 %vm6536_vm6, %v1576_v38  ;;  %5734 = vmatpush.msk.msrb.mxu1 %vm6532_vm5, %v1564_v23  ;;  %v1517_v42 = vsel %vm10288_vm14, %v1508_v62, %v7207_v59  ;;  %vm10304_vm14 = vmmov %vm10292_vm1  ;;  %v5777_v38 = vld [vmem:[%s9951_s3 + $0x48] sm:$0xff] }
 0x231   :  { %5771 = vmatpush.msk.msra.mxu3 %vm6599_vm15, %v1517_v42  ;;  %vm10295_vm15 = vnez %v10294_v61 }
 0x232   :  { %5729 = vmatpush.msk.msrb.mxu0 %vm6536_vm6, %v1575_v24  ;;  %5735 = vmatpush.msk.msrb.mxu1 %vm6532_vm5, %v1561_v53  ;;  %vm10296_vm5 = vmmov %vm10292_vm1  ;;  %v10358_v24 = vld [vmem:[#allocation20_spill] sm:$0xff]  ;;  %v10360_v53 = vld [vmem:[#allocation19_spill] sm:$0xff] }
 0x233   :  { %5730 = vmatmul.msk.f32.vlgmr.msrb.gmra.mxu0 %vm10291_vm9, %v5724_v14  ;;  %5736 = vmatmul.msk.f32.vlgmr.msrb.gmra.mxu1 %vm10292_vm1, %v5724_v14  ;;  %vm10297_vm6 = vmmov %vm10290_vm12 }
 0x234   :  { %5749 = vmatmul.msk.f32.gmra.mxu3 %vm10293_vm8, %v5725_v16  ;;  %5752 = vmatpush.msk.msra.mxu0 %vm10295_vm15, %v1530_v12  ;;  %vm10298_vm4 = vmmov %vm10297_vm6 }
 0x235   :  { %2773 = vrot.lane.b32.xlu2 %v7095_v3, %s6363_s10  ;;  %2759 = vrot.lane.b32.xlu0 %v7079_v55, %s6363_s10  ;;  %vm10306_vm3 = vmmov %vm10298_vm4 }
 0x236   :  { %v1861_v4 = vpop.permute.xlu2 %1860  ;;  %v1512_v9 = vpop.permute.xlu0 %1511  ;;  %2964 = vrot.lane.b32.xlu1 %v7095_v3, %s6365_s11  ;;  %5745 = vmatmul.msk.f32.gmra.mxu2 %vm10296_vm5, %v5727_v30  ;;  %vm10307_vm12 = vmmov %vm10292_vm1 }
 0x237   :  { %v1518_v48 = vsel %vm10297_vm6, %v1510_v40, %v1512_v9  ;;  %v1519_v8 = vsel %vm10298_vm4, %v1512_v9, %v1514_v47  ;;  %v1849_v31 = vpop.permute.xlu1 %1848  ;;  %vm10308_vm9 = vmmov %vm10292_vm1  ;;  %vm10312_vm4 = vcmask 121856  }
 0x238   :  { %5758 = vmatpush.msk.msra.mxu1 %vm10300_vm13, %v1518_v48  ;;  %5764 = vmatpush.msk.msra.mxu2 %vm10302_vm7, %v1519_v8  ;;  %vm10309_vm8 = vmmov %vm10292_vm1  ;;  %v10374_v48 = vld [vmem:[#allocation22_spill] sm:$0xff] }
 0x239   :  { %vm10310_vm5 = vmmov %vm10306_vm3 }
 0x23a   :  { %vm10311_vm6 = vmmov %vm10306_vm3 }
 0x23b   :  { %5731 = vmatmul.msk.f32.gmra.mxu0 %vm10303_vm11, %v5725_v16  ;;  %5737 = vmatmul.msk.f32.gmra.mxu1 %vm10304_vm14, %v5725_v16  ;;  %vm10314_vm11 = vmmov %vm10292_vm1  ;;  %vm10316_vm14 = vnez %v10315_v49  ;;  %v1542_v16 = vld [vmem:[%s9951_s3 + $0x18] sm:$0xff] }
 0x23c   :  { %5750 = vmatmul.msk.f32.gmra.mxu3 %vm10305_vm10, %v5726_v54  ;;  %vm10318_vm10 = vnez %v10317_v11  ;;  %v5807_v49 = vld [vmem:[%s9951_s3 + $0x78] sm:$0xff]  ;;  %v5832_v11 = vld [vmem:[%s9951_s3 + $0x80] sm:$0xff] }
 0x23d   :  { %2765 = vrot.lane.b32.xlu2 %v7077_v45, %s6363_s10  ;;  %2769 = vrot.lane.b32.xlu0 %v7055_v26, %s6363_s10 }
 0x23e   :  { %v1855_v43 = vpop.permute.xlu2 %1854  ;;  %v1506_v1 = vpop.permute.xlu0 %1505  ;;  %2956 = vrot.lane.b32.xlu1 %v7077_v45, %s6365_s11 }
 0x23f   :  { %v1516_v15 = vsel %vm10306_vm3, %v1506_v1, %v1508_v62  ;;  %v1847_v13 = vpop.permute.xlu1 %1846  ;;  %vm10319_vm3 = vmmov %vm10292_vm1 }
 0x240   :  { %5765 = vmatpush.msk.msra.mxu2 %vm10302_vm7, %v1516_v15  ;;  %vm10313_vm7 = vmmov %vm10312_vm4  ;;  %v5806_v15 = vld [vmem:[%s9951_s3 + $0x70] sm:$0xff] }
 0x241   :  { %5766 = vmatmul.msk.f32.vlgmr.msra.gmra.mxu2 %vm10307_vm12, %v1539_v63  ;;  %vm10320_vm12 = vmmov %vm10292_vm1 }
 0x243   :  { %5732 = vmatmul.msk.f32.gmra.mxu0 %vm10308_vm9, %v5726_v54  ;;  %5738 = vmatmul.msk.f32.gmra.mxu1 %vm10292_vm1, %v5726_v54  ;;  %vm10322_vm9 = vmmov %vm10292_vm1 }
 0x244   :  { %5751 = vmatmul.msk.f32.gmra.mxu3 %vm10309_vm8, %v5727_v30  ;;  %vm10324_vm1 = vmmov %vm10312_vm4 }
 0x245   :  { %2958 = vrot.lane.b32.xlu2 %v7107_v18, %s6365_s11  ;;  %2954 = vrot.lane.b32.xlu0 %v7105_v10, %s6365_s11  ;;  %vm10325_vm8 = vmmov %vm10324_vm1 }
 0x246   :  { %v1853_v2 = vpop.permute.xlu2 %1852  ;;  %v1504_v17 = vpop.permute.xlu0 %1503 }
 0x247   :  { %v1529_v19 = vsel %vm10310_vm5, %v7207_v59, %v1504_v17  ;;  %v1515_v37 = vsel %vm10311_vm6, %v1504_v17, %v1506_v1  ;;  %v1859_v20 = vpop.permute.xlu1 %1858  ;;  %vm10327_vm5 = vnez %v10326_v33  ;;  %vm10329_vm6 = vnez %v10328_v32  ;;  %v10384_v1 = vld [vmem:[#allocation23_spill] sm:$0xff]  ;;  %v10393_v17 = vld [vmem:[#allocation24_spill] sm:$0xff] }
 0x248   :  { %5753 = vmatpush.msk.msra.mxu0 %vm10295_vm15, %v1529_v19  ;;  %5759 = vmatpush.msk.msra.mxu1 %vm10300_vm13, %v1515_v37  ;;  %v1867_v58 = vsel %vm10312_vm4, %v1859_v20, %v1861_v4  ;;  %v1879_v41 = vsel %vm10313_vm7, %v1849_v31, %v1859_v20  ;;  %vm10321_vm15 = vmmov %vm10312_vm4  ;;  %v10395_v37 = vld [vmem:[#allocation21_spill] sm:$0xff] }
 0x249   :  { %5767 = vmatmul.msk.f32.gmra.mxu2 %vm10314_vm11, %v1540_v28  ;;  %v1878_v57 = vsel %vm10321_vm15, %v1847_v13, %v1853_v2  ;;  %vm10323_vm13 = vmmov %vm10312_vm4 }
 0x24a   :  { %5780 = vmatpush.msk.msrb.mxu0 %vm10316_vm14, %v1879_v41  ;;  %5786 = vmatpush.msk.msrb.mxu1 %vm10318_vm10, %v1867_v58  ;;  %v1864_v29 = vsel %vm10323_vm13, %v1853_v2, %v1855_v43  ;;  %vm10330_vm4 = vmmov %vm10319_vm3  ;;  %vm10340_vm13 = vnez %v10339_v52 }
 0x24b   :  { %5733 = vmatmul.msk.f32.gmra.mxu0 %vm10319_vm3, %v5727_v30  ;;  %5739 = vmatmul.msk.f32.gmra.mxu1 %vm10320_vm12, %v5727_v30  ;;  %vm10331_vm7 = vmmov %vm10319_vm3  ;;  %vm10336_vm12 = vcmask 7168   ;;  %v5779_v30 = vld [vmem:[%s9951_s3 + $0x58] sm:$0xff] }
 0x24c   :  { %5772 = vmatmul.msk.f32.vlgmr.msra.gmra.mxu3 %vm10322_vm9, %v1539_v63  ;;  %5781 = vmatpush.msk.msrb.mxu0 %vm10316_vm14, %v1878_v57  ;;  %vm10332_vm11 = vmmov %vm10319_vm3 }
 0x24d   :  { %2950 = vrot.lane.b32.xlu2 %v7079_v55, %s6365_s11  ;;  %2962 = vrot.lane.b32.xlu0 %v7093_v35, %s6365_s11  ;;  %vm10333_vm14 = vmmov %vm10319_vm3 }
 0x24e   :  { %5787 = vmatpush.msk.msrb.mxu1 %vm10318_vm10, %v1864_v29  ;;  %v2054_v25 = vpop.permute.xlu2 %2053  ;;  %v1863_v22 = vpop.permute.xlu0 %1862  ;;  %vm10334_vm10 = vmmov %vm10324_vm1 }
 0x24f   :  { %v1868_v39 = vsel %vm10324_vm1, %v1861_v4, %v1863_v22  ;;  %v1869_v27 = vsel %vm10325_vm8, %v1863_v22, %v1849_v31  ;;  %v2052_v14 = vpop.permute.xlu1 %2051  ;;  %vm10335_vm3 = vmmov %vm10324_vm1  ;;  %v5805_v31 = vld [vmem:[%s9951_s3 + $0x68] sm:$0xff] }
 0x250   :  { %5792 = vmatpush.msk.msrb.mxu2 %vm10327_vm5, %v1868_v39  ;;  %5798 = vmatpush.msk.msrb.mxu3 %vm10329_vm6, %v1869_v27  ;;  %v2059_v0 = vsel %vm10336_vm12, %v2052_v14, %v2054_v25  ;;  %vm10337_vm15 = vmmov %vm10330_vm4  ;;  %v10405_v39 = vld [vmem:[#allocation26_spill] sm:$0xff] }
 0x251   :  { %5768 = vmatmul.msk.f32.gmra.mxu2 %vm10330_vm4, %v1541_v21  ;;  %vm10338_vm9 = vmmov %vm10336_vm12 }
 0x252   :  { %vm10341_vm1 = vmmov %vm10330_vm4 }
 0x253   :  { %5754 = vmatmul.msk.f32.vlgmr.msra.gmra.mxu0 %vm10331_vm7, %v1539_v63  ;;  %5760 = vmatmul.msk.f32.vlgmr.msra.gmra.mxu1 %vm10332_vm11, %v1539_v63  ;;  %vm10342_vm8 = vmmov %vm10341_vm1 }
 0x254   :  { %5773 = vmatmul.msk.f32.gmra.mxu3 %vm10333_vm14, %v1540_v28  ;;  %vm10343_vm4 = vmmov %vm10341_vm1 }
 0x255   :  { %2960 = vrot.lane.b32.xlu2 %v7055_v26, %s6365_s11  ;;  %2952 = vrot.lane.b32.xlu0 %v7040_v44, %s6365_s11  ;;  %vm10347_vm7 = vmmov %vm10341_vm1 }
 0x256   :  { %v1857_v36 = vpop.permute.xlu0 %1856  ;;  %v2048_v47 = vpop.permute.xlu2 %2047  ;;  %vm10348_vm11 = vmmov %vm10341_vm1 }
 0x257   :  { %v1865_v34 = vsel %vm10334_vm10, %v1855_v43, %v1857_v36  ;;  %v1866_v59 = vsel %vm10335_vm3, %v1857_v36, %v1847_v13  ;;  %v2046_v6 = vpop.permute.xlu1 %2045  ;;  %vm10349_vm14 = vmmov %vm10341_vm1 }
 0x258   :  { %5793 = vmatpush.msk.msrb.mxu2 %vm10327_vm5, %v1865_v34  ;;  %5799 = vmatpush.msk.msrb.mxu3 %vm10329_vm6, %v1866_v59  ;;  %v2056_v50 = vsel %vm10338_vm9, %v2046_v6, %v2048_v47  ;;  %vm10344_vm5 = vmmov %vm10338_vm9  ;;  %vm10346_vm6 = vnez %v10345_v46  ;;  %v10415_v34 = vld [vmem:[#allocation28_spill] sm:$0xff] }
 0x259   :  { %5769 = vmatmul.msk.f32.gmra.mxu2 %vm10337_vm15, %v1542_v16  ;;  %vm10350_vm10 = vmmov %vm10341_vm1 }
 0x25a   :  { %5820 = vmatpush.msk.msra.mxu2 %vm10340_vm13, %v2059_v0  ;;  %vm10351_vm3 = vmmov %vm10344_vm5 }
 0x25b   :  { %5755 = vmatmul.msk.f32.gmra.mxu0 %vm10341_vm1, %v1540_v28  ;;  %5761 = vmatmul.msk.f32.gmra.mxu1 %vm10342_vm8, %v1540_v28  ;;  %vm10352_vm12 = vmmov %vm10341_vm1 }
 0x25c   :  { %5774 = vmatmul.msk.f32.gmra.mxu3 %vm10343_vm4, %v1541_v21  ;;  %5821 = vmatpush.msk.msra.mxu2 %vm10340_vm13, %v2056_v50  ;;  %vm10353_vm15 = vmmov %vm10341_vm1  ;;  %vm10359_vm4 = vnez %v10358_v24 }
 0x25d   :  { %vm10354_vm9 = vmmov %vm10341_vm1 }
 0x25e   :  { %v2040_v54 = vpop.permute.xlu0 %2039  ;;  %vm10355_vm13 = vmmov %vm10341_vm1  ;;  %v2386_v61 = vpop.permute.xlu2 %2385 }
 0x25f   :  { %v2060_v40 = vsel %vm10344_vm5, %v2054_v25, %v2040_v54  ;;  %vm10356_vm1 = vmmov %vm10351_vm3  ;;  %vm10361_vm5 = vnez %v10360_v53 }
 0x260   :  { %5826 = vmatpush.msk.msra.mxu3 %vm10346_vm6, %v2060_v40  ;;  %vm10357_vm8 = vmmov %vm10356_vm1 }
 0x261   :  { %5794 = vmatmul.msk.f32.vlgmr.msrb.gmra.mxu2 %vm10347_vm7, %v5776_v7 }
 0x262   :  { %2317 = vmatpush.msrb.mxu2 %v7093_v35  ;;  %v2044_v35 = vpop.permute.xlu1 %2043 }
 0x263   :  { %5756 = vmatmul.msk.f32.gmra.mxu0 %vm10348_vm11, %v1541_v21  ;;  %5762 = vmatmul.msk.f32.gmra.mxu1 %vm10349_vm14, %v1541_v21  ;;  %vm10364_vm11 = vmmov %vm10356_vm1 }
 0x264   :  { %5775 = vmatmul.msk.f32.gmra.mxu3 %vm10350_vm10, %v1542_v16  ;;  %2318 = vmatpush.msrb.mxu2 %v7105_v10  ;;  %v2055_v12 = vsel %vm10364_vm11, %v2044_v35, %v2046_v6 }
 0x266   :  { %v2038_v23 = vpop.permute.xlu0 %2037  ;;  %v2378_v9 = vpop.permute.xlu2 %2377 }
 0x267   :  { %v2057_v62 = vsel %vm10351_vm3, %v2048_v47, %v2038_v23  ;;  %v5834_v47 = vld [vmem:[%s9951_s3 + $0x90] sm:$0xff] }
 0x268   :  { %5827 = vmatpush.msk.msra.mxu3 %vm10346_vm6, %v2057_v62  ;;  %vm10362_vm6 = vmmov %vm10347_vm7  ;;  %v10426_v62 = vld [vmem:[#allocation25_spill] sm:$0xff] }
 0x269   :  { %5795 = vmatmul.msk.f32.gmra.mxu2 %vm10352_vm12, %v5777_v38  ;;  %vm10363_vm7 = vmmov %vm10356_vm1 }
 0x26a   :  { %vm10365_vm14 = vmmov %vm10362_vm6  ;;  %v2392_v4 = vpop.permute.xlu1 %2391 }
 0x26b   :  { %5757 = vmatmul.msk.f32.gmra.mxu0 %vm10353_vm15, %v1542_v16  ;;  %5763 = vmatmul.msk.f32.gmra.mxu1 %vm10354_vm9, %v1542_v16  ;;  %vm10366_vm10 = vmmov %vm10362_vm6 }
 0x26c   :  { %5800 = vmatmul.msk.f32.vlgmr.msrb.gmra.mxu3 %vm10355_vm13, %v5776_v7  ;;  %vm10367_vm3 = vmmov %vm10362_vm6 }
 0x26d   :  { %2346 = vmatpush.msrb.mxu3 %v7095_v3  ;;  %v2069_v3 = vsel %vm10363_vm7, %v2038_v23, %v2044_v35  ;;  %vm10368_vm12 = vmmov %vm10367_vm3  ;;  %v10424_v23 = vld [vmem:[#allocation27_spill] sm:$0xff] }
 0x26e   :  { %v2050_v10 = vpop.permute.xlu0 %2049  ;;  %vm10369_vm15 = vmmov %vm10367_vm3  ;;  %v2388_v51 = vpop.permute.xlu2 %2387 }
 0x26f   :  { %2347 = vmatpush.msrb.mxu3 %v7077_v45  ;;  %v2058_v60 = vsel %vm10356_vm1, %v2050_v10, %v2052_v14  ;;  %v2070_v42 = vsel %vm10357_vm8, %v2040_v54, %v2050_v10  ;;  %vm10370_vm9 = vmmov %vm10367_vm3  ;;  %vm10372_vm1 = vcmask 1039360   ;;  %v5833_v14 = vld [vmem:[%s9951_s3 + $0x88] sm:$0xff] }
 0x270   :  { %5808 = vmatpush.msk.msra.mxu0 %vm10359_vm4, %v2070_v42  ;;  %5814 = vmatpush.msk.msra.mxu1 %vm10361_vm5, %v2058_v60  ;;  %vm10371_vm13 = vmmov %vm10367_vm3 }
 0x271   :  { %5796 = vmatmul.msk.f32.gmra.mxu2 %vm10362_vm6, %v5778_v5  ;;  %vm10373_vm8 = vmmov %vm10367_vm3 }
 0x272   :  { %5809 = vmatpush.msk.msra.mxu0 %vm10359_vm4, %v2069_v3  ;;  %5815 = vmatpush.msk.msra.mxu1 %vm10361_vm5, %v2055_v12  ;;  %vm10375_vm4 = vnez %v10374_v48  ;;  %vm10376_vm5 = vmmov %vm10367_vm3 }
 0x273   :  { %5782 = vmatmul.msk.f32.vlgmr.msrb.gmra.mxu0 %vm10365_vm14, %v5776_v7  ;;  %5788 = vmatmul.msk.f32.vlgmr.msrb.gmra.mxu1 %vm10366_vm10, %v5776_v7  ;;  %vm10377_vm6 = vmmov %vm10367_vm3 }
 0x274   :  { %5801 = vmatmul.msk.f32.gmra.mxu3 %vm10367_vm3, %v5777_v38  ;;  %2259 = vmatpush.msrb.mxu0 %v7107_v18  ;;  %vm10378_vm7 = vmmov %vm10372_vm1 }
 0x275   :  { %2288 = vmatpush.msrb.mxu1 %v7055_v26  ;;  %vm10379_vm11 = vmmov %vm10367_vm3 }
 0x276   :  { %2260 = vmatpush.msrb.mxu0 %v7079_v55  ;;  %v2382_v45 = vpop.permute.xlu0 %2381  ;;  %v5804_v55 = vld [vmem:[%s9951_s3 + $0x60] sm:$0xff]  ;;  %vm10380_vm14 = vmmov %vm10367_vm3  ;;  %v2573_v28 = vpop.permute.xlu2 %2572 }
 0x277   :  { %2289 = vmatpush.msrb.mxu1 %v7040_v44  ;;  %v2384_v44 = vpop.permute.xlu1 %2383  ;;  %vm10381_vm10 = vmmov %vm10367_vm3 }
 0x278   :  { %v2395_v8 = vsel %vm10378_vm7, %v2382_v45, %v2384_v44 }
 0x279   :  { %5797 = vmatmul.msk.f32.gmra.mxu2 %vm10368_vm12, %v5779_v30  ;;  %vm10382_vm12 = vmmov %vm10372_vm1 }
 0x27a   :  { %v2410_v56 = vsel %vm10382_vm12, %v2392_v4, %v2386_v61 }
 0x27b   :  { %5783 = vmatmul.msk.f32.gmra.mxu0 %vm10369_vm15, %v5777_v38  ;;  %5789 = vmatmul.msk.f32.gmra.mxu1 %vm10370_vm9, %v5777_v38  ;;  %vm10383_vm15 = vmmov %vm10367_vm3  ;;  %vm10385_vm9 = vnez %v10384_v1 }
 0x27c   :  { %5802 = vmatmul.msk.f32.gmra.mxu3 %vm10371_vm13, %v5778_v5  ;;  %vm10386_vm13 = vmmov %vm10372_vm1 }
 0x27d   :  { %v2409_v63 = vsel %vm10386_vm13, %v2384_v44, %v2378_v9 }
 0x27e   :  { %v2390_v26 = vpop.permute.xlu0 %2389  ;;  %v2581_v57 = vpop.permute.xlu2 %2580 }
 0x27f   :  { %v2398_v18 = vsel %vm10372_vm1, %v2390_v26, %v2392_v4  ;;  %vm10387_vm1 = vmmov %vm10367_vm3  ;;  %v2577_v19 = vpop.permute.xlu1 %2576 }
 0x280   :  { %vm10399_vm12 = vmmov %vm10387_vm1 }
 0x281   :  { %5822 = vmatmul.msk.f32.vlgmr.msra.gmra.mxu2 %vm10373_vm8, %v5804_v55  ;;  %vm10388_vm8 = vmmov %vm10378_vm7 }
 0x282   :  { %5868 = vmatpush.msk.msra.mxu2 %vm10375_vm4, %v2398_v18  ;;  %v2396_v13 = vsel %vm10388_vm8, %v2386_v61, %v2388_v51  ;;  %vm10402_vm13 = vmmov %vm10387_vm1  ;;  %v10437_v18 = vld [vmem:[#allocation30_spill] sm:$0xff] }
 0x283   :  { %5784 = vmatmul.msk.f32.gmra.mxu0 %vm10376_vm5, %v5778_v5  ;;  %5790 = vmatmul.msk.f32.gmra.mxu1 %vm10377_vm6, %v5778_v5  ;;  %vm10390_vm5 = vmmov %vm10387_vm1  ;;  %v5835_v5 = vld [vmem:[%s9951_s3 + $0x98] sm:$0xff] }
 0x284   :  { %5803 = vmatmul.msk.f32.gmra.mxu3 %vm10379_vm11, %v5779_v30  ;;  %5869 = vmatpush.msk.msra.mxu2 %vm10375_vm4, %v2395_v8  ;;  %vm10389_vm4 = vmmov %vm10387_vm1  ;;  %vm10394_vm11 = vnez %v10393_v17  ;;  %v5853_v8 = vld [vmem:[%s9951_s3 + $0xa8] sm:$0xff] }
 0x285   :  { %vm10391_vm6 = vmmov %vm10378_vm7 }
 0x286   :  { %v2380_v43 = vpop.permute.xlu0 %2379  ;;  %v2397_v2 = vsel %vm10391_vm6, %v2388_v51, %v2390_v26  ;;  %vm10392_vm7 = vmmov %vm10387_vm1  ;;  %v2571_v32 = vpop.permute.xlu2 %2570 }
 0x287   :  { %v2569_v29 = vpop.permute.xlu1 %2568  ;;  %vm10404_vm8 = vmmov %vm10389_vm4 }
 0x289   :  { %5823 = vmatmul.msk.f32.gmra.mxu2 %vm10380_vm14, %v5805_v31  ;;  %vm10396_vm14 = vnez %v10395_v37 }
 0x28b   :  { %5785 = vmatmul.msk.f32.gmra.mxu0 %vm10381_vm10, %v5779_v30  ;;  %5791 = vmatmul.msk.f32.gmra.mxu1 %vm10367_vm3, %v5779_v30  ;;  %vm10397_vm10 = vmmov %vm10391_vm6 }
 0x28c   :  { %5828 = vmatmul.msk.f32.vlgmr.msra.gmra.mxu3 %vm10383_vm15, %v5804_v55  ;;  %v2393_v20 = vsel %vm10397_vm10, %v2378_v9, %v2380_v43  ;;  %vm10398_vm3 = vmmov %vm10391_vm6 }
 0x28d   :  { %5874 = vmatpush.msk.msra.mxu3 %vm10385_vm9, %v2410_v56  ;;  %v2394_v41 = vsel %vm10398_vm3, %v2380_v43, %v2382_v45  ;;  %vm10400_vm15 = vmmov %vm10387_vm1  ;;  %v5852_v45 = vld [vmem:[%s9951_s3 + $0xa0] sm:$0xff] }
 0x28e   :  { %v2583_v58 = vpop.permute.xlu0 %2582  ;;  %vm10407_vm6 = vmmov %vm10390_vm5 }
 0x28f   :  { %5875 = vmatpush.msk.msra.mxu3 %vm10385_vm9, %v2409_v63  ;;  %vm10401_vm9 = vmmov %vm10387_vm1  ;;  %v2579_v36 = vpop.permute.xlu1 %2578  ;;  %v2774_v40 = vpop.permute.xlu2 %2773 }
 0x290   :  { %vm10411_vm10 = vmmov %vm10390_vm5 }
 0x291   :  { %5824 = vmatmul.msk.f32.gmra.mxu2 %vm10387_vm1, %v5806_v15  ;;  %vm10403_vm1 = vcmask 924672   ;;  %vm10412_vm3 = vmmov %vm10390_vm5 }
 0x292   :  { %v2589_v21 = vsel %vm10403_vm1, %v2581_v57, %v2583_v58 }
 0x293   :  { %5810 = vmatmul.msk.f32.vlgmr.msra.gmra.mxu0 %vm10389_vm4, %v5804_v55  ;;  %5816 = vmatmul.msk.f32.vlgmr.msra.gmra.mxu1 %vm10390_vm5, %v5804_v55  ;;  %vm10406_vm4 = vnez %v10405_v39 }
 0x294   :  { %5829 = vmatmul.msk.f32.gmra.mxu3 %vm10392_vm7, %v5805_v31  ;;  %5856 = vmatpush.msk.msra.mxu0 %vm10394_vm11, %v2396_v13  ;;  %vm10408_vm7 = vmmov %vm10403_vm1 }
 0x295   :  { %5862 = vmatpush.msk.msra.mxu1 %vm10396_vm14, %v2397_v2 }
 0x296   :  { %5857 = vmatpush.msk.msra.mxu0 %vm10394_vm11, %v2393_v20  ;;  %v2575_v25 = vpop.permute.xlu0 %2574  ;;  %vm10409_vm11 = vmmov %vm10390_vm5 }
 0x297   :  { %5863 = vmatpush.msk.msra.mxu1 %vm10396_vm14, %v2394_v41  ;;  %v2586_v27 = vsel %vm10408_vm7, %v2573_v28, %v2575_v25  ;;  %vm10410_vm14 = vmmov %vm10390_vm5  ;;  %v7508_v46 = vpop.permute.xlu1 %2763  ;;  %v2766_v3 = vpop.permute.xlu2 %2765 }
 0x299   :  { %5825 = vmatmul.msk.f32.gmra.mxu2 %vm10399_vm12, %v5807_v49  ;;  %vm10413_vm12 = vmmov %vm10403_vm1 }
 0x29a   :  { %v2601_v16 = vsel %vm10413_vm12, %v2583_v58, %v2577_v19 }
 0x29b   :  { %5811 = vmatmul.msk.f32.gmra.mxu0 %vm10400_vm15, %v5805_v31  ;;  %5817 = vmatmul.msk.f32.gmra.mxu1 %vm10401_vm9, %v5805_v31  ;;  %vm10414_vm15 = vmmov %vm10412_vm3  ;;  %vm10416_vm9 = vnez %v10415_v34 }
 0x29c   :  { %5830 = vmatmul.msk.f32.gmra.mxu3 %vm10402_vm13, %v5806_v15  ;;  %vm10417_vm13 = vmmov %vm10403_vm1 }
 0x29d   :  { %v2600_v59 = vsel %vm10417_vm13, %v2575_v25, %v2569_v29  ;;  %vm10418_vm1 = vmmov %vm10412_vm3  ;;  %v10458_v25 = vld [vmem:[#allocation29_spill] sm:$0xff] }
 0x29e   :  { %vm10430_vm12 = vmmov %vm10418_vm1 }
 0x29f   :  { %v2768_v38 = vpop.permute.xlu0 %2767  ;;  %vm10433_vm13 = vmmov %vm10418_vm1  ;;  %v2772_v12 = vpop.permute.xlu1 %2771 }
 0x2a0   :  { %v7465_v22 = vpop.f32.mrf.mxu2  ;;  %v2959_v34 = vpop.permute.xlu2 %2958 }
 0x2a1   :  { %5844 = vmatmul.msk.f32.vlgmr.msrb.gmra.mxu2 %vm10404_vm8, %v5832_v11  ;;  %vm10419_vm8 = vmmov %vm10408_vm7 }
 0x2a2   :  { %5896 = vmatpush.msk.msrb.mxu2 %vm10406_vm4, %v2589_v21  ;;  %v2587_v54 = vsel %vm10419_vm8, %v2577_v19, %v2579_v36 }
 0x2a3   :  { %5812 = vmatmul.msk.f32.gmra.mxu0 %vm10390_vm5, %v5806_v15  ;;  %5818 = vmatmul.msk.f32.gmra.mxu1 %vm10407_vm6, %v5806_v15  ;;  %vm10421_vm5 = vmmov %vm10418_vm1 }
 0x2a4   :  { %5831 = vmatmul.msk.f32.gmra.mxu3 %vm10409_vm11, %v5807_v49  ;;  %5897 = vmatpush.msk.msrb.mxu2 %vm10406_vm4, %v2586_v27  ;;  %vm10420_vm4 = vmmov %vm10418_vm1  ;;  %vm10425_vm11 = vnez %v10424_v23  ;;  %v5855_v27 = vld [vmem:[%s9951_s3 + $0xb8] sm:$0xff] }
 0x2a5   :  { %vm10422_vm6 = vmmov %vm10408_vm7 }
 0x2a6   :  { %v2588_v7 = vsel %vm10422_vm6, %v2579_v36, %v2581_v57  ;;  %vm10423_vm7 = vmmov %vm10418_vm1  ;;  %v10456_v57 = vld [vmem:[#allocation31_spill] sm:$0xff] }
 0x2a7   :  { %v2760_v30 = vpop.permute.xlu0 %2759  ;;  %vm10436_vm8 = vmmov %vm10420_vm4  ;;  %v2762_v15 = vpop.permute.xlu1 %2761 }
 0x2a8   :  { %v7480_v33 = vpop.f32.mrf.mxu2 }
 0x2a9   :  { %5845 = vmatmul.msk.f32.gmra.mxu2 %vm10410_vm14, %v5833_v14  ;;  %vm10427_vm14 = vnez %v10426_v62  ;;  %v36_v62 = vld [vmem:[%s9954_s6 + $0x18] sm:$0xff] }
 0x2ab   :  { %5813 = vmatmul.msk.f32.gmra.mxu0 %vm10411_vm10, %v5807_v49  ;;  %5819 = vmatmul.msk.f32.gmra.mxu1 %vm10412_vm3, %v5807_v49  ;;  %vm10428_vm10 = vmmov %vm10422_vm6 }
 0x2ac   :  { %5848 = vmatmul.msk.f32.vlgmr.msrb.gmra.mxu3 %vm10414_vm15, %v5832_v11  ;;  %v2584_v35 = vsel %vm10428_vm10, %v2569_v29, %v2571_v32  ;;  %vm10429_vm3 = vmmov %vm10422_vm6 }
 0x2ad   :  { %5902 = vmatpush.msk.msrb.mxu3 %vm10416_vm9, %v2601_v16  ;;  %v2585_v10 = vsel %vm10429_vm3, %v2571_v32, %v2573_v28  ;;  %vm10431_vm15 = vmmov %vm10418_vm1  ;;  %v5854_v28 = vld [vmem:[%s9951_s3 + $0xb0] sm:$0xff] }
 0x2ae   :  { %v7490_v6 = vpop.f32.mrf.mxu3  ;;  %vm10439_vm6 = vmmov %vm10421_vm5 }
 0x2af   :  { %5903 = vmatpush.msk.msrb.mxu3 %vm10416_vm9, %v2600_v59  ;;  %vm10432_vm9 = vmmov %vm10418_vm1  ;;  %v2770_v43 = vpop.permute.xlu0 %2769 }
 0x2b0   :  { %v7497_v0 = vpop.f32.mrf.mxu0  ;;  %v7499_v50 = vpop.f32.mrf.mxu1  ;;  %vm10445_vm10 = vmmov %vm10421_vm5 }
 0x2b1   :  { %5846 = vmatmul.msk.f32.gmra.mxu2 %vm10418_vm1, %v5834_v47  ;;  %v7502_v52 = vpop.f32.mrf.mxu2  ;;  %vm10435_vm1 = vcmask 916480   ;;  %vm10446_vm3 = vmmov %vm10421_vm5 }
 0x2b2   :  { %v2780_v55 = vsel %vm10435_vm1, %v2772_v12, %v2774_v40  ;;  %v2778_v41 = vsel %vm10435_vm1, %v2768_v38, %v2770_v43 }
 0x2b3   :  { %5836 = vmatmul.msk.f32.vlgmr.msrb.gmra.mxu0 %vm10420_vm4, %v5832_v11  ;;  %5840 = vmatmul.msk.f32.vlgmr.msrb.gmra.mxu1 %vm10421_vm5, %v5832_v11  ;;  %vm10438_vm4 = vnez %v10437_v18  ;;  %v10481_v18 = vld [vmem:[#allocation36_spill] sm:$0xff] }
 0x2b4   :  { %5849 = vmatmul.msk.f32.gmra.mxu3 %vm10423_vm7, %v5833_v14  ;;  %5884 = vmatpush.msk.msrb.mxu0 %vm10425_vm11, %v2587_v54  ;;  %vm10440_vm7 = vmmov %vm10435_vm1 }
 0x2b5   :  { %5890 = vmatpush.msk.msrb.mxu1 %vm10427_vm14, %v2588_v7  ;;  %v2777_v9 = vsel %vm10440_vm7, %v7508_v46, %v2766_v3  ;;  %vm10459_vm7 = vnez %v10458_v25 }
 0x2b6   :  { %5885 = vmatpush.msk.msrb.mxu0 %vm10425_vm11, %v2584_v35  ;;  %vm10441_vm11 = vmmov %vm10421_vm5 }
 0x2b7   :  { %5891 = vmatpush.msk.msrb.mxu1 %vm10427_vm14, %v2585_v10  ;;  %v7524_v60 = vpop.f32.mrf.mxu3  ;;  %vm10444_vm14 = vmmov %vm10421_vm5  ;;  %v7596_v11 = vpop.permute.xlu0 %2954 }
 0x2b8   :  { %v7526_v42 = vpop.f32.mrf.mxu0  ;;  %v7528_v24 = vpop.f32.mrf.mxu1 }
 0x2b9   :  { %5847 = vmatmul.msk.f32.gmra.mxu2 %vm10430_vm12, %v5835_v5  ;;  %v7531_v53 = vpop.f32.mrf.mxu2  ;;  %vm10447_vm12 = vmmov %vm10435_vm1 }
 0x2ba   :  { %v2792_v1 = vsel %vm10447_vm12, %v2774_v40, %v2768_v38 }
 0x2bb   :  { %5837 = vmatmul.msk.f32.gmra.mxu0 %vm10431_vm15, %v5833_v14  ;;  %5841 = vmatmul.msk.f32.gmra.mxu1 %vm10432_vm9, %v5833_v14  ;;  %vm10448_vm15 = vmmov %vm10446_vm3  ;;  %v2965_v14 = vpop.permute.xlu1 %2964 }
 0x2bc   :  { %5850 = vmatmul.msk.f32.gmra.mxu3 %vm10433_vm13, %v5834_v47  ;;  %vm10450_vm9 = vmmov %vm10435_vm1 }
 0x2bd   :  { %v2791_v17 = vsel %vm10450_vm9, %v2766_v3, %v2760_v30  ;;  %vm10451_vm13 = vmmov %vm10446_vm3  ;;  %vm10467_vm9 = vcmask 908288  }
 0x2bf   :  { %v7539_v61 = vpop.f32.mrf.mxu3 }
 0x2c0   :  { %v7541_v4 = vpop.f32.mrf.mxu0  ;;  %v7543_v26 = vpop.f32.mrf.mxu1 }
 0x2c1   :  { %10434 = vst [vmem:[#allocation37_spill] sm:$0xff] %v7541_v4  ;;  %5870 = vmatmul.msk.f32.vlgmr.msra.gmra.mxu2 %vm10436_vm8, %v5852_v45  ;;  %vm10452_vm8 = vmmov %vm10446_vm3 }
 0x2c2   :  { %5924 = vmatpush.msk.msra.mxu2 %vm10438_vm4, %v2780_v55 }
 0x2c3   :  { %5838 = vmatmul.msk.f32.gmra.mxu0 %vm10421_vm5, %v5834_v47  ;;  %5842 = vmatmul.msk.f32.gmra.mxu1 %vm10439_vm6, %v5834_v47  ;;  %vm10454_vm5 = vmmov %vm10435_vm1  ;;  %vm10457_vm6 = vnez %v10456_v57  ;;  %v2963_v47 = vpop.permute.xlu0 %2962  ;;  %v2957_v38 = vpop.permute.xlu1 %2956  ;;  %v5883_v57 = vld [vmem:[%s9951_s3 + $0xd8] sm:$0xff] }
 0x2c4   :  { %5851 = vmatmul.msk.f32.gmra.mxu3 %vm10441_vm11, %v5835_v5  ;;  %5925 = vmatpush.msk.msra.mxu2 %vm10438_vm4, %v2777_v9  ;;  %v1805_v44 = vpop.f32.mrf.mxu2  ;;  %vm10453_vm4 = vmmov %vm10446_vm3  ;;  %v2779_v49 = vsel %vm10454_vm5, %v2770_v43, %v2772_v12  ;;  %v2971_v23 = vsel %vm10467_vm9, %v2963_v47, %v2965_v14 }
 0x2c5   :  { %v7557_v48 = vadd.f32 %v1805_v44, %v7465_v22  ;;  %vm10460_vm11 = vmmov %vm10435_vm1 }
 0x2c6   :  { %v2775_v21 = vsel %vm10460_vm11, %v2760_v30, %v2762_v15 }
 0x2c7   :  { %v7562_v31 = vpop.f32.mrf.mxu3 }
 0x2c8   :  { %v7564_v51 = vpop.f32.mrf.mxu0  ;;  %v7566_v56 = vpop.f32.mrf.mxu1 }
 0x2c9   :  { %10442 = vst [vmem:[#allocation38_spill] sm:$0xff] %v7564_v51  ;;  %5871 = vmatmul.msk.f32.gmra.mxu2 %vm10444_vm14, %v5853_v8  ;;  %vm10461_vm14 = vmmov %vm10435_vm1 }
 0x2ca   :  { %10443 = vst [vmem:[#allocation43_spill] sm:$0xff] %v7566_v56  ;;  %v2776_v39 = vsel %vm10461_vm14, %v2762_v15, %v7508_v46  ;;  %vm10482_vm14 = vnez %v10481_v18 }
 0x2cb   :  { %5839 = vmatmul.msk.f32.gmra.mxu0 %vm10445_vm10, %v5835_v5  ;;  %5843 = vmatmul.msk.f32.gmra.mxu1 %vm10446_vm3, %v5835_v5  ;;  %v2951_v5 = vpop.permute.xlu2 %2950  ;;  %v2953_v15 = vpop.permute.xlu0 %2952 }
 0x2cc   :  { %5876 = vmatmul.msk.f32.vlgmr.msra.gmra.mxu3 %vm10448_vm15, %v5852_v45  ;;  %v1808_v63 = vpop.f32.mrf.mxu2 }
 0x2cd   :  { %5930 = vmatpush.msk.msra.mxu3 %vm6853_vm2, %v2792_v1  ;;  %v7576_v2 = vadd.f32 %v1808_v63, %v7480_v33 }
 0x2cf   :  { %5931 = vmatpush.msk.msra.mxu3 %vm6853_vm2, %v2791_v17  ;;  %v1834_v19 = vpop.f32.mrf.mxu3  ;;  %vm10455_vm2 = vmmov %vm10446_vm3  ;;  %v10490_v17 = vld [vmem:[#allocation35_spill] sm:$0xff] }
 0x2d0   :  { %v7585_v37 = vadd.f32 %v1834_v19, %v7490_v6  ;;  %v7587_v20 = vpop.f32.mrf.mxu0  ;;  %v7589_v58 = vpop.f32.mrf.mxu1  ;;  %vm10462_vm10 = vmmov %vm10455_vm2 }
 0x2d1   :  { %5872 = vmatmul.msk.f32.gmra.mxu2 %vm10451_vm13, %v5854_v28  ;;  %vm10463_vm3 = vmmov %vm10455_vm2 }
 0x2d2   :  { %vm10464_vm12 = vmmov %vm10455_vm2 }
 0x2d3   :  { %5858 = vmatmul.msk.f32.vlgmr.msra.gmra.mxu0 %vm10452_vm8, %v5852_v45  ;;  %5864 = vmatmul.msk.f32.vlgmr.msra.gmra.mxu1 %vm10453_vm4, %v5852_v45  ;;  %vm10465_vm15 = vmmov %vm10455_vm2 }
 0x2d4   :  { %5877 = vmatmul.msk.f32.gmra.mxu3 %vm10455_vm2, %v5853_v8  ;;  %5912 = vmatpush.msk.msra.mxu0 %vm10457_vm6, %v2778_v41  ;;  %v1811_v29 = vpop.f32.mrf.mxu2  ;;  %vm10468_vm13 = vmmov %vm10455_vm2 }
 0x2d5   :  { %5918 = vmatpush.msk.msra.mxu1 %vm10459_vm7, %v2779_v49  ;;  %v7604_v22 = vadd.f32 %v1811_v29, %v7502_v52  ;;  %v5880_v52 = vld [vmem:[%s9951_s3 + $0xc0] sm:$0xff]  ;;  %vm10470_vm1 = vmmov %vm10455_vm2 }
 0x2d6   :  { %5913 = vmatpush.msk.msra.mxu0 %vm10457_vm6, %v2775_v21  ;;  %vm10471_vm8 = vmmov %vm10470_vm1 }
 0x2d7   :  { %5919 = vmatpush.msk.msra.mxu1 %vm10459_vm7, %v2776_v39  ;;  %v1837_v33 = vpop.f32.mrf.mxu3  ;;  %vm10472_vm4 = vmmov %vm10467_vm9 }
 0x2d8   :  { %v7617_v32 = vadd.f32 %v1837_v33, %v7524_v60  ;;  %v7619_v36 = vpop.f32.mrf.mxu0  ;;  %v7621_v16 = vpop.f32.mrf.mxu1  ;;  %v2968_v35 = vsel %vm10472_vm4, %v7596_v11, %v2957_v38  ;;  %vm10473_vm5 = vmmov %vm10470_vm1  ;;  %v2966_v19 = vsel %vm10472_vm4, %v2951_v5, %v2953_v15 }
 0x2d9   :  { %5873 = vmatmul.msk.f32.gmra.mxu2 %vm10462_vm10, %v5855_v27  ;;  %vm10476_vm2 = vmmov %vm10470_vm1 }
 0x2da   :  { %vm10477_vm6 = vmmov %vm10470_vm1 }
 0x2db   :  { %5859 = vmatmul.msk.f32.gmra.mxu0 %vm10463_vm3, %v5853_v8  ;;  %5865 = vmatmul.msk.f32.gmra.mxu1 %vm10464_vm12, %v5853_v8  ;;  %vm10479_vm7 = vmmov %vm10472_vm4  ;;  %v2961_v8 = vpop.permute.xlu2 %2960 }
 0x2dc   :  { %5878 = vmatmul.msk.f32.gmra.mxu3 %vm10465_vm15, %v5854_v28  ;;  %v1814_v59 = vpop.f32.mrf.mxu2  ;;  %vm10483_vm10 = vmmov %vm10472_vm4 }
 0x2dd   :  { %v7628_v6 = vadd.f32 %v1814_v59, %v7531_v53  ;;  %v5881_v53 = vld [vmem:[%s9951_s3 + $0xc8] sm:$0xff]  ;;  %v2982_v44 = vsel %vm10483_vm10, %v2957_v38, %v2951_v5  ;;  %vm10485_vm12 = vmmov %vm10472_vm4 }
 0x2de   :  { %v2969_v13 = vsel %vm10485_vm12, %v2959_v34, %v2961_v8 }
 0x2df   :  { %v1840_v54 = vpop.f32.mrf.mxu3 }
 0x2e0   :  { %v7634_v7 = vadd.f32 %v1840_v54, %v7539_v61  ;;  %v7636_v40 = vpop.f32.mrf.mxu0  ;;  %v7638_v46 = vpop.f32.mrf.mxu1  ;;  %v2983_v61 = vsel %vm10479_vm7, %v2965_v14, %v2959_v34 }
 0x2e1   :  { %10466 = vst [vmem:[#allocation39_spill] sm:$0xff] %v7636_v40  ;;  %5898 = vmatmul.msk.f32.vlgmr.msrb.gmra.mxu2 %vm10468_vm13, %v5880_v52  ;;  %vm10488_vm13 = vmmov %vm10472_vm4 }
 0x2e2   :  { %5952 = vmatpush.msk.msrb.mxu2 %vm6895_vm0, %v2971_v23  ;;  %v6366_v23 = vmov 1  }
 0x2e3   :  { %5860 = vmatmul.msk.f32.gmra.mxu0 %vm10470_vm1, %v5854_v28  ;;  %5866 = vmatmul.msk.f32.gmra.mxu1 %vm10471_vm8, %v5854_v28  ;;  %vm10491_vm8 = vnez %v10490_v17 }
 0x2e4   :  { %5879 = vmatmul.msk.f32.gmra.mxu3 %vm10473_vm5, %v5855_v27  ;;  %5953 = vmatpush.msk.msrb.mxu2 %vm6895_vm0, %v2968_v35  ;;  %v1980_v10 = vpop.f32.mrf.mxu2  ;;  %vm10478_vm0 = vmmov %vm10470_vm1  ;;  %v6323_v35 = vld [vmem:[%s9954_s6 + $0x8] sm:$0xff] }
 0x2e5   :  { %v7652_v60 = vadd.f32 %v1980_v10, %v7557_v48  ;;  %vm10480_vm11 = vmmov %vm10478_vm0  ;;  %v5882_v48 = vld [vmem:[%s9951_s3 + $0xd0] sm:$0xff]  ;;  %6309 = vset.pattern.permute.xlu1 %v6366_v23  ;;  %6311 = vset.pattern.permute.xlu0 %v6366_v23 }
 0x2e6   :  { %vm10484_vm3 = vmmov %vm10478_vm0  ;;  %3146 = vperm.xlu0 %6311, %v6323_v35   ;;  %3156 = vperm.xlu1 %6309, %v36_v62   ;;  %v5910_v10 = vld [vmem:[%s9951_s3 + $0xf0] sm:$0xff] }
 0x2e7   :  { %v1843_v3 = vpop.f32.mrf.mxu3  ;;  %vm10486_vm15 = vmmov %vm10478_vm0  ;;  %6310 = vset.pattern.permute.xlu2 %v6366_v23 }
 0x2e8   :  { %v1844_v12 = vadd.f32 %v1843_v3, %v7562_v31  ;;  %v7658_v45 = vpop.f32.mrf.mxu0  ;;  %v7660_v30 = vpop.f32.mrf.mxu1  ;;  %vm10487_vm9 = vmmov %vm10478_vm0 }
 0x2e9   :  { %10474 = vst [vmem:[#allocation40_spill] sm:$0xff] %v7658_v45  ;;  %5899 = vmatmul.msk.f32.gmra.mxu2 %vm10476_vm2, %v5881_v53  ;;  %vm10489_vm1 = vmmov %vm10478_vm0 }
 0x2ea   :  { %10475 = vst [vmem:[#allocation41_spill] sm:$0xff] %v7660_v30  ;;  %vm10495_vm2 = vmmov %vm10472_vm4 }
 0x2eb   :  { %5861 = vmatmul.msk.f32.gmra.mxu0 %vm10477_vm6, %v5855_v27  ;;  %5867 = vmatmul.msk.f32.gmra.mxu1 %vm10478_vm0, %v5855_v27  ;;  %v2967_v49 = vsel %vm10495_vm2, %v2953_v15, %v7596_v11  ;;  %vm10496_vm6 = vmmov %vm10478_vm0  ;;  %v5908_v27 = vld [vmem:[%s9951_s3 + $0xe0] sm:$0xff] }
 0x2ec   :  { %5904 = vmatmul.msk.f32.vlgmr.msrb.gmra.mxu3 %vm10480_vm11, %v5880_v52  ;;  %v1983_v55 = vpop.f32.mrf.mxu2  ;;  %vm10497_vm7 = vmmov %vm10478_vm0 }
 0x2ed   :  { %5958 = vmatpush.msk.msrb.mxu3 %vm10482_vm14, %v2983_v61  ;;  %v7670_v9 = vadd.f32 %v1983_v55, %v7576_v2  ;;  %v2970_v2 = vsel %vm10488_vm13, %v2961_v8, %v2963_v47  ;;  %vm10498_vm11 = vmmov %vm10478_vm0  ;;  %v6324_v61 = vld [vmem:[%s9954_s6] sm:$0xff]  ;;  %v5911_v55 = vld [vmem:[%s9951_s3 + $0xf8] sm:$0xff] }
 0x2ee   :  { %vm10503_vm10 = vmmov %vm10478_vm0  ;;  %3142 = vperm.xlu1 %6309, %v6324_v61  }
 0x2ef   :  { %5959 = vmatpush.msk.msrb.mxu3 %vm10482_vm14, %v2982_v44  ;;  %v2009_v31 = vpop.f32.mrf.mxu3  ;;  %vm10502_vm14 = vmmov %vm10478_vm0 }
 0x2f0   :  { %v7679_v43 = vadd.f32 %v2009_v31, %v7585_v37  ;;  %v7681_v1 = vpop.f32.mrf.mxu0  ;;  %v7683_v63 = vpop.f32.mrf.mxu1  ;;  %v10492_v37 = vld [vmem:[#allocation33_spill] sm:$0xff]  ;;  %vm10505_vm12 = vmmov %vm10478_vm0  ;;  %v5936_v31 = vld [vmem:[%s9951_s3 + $0x100] sm:$0xff] }
 0x2f1   :  { %5900 = vmatmul.msk.f32.gmra.mxu2 %vm10484_vm3, %v5882_v48  ;;  %vm10493_vm5 = vnez %v10492_v37  ;;  %vm10504_vm3 = vmmov %vm10478_vm0 }
 0x2f2   :  { %vm10511_vm13 = vmmov %vm10478_vm0 }
 0x2f3   :  { %5886 = vmatmul.msk.f32.vlgmr.msrb.gmra.mxu0 %vm10486_vm15, %v5880_v52  ;;  %5892 = vmatmul.msk.f32.vlgmr.msrb.gmra.mxu1 %vm10487_vm9, %v5880_v52  ;;  %vm10509_vm15 = vmmov %vm10478_vm0 }
 0x2f4   :  { %5905 = vmatmul.msk.f32.gmra.mxu3 %vm10489_vm1, %v5881_v53  ;;  %5940 = vmatpush.msk.msrb.mxu0 %vm10491_vm8, %v2969_v13  ;;  %v1986_v28 = vpop.f32.mrf.mxu2  ;;  %vm10510_vm9 = vmmov %vm10478_vm0 }
 0x2f5   :  { %5946 = vmatpush.msk.msrb.mxu1 %vm10493_vm5, %v2970_v2  ;;  %v7697_v41 = vadd.f32 %v1986_v28, %v7604_v22  ;;  %vm10512_vm1 = vmmov %vm10478_vm0  ;;  %v5937_v28 = vld [vmem:[%s9951_s3 + $0x108] sm:$0xff] }
 0x2f6   :  { %5941 = vmatpush.msk.msrb.mxu0 %vm10491_vm8, %v2966_v19  ;;  %vm10513_vm8 = vmmov %vm10478_vm0 }
 0x2f7   :  { %10494 = vst [vmem:[#allocation42_spill] sm:$0xff] %v7697_v41  ;;  %5947 = vmatpush.msk.msrb.mxu1 %vm10493_vm5, %v2967_v49  ;;  %v2012_v29 = vpop.f32.mrf.mxu3  ;;  %vm10514_vm4 = vmmov %vm10478_vm0 }
 0x2f8   :  { %v7709_v25 = vadd.f32 %v2012_v29, %v7617_v32  ;;  %v7711_v21 = vpop.f32.mrf.mxu0  ;;  %v7713_v22 = vpop.f32.mrf.mxu1  ;;  %vm10515_vm5 = vmmov %vm10478_vm0  ;;  %v5938_v29 = vld [vmem:[%s9951_s3 + $0x110] sm:$0xff] }
 0x2f9   :  { %5901 = vmatmul.msk.f32.gmra.mxu2 %vm10496_vm6, %v5883_v57  ;;  %vm10516_vm2 = vmmov %vm10478_vm0 }
 0x2fa   :  { %vm10518_vm6 = vmmov %vm10478_vm0 }
 0x2fb   :  { %5887 = vmatmul.msk.f32.gmra.mxu0 %vm10478_vm0, %v5881_v53  ;;  %5893 = vmatmul.msk.f32.gmra.mxu1 %vm10497_vm7, %v5881_v53  ;;  %vm10519_vm7 = vmmov %vm10478_vm0 }
 0x2fc   :  { %5906 = vmatmul.msk.f32.gmra.mxu3 %vm10498_vm11, %v5882_v48  ;;  %v1989_v11 = vpop.f32.mrf.mxu2  ;;  %vm10520_vm11 = vmmov %vm10478_vm0 }
 0x2fd   :  { %v7720_v39 = vadd.f32 %v1989_v11, %v7628_v6  ;;  %v5909_v6 = vld [vmem:[%s9951_s3 + $0xe8] sm:$0xff] }
 0x2ff   :  { %10499 = vst [vmem:[#allocation8_spill] sm:$0xff] %v7720_v39  ;;  %v2015_v14 = vpop.f32.mrf.mxu3 }
 0x300   :  { %v7726_v33 = vadd.f32 %v2015_v14, %v7634_v7  ;;  %v7728_v32 = vpop.f32.mrf.mxu0  ;;  %v7730_v34 = vpop.f32.mrf.mxu1 }
 0x301   :  { %10501 = vst [vmem:[#allocation11_spill] sm:$0xff] %v7728_v32  ;;  %5926 = vmatmul.msk.f32.vlgmr.msra.gmra.mxu2 %vm10502_vm14, %v5908_v27  ;;  %vm10524_vm14 = vmmov %vm10478_vm0 }
 0x302   :  { %10500 = vst [vmem:[#allocation9_spill] sm:$0xff] %v7726_v33 }
 0x303   :  { %5888 = vmatmul.msk.f32.gmra.mxu0 %vm10503_vm10, %v5882_v48  ;;  %5894 = vmatmul.msk.f32.gmra.mxu1 %vm10504_vm3, %v5882_v48  ;;  %vm10525_vm10 = vmmov %vm10478_vm0 }
 0x304   :  { %5907 = vmatmul.msk.f32.gmra.mxu3 %vm10505_vm12, %v5883_v57  ;;  %v7736_v59 = vpop.f32.mrf.mxu2  ;;  %vm10526_vm3 = vmmov %vm10478_vm0 }
 0x305   :  { %vm10527_vm12 = vmmov %vm10478_vm0 }
 0x307   :  { %v2018_v47 = vpop.f32.mrf.mxu3 }
 0x308   :  { %v7741_v52 = vadd.f32 %v2018_v47, %v1844_v12  ;;  %v7743_v54 = vpop.f32.mrf.mxu0  ;;  %v7745_v7 = vpop.f32.mrf.mxu1  ;;  %v5939_v47 = vld [vmem:[%s9951_s3 + $0x118] sm:$0xff]  ;;  %s6367_s3 = smov 32  }
 0x309   :  { %10507 = vst [vmem:[#allocation5_spill] sm:$0xff] %v7743_v54  ;;  %5927 = vmatmul.msk.f32.gmra.mxu2 %vm10509_vm15, %v5909_v6  ;;  %vm10531_vm15 = vmmov %vm10478_vm0 }
 0x30a   :  { %10506 = vst [vmem:[#allocation6_spill] sm:$0xff] %v7741_v52 }
 0x30b   :  { %10508 = vst [vmem:[#allocation13_spill] sm:$0xff] %v7745_v7  ;;  %5889 = vmatmul.msk.f32.gmra.mxu0 %vm10510_vm9, %v5883_v57  ;;  %5895 = vmatmul.msk.f32.gmra.mxu1 %vm10511_vm13, %v5883_v57  ;;  %vm10532_vm9 = vmmov %vm10478_vm0 }
 0x30c   :  { %5932 = vmatmul.msk.f32.vlgmr.msra.gmra.mxu3 %vm10512_vm1, %v5908_v27  ;;  %v7751_v38 = vpop.f32.mrf.mxu2  ;;  %vm10533_vm13 = vmmov %vm10478_vm0 }
 0x30d   :  { %vm10534_vm1 = vmmov %vm10478_vm0 }
 0x30f   :  { %v7762_v5 = vpop.f32.mrf.mxu3 }
 0x310   :  { %v7764_v53 = vpop.f32.mrf.mxu0  ;;  %v7766_v3 = vpop.f32.mrf.mxu1 }
 0x311   :  { %5928 = vmatmul.msk.f32.gmra.mxu2 %vm10513_vm8, %v5910_v10  ;;  %vm10536_vm8 = vmmov %vm10478_vm0 }
 0x313   :  { %5914 = vmatmul.msk.f32.vlgmr.msra.gmra.mxu0 %vm10514_vm4, %v5908_v27  ;;  %5920 = vmatmul.msk.f32.vlgmr.msra.gmra.mxu1 %vm10515_vm5, %v5908_v27  ;;  %vm10537_vm4 = vmmov %vm10478_vm0 }
 0x314   :  { %5933 = vmatmul.msk.f32.gmra.mxu3 %vm10516_vm2, %v5909_v6  ;;  %v7772_v12 = vpop.f32.mrf.mxu2  ;;  %vm10538_vm5 = vmmov %vm10478_vm0 }
 0x315   :  { %10517 = vst [vmem:[#allocation7_spill] sm:$0xff] %v7772_v12  ;;  %vm10539_vm2 = vmmov %vm10478_vm0 }
 0x317   :  { %v7780_v18 = vpop.f32.mrf.mxu3 }
 0x318   :  { %v7782_v44 = vpop.f32.mrf.mxu0  ;;  %v7784_v48 = vpop.f32.mrf.mxu1 }
 0x319   :  { %5929 = vmatmul.msk.f32.gmra.mxu2 %vm10518_vm6, %v5911_v55  ;;  %vm10541_vm6 = vmmov %vm10478_vm0 }
 0x31b   :  { %5915 = vmatmul.msk.f32.gmra.mxu0 %vm10478_vm0, %v5909_v6  ;;  %5921 = vmatmul.msk.f32.gmra.mxu1 %vm10519_vm7, %v5909_v6  ;;  %vm10542_vm7 = vmmov %vm10478_vm0 }
 0x31c   :  { %5934 = vmatmul.msk.f32.gmra.mxu3 %vm10520_vm11, %v5910_v10  ;;  %v7790_v8 = vpop.f32.mrf.mxu2  ;;  %vm10543_vm11 = vmmov %vm10478_vm0 }
 0x31d   :  { %10521 = vst [vmem:[#allocation10_spill] sm:$0xff] %v7790_v8 }
 0x31f   :  { %v7795_v15 = vpop.f32.mrf.mxu3 }
 0x320   :  { %10522 = vst [vmem:[#allocation15_spill] sm:$0xff] %v7795_v15  ;;  %v7797_v13 = vpop.f32.mrf.mxu0  ;;  %v7799_v2 = vpop.f32.mrf.mxu1 }
 0x321   :  { %10523 = vst [vmem:[#allocation14_spill] sm:$0xff] %v7797_v13  ;;  %5954 = vmatmul.msk.f32.vlgmr.msrb.gmra.mxu2 %vm10524_vm14, %v5936_v31  ;;  %vm10547_vm14 = vmmov %vm10478_vm0 }
 0x323   :  { %5916 = vmatmul.msk.f32.gmra.mxu0 %vm10525_vm10, %v5910_v10  ;;  %5922 = vmatmul.msk.f32.gmra.mxu1 %vm10526_vm3, %v5910_v10  ;;  %v35_v10 = vld [vmem:[%s9954_s6 + $0x10] sm:$0xff]  ;;  %vm10548_vm10 = vmmov %vm10478_vm0 }
 0x324   :  { %5935 = vmatmul.msk.f32.gmra.mxu3 %vm10527_vm12, %v5911_v55  ;;  %v7805_v17 = vpop.f32.mrf.mxu2  ;;  %3151 = vperm.xlu2 %6310, %v35_v10   ;;  %vm10549_vm3 = vmmov %vm10478_vm0 }
 0x325   :  { %vm10554_vm12 = vmmov %vm10478_vm0 }
 0x327   :  { %v7810_v19 = vpop.f32.mrf.mxu3 }
 0x328   :  { %10528 = vst [vmem:[#allocation12_spill] sm:$0xff] %v7810_v19  ;;  %v7812_v37 = vpop.f32.mrf.mxu0  ;;  %v7814_v49 = vpop.f32.mrf.mxu1 }
 0x329   :  { %10529 = vst [vmem:[#allocation16_spill] sm:$0xff] %v7812_v37  ;;  %5955 = vmatmul.msk.f32.gmra.mxu2 %vm10531_vm15, %v5937_v28  ;;  %vm10555_vm15 = vmmov %vm10478_vm0 }
 0x32a   :  { %10530 = vst [vmem:[#allocation18_spill] sm:$0xff] %v7814_v49 }
 0x32b   :  { %5917 = vmatmul.msk.f32.gmra.mxu0 %vm10532_vm9, %v5911_v55  ;;  %5923 = vmatmul.msk.f32.gmra.mxu1 %vm10533_vm13, %v5911_v55 }
 0x32c   :  { %5960 = vmatmul.msk.f32.vlgmr.msrb.gmra.mxu3 %vm10534_vm1, %v5936_v31  ;;  %v7820_v57 = vpop.f32.mrf.mxu2  ;;  %vm3344_vm1 = vcmask 261120  }
 0x32d   :  { %10535 = vst [vmem:[#allocation17_spill] sm:$0xff] %v7820_v57 }
 0x32f   :  { %v7825_v11 = vpop.f32.mrf.mxu3 }
 0x330   :  { %v7827_v27 = vpop.f32.mrf.mxu0  ;;  %v7829_v14 = vpop.f32.mrf.mxu1 }
 0x331   :  { %5956 = vmatmul.msk.f32.gmra.mxu2 %vm10536_vm8, %v5938_v29 }
 0x333   :  { %5942 = vmatmul.msk.f32.vlgmr.msrb.gmra.mxu0 %vm10537_vm4, %v5936_v31  ;;  %5948 = vmatmul.msk.f32.vlgmr.msrb.gmra.mxu1 %vm10538_vm5, %v5936_v31 }
 0x334   :  { %5961 = vmatmul.msk.f32.gmra.mxu3 %vm10539_vm2, %v5937_v28  ;;  %v7835_v6 = vpop.f32.mrf.mxu2 }
 0x335   :  { %10540 = vst [vmem:[#allocation20_spill] sm:$0xff] %v7835_v6 }
 0x337   :  { %v7840_v23 = vpop.f32.mrf.mxu3 }
 0x338   :  { %v7842_v62 = vpop.f32.mrf.mxu0  ;;  %v7844_v35 = vpop.f32.mrf.mxu1 }
 0x339   :  { %5957 = vmatmul.msk.f32.gmra.mxu2 %vm10541_vm6, %v5939_v47 }
 0x33b   :  { %5943 = vmatmul.msk.f32.gmra.mxu0 %vm10478_vm0, %v5937_v28  ;;  %5949 = vmatmul.msk.f32.gmra.mxu1 %vm10542_vm7, %v5937_v28  ;;  %vm3243_vm7 = vcmask 277504  }
 0x33c   :  { %5962 = vmatmul.msk.f32.gmra.mxu3 %vm10543_vm11, %v5938_v29  ;;  %v7853_v61 = vpop.f32.mrf.mxu2 }
 0x33d   :  { %10544 = vst [vmem:[#allocation19_spill] sm:$0xff] %v7853_v61 }
 0x33f   :  { %v7855_v55 = vpop.f32.mrf.mxu3 }
 0x340   :  { %10545 = vst [vmem:[#allocation22_spill] sm:$0xff] %v7855_v55  ;;  %v7857_v31 = vpop.f32.mrf.mxu0  ;;  %v7859_v8 = vpop.f32.mrf.mxu1 }
 0x341   :  { %10546 = vst [vmem:[#allocation23_spill] sm:$0xff] %v7857_v31 }
 0x343   :  { %5944 = vmatmul.msk.f32.gmra.mxu0 %vm10547_vm14, %v5938_v29  ;;  %5950 = vmatmul.msk.f32.gmra.mxu1 %vm10548_vm10, %v5938_v29 }
 0x344   :  { %5963 = vmatmul.msk.f32.gmra.mxu3 %vm10549_vm3, %v5939_v47  ;;  %v7864_v10 = vpop.f32.mrf.mxu2 }
 0x345   :  { %10550 = vst [vmem:[#allocation24_spill] sm:$0xff] %v7864_v10 }
 0x347   :  { %v7866_v39 = vpop.f32.mrf.mxu3 }
 0x348   :  { %10551 = vst [vmem:[#allocation21_spill] sm:$0xff] %v7866_v39  ;;  %v7868_v28 = vpop.f32.mrf.mxu0  ;;  %v7870_v19 = vpop.f32.mrf.mxu1 }
 0x349   :  { %10552 = vst [vmem:[#allocation26_spill] sm:$0xff] %v7868_v28 }
 0x34a   :  { %10553 = vst [vmem:[#allocation28_spill] sm:$0xff] %v7870_v19 }
 0x34b   :  { %5945 = vmatmul.msk.f32.gmra.mxu0 %vm10554_vm12, %v5939_v47  ;;  %5951 = vmatmul.msk.f32.gmra.mxu1 %vm10555_vm15, %v5939_v47  ;;  %vm3699_vm15 = vcmask 244736  }
 0x34c   :  { %v7874_v61 = vpop.f32.mrf.mxu2 }
 0x34d   :  { %10556 = vst [vmem:[#allocation27_spill] sm:$0xff] %v7874_v61 }
 0x34f   :  { %v7876_v52 = vpop.f32.mrf.mxu3 }
 0x350   :  { %v2453_v6 = vpop.f32.mrf.mxu0  ;;  %v2482_v29 = vpop.f32.mrf.mxu1 }
 0x354   :  { %v7878_v12 = vpop.f32.mrf.mxu2 }
 0x355   :  { %10557 = vst [vmem:[#allocation25_spill] sm:$0xff] %v7878_v12 }
 0x357   :  { %v7880_v41 = vpop.f32.mrf.mxu3 }
 0x358   :  { %v7882_v49 = vpop.f32.mrf.mxu0  ;;  %v7884_v39 = vpop.f32.mrf.mxu1 }
 0x359   :  { %v7948_v57 = vpop.permute.xlu1 %3156 }
 0x35c   :  { %v7886_v7 = vpop.f32.mrf.mxu2 }
 0x35d   :  { %10558 = vst [vmem:[#allocation30_spill] sm:$0xff] %v7886_v7 }
 0x35f   :  { %v7888_v19 = vpop.f32.mrf.mxu3 }
 0x360   :  { %10559 = vst [vmem:[#allocation32_spill] sm:$0xff] %v7888_v19  ;;  %v7890_v30 = vpop.f32.mrf.mxu0  ;;  %v7892_v47 = vpop.f32.mrf.mxu1 }
 0x361   :  { %10560 = vst [vmem:[#allocation31_spill] sm:$0xff] %v7890_v30 }
 0x362   :  { %10561 = vst [vmem:[#allocation29_spill] sm:$0xff] %v7892_v47 }
 0x364   :  { %v7900_v12 = vpop.f32.mrf.mxu2 }
 0x365   :  { %10565 = vst [vmem:[#allocation33_spill] sm:$0xff] %v7900_v12 }
 0x367   :  { %v7894_v56 = vpop.f32.mrf.mxu3 }
 0x368   :  { %10562 = vst [vmem:[#allocation34_spill] sm:$0xff] %v7894_v56  ;;  %v7896_v55 = vpop.f32.mrf.mxu0  ;;  %v7898_v15 = vpop.f32.mrf.mxu1 }
 0x369   :  { %10563 = vst [vmem:[#allocation36_spill] sm:$0xff] %v7896_v55 }
 0x36a   :  { %10564 = vst [vmem:[#allocation35_spill] sm:$0xff] %v7898_v15 }
 0x36c   :  { %v7902_v37 = vpop.f32.mrf.mxu2 }
 0x36d   :  { %10566 = vst [vmem:[#allocation44_spill] sm:$0xff] %v7902_v37 }
 0x36f   :  { %v2731_v33 = vpop.f32.mrf.mxu3 }
 0x370   :  { %v2644_v28 = vpop.f32.mrf.mxu0  ;;  %v2673_v31 = vpop.f32.mrf.mxu1 }
 0x374   :  { %v7910_v13 = vpop.f32.mrf.mxu2 }
 0x375   :  { %10567 = vst [vmem:[#allocation45_spill] sm:$0xff] %v7910_v13 }
 0x377   :  { %v7904_v7 = vpop.f32.mrf.mxu3 }
 0x378   :  { %v7906_v19 = vpop.f32.mrf.mxu0  ;;  %v7908_v30 = vpop.f32.mrf.mxu1 }
 0x37c   :  { %v7918_v54 = vpop.f32.mrf.mxu2 }
 0x37d   :  { %10571 = vst [vmem:[#allocation49_spill] sm:$0xff] %v7918_v54 }
 0x37f   :  { %v7912_v56 = vpop.f32.mrf.mxu3 }
 0x380   :  { %10568 = vst [vmem:[#allocation46_spill] sm:$0xff] %v7912_v56  ;;  %v7914_v55 = vpop.f32.mrf.mxu0  ;;  %v7916_v15 = vpop.f32.mrf.mxu1 }
 0x381   :  { %10569 = vst [vmem:[#allocation47_spill] sm:$0xff] %v7914_v55 }
 0x382   :  { %10570 = vst [vmem:[#allocation48_spill] sm:$0xff] %v7916_v15 }
 0x384   :  { %v7926_v47 = vpop.f32.mrf.mxu2 }
 0x385   :  { %10575 = vst [vmem:[#allocation53_spill] sm:$0xff] %v7926_v47 }
 0x387   :  { %v7920_v12 = vpop.f32.mrf.mxu3 }
 0x388   :  { %10572 = vst [vmem:[#allocation50_spill] sm:$0xff] %v7920_v12  ;;  %v7922_v32 = vpop.f32.mrf.mxu0  ;;  %v7924_v37 = vpop.f32.mrf.mxu1 }
 0x389   :  { %10573 = vst [vmem:[#allocation51_spill] sm:$0xff] %v7922_v32  ;;  %v1777_v32 = vadd.f32 %v7589_v58, %v7499_v50  ;;  %v1751_v58 = vadd.f32 %v7619_v36, %v7526_v42 }
 0x38a   :  { %10574 = vst [vmem:[#allocation52_spill] sm:$0xff] %v7924_v37  ;;  %v1748_v37 = vadd.f32 %v7587_v20, %v7497_v0 }
 0x38b   :  { %v2022_v40 = vadd.f32 %v7683_v63, %v1777_v32  ;;  %v2215_v32 = vadd.f32 %v7762_v5, %v7679_v43 }
 0x38c   :  { %v7930_v55 = vpop.f32.mrf.mxu2  ;;  %v2021_v47 = vadd.f32 %v7681_v1, %v1748_v37  ;;  %v1780_v1 = vadd.f32 %v7621_v16, %v7528_v24 }
 0x38d   :  { %10576 = vst [vmem:[#allocation54_spill] sm:$0xff] %v7930_v55 }
 0x38e   :  { %v2212_v55 = vadd.f32 %v7764_v53, %v2021_v47  ;;  %v2025_v53 = vadd.f32 %v7711_v21, %v1751_v58 }
 0x38f   :  { %v2922_v61 = vpop.f32.mrf.mxu3 }
 0x390   :  { %v2835_v45 = vpop.f32.mrf.mxu0  ;;  %v2864_v51 = vpop.f32.mrf.mxu1  ;;  %v2361_v50 = vadd.f32 %v7827_v27, %v2212_v55  ;;  %v2364_v27 = vadd.f32 %v7825_v11, %v2215_v32 }
 0x392   :  { %v2552_v63 = vadd.f32 %v2453_v6, %v2361_v50  ;;  %v2555_v16 = vadd.f32 %v7876_v52, %v2364_v27 }
 0x394   :  { %v7944_v4 = vpop.f32.mrf.mxu2  ;;  %v2743_v37 = vadd.f32 %v2644_v28, %v2552_v63  ;;  %v2746_v11 = vadd.f32 %v2731_v33, %v2555_v16  ;;  %v7974_v28 = vpop.permute.xlu1 %3142  ;;  %v10583_v16 = vld [vmem:[#allocation24_spill] sm:$0xff] }
 0x396   :  { %v2934_v36 = vadd.f32 %v2835_v45, %v2743_v37 }
 0x397   :  { %v7928_v13 = vpop.f32.mrf.mxu3 }
 0x398   :  { %v2838_v56 = vpop.f32.mrf.mxu0  ;;  %v2867_v10 = vpop.f32.mrf.mxu1 }
 0x39c   :  { %v7969_v24 = vpop.f32.mrf.mxu2 }
 0x39f   :  { %v7932_v15 = vpop.f32.mrf.mxu3 }
 0x3a0   :  { %10577 = vst [vmem:[#allocation55_spill] sm:$0xff] %v7932_v15  ;;  %v7934_v54 = vpop.f32.mrf.mxu0  ;;  %v7936_v12 = vpop.f32.mrf.mxu1  ;;  %v2213_v15 = vadd.f32 %v7766_v3, %v2022_v40  ;;  %v2026_v3 = vadd.f32 %v7713_v22, %v1780_v1 }
 0x3a1   :  { %10578 = vst [vmem:[#allocation56_spill] sm:$0xff] %v7934_v54 }
 0x3a2   :  { %10579 = vst [vmem:[#allocation57_spill] sm:$0xff] %v7936_v12  ;;  %v2362_v20 = vadd.f32 %v7829_v14, %v2213_v15  ;;  %v2216_v15 = vadd.f32 %v7782_v44, %v2025_v53  ;;  %v2217_v42 = vadd.f32 %v7784_v48, %v2026_v3  ;;  %v2219_v48 = vadd.f32 %v7780_v18, %v7709_v25 }
 0x3a3   :  { %v2218_v3 = vadd.f32 %v7751_v38, %v7670_v9  ;;  %v10584_v38 = vld [vmem:[#allocation29_spill] sm:$0xff] }
 0x3a4   :  { %v2553_v40 = vadd.f32 %v2482_v29, %v2362_v20  ;;  %v2365_v21 = vadd.f32 %v7842_v62, %v2216_v15  ;;  %v2366_v22 = vadd.f32 %v7844_v35, %v2217_v42  ;;  %v2937_v62 = vadd.f32 %v2922_v61, %v2746_v11  ;;  %v10580_v15 = vld [vmem:[#allocation17_spill] sm:$0xff]  ;;  %v10590_v11 = vld [vmem:[#allocation48_spill] sm:$0xff] }
 0x3a5   :  { %v10581_v42 = vld [vmem:[#allocation37_spill] sm:$0xff] }
 0x3a6   :  { %v2744_v47 = vadd.f32 %v2673_v31, %v2553_v40  ;;  %v2556_v44 = vadd.f32 %v7882_v49, %v2365_v21  ;;  %v2368_v49 = vadd.f32 %v7840_v23, %v2219_v48  ;;  %v3084_v23 = vpop.f32.mrf.mxu2  ;;  %v10592_v48 = vld [vmem:[#allocation44_spill] sm:$0xff] }
 0x3a7   :  { %v7950_v54 = vpop.f32.mrf.mxu3 }
 0x3a8   :  { %v7952_v12 = vpop.f32.mrf.mxu0  ;;  %v7954_v0 = vpop.f32.mrf.mxu1  ;;  %v2935_v14 = vadd.f32 %v2864_v51, %v2744_v47  ;;  %v2557_v51 = vadd.f32 %v7884_v39, %v2366_v22  ;;  %v2747_v35 = vadd.f32 %v7906_v19, %v2556_v44  ;;  %v1783_v39 = vadd.f32 %v7638_v46, %v7543_v26  ;;  %v10588_v22 = vld [vmem:[#allocation11_spill] sm:$0xff] }
 0x3aa   :  { %v2748_v29 = vadd.f32 %v7908_v30, %v2557_v51  ;;  %v2938_v58 = vadd.f32 %v2838_v56, %v2747_v35  ;;  %v2559_v30 = vadd.f32 %v7880_v41, %v2368_v49  ;;  %v2030_v19 = vadd.f32 %v7730_v34, %v1783_v39  ;;  %v3147_v56 = vpop.permute.xlu0 %3146  ;;  %v10593_v49 = vld [vmem:[#allocation14_spill] sm:$0xff]  ;;  %v10594_v39 = vld [vmem:[#allocation53_spill] sm:$0xff] }
 0x3ac   :  { %v2939_v1 = vadd.f32 %v2867_v10, %v2748_v29  ;;  %v2750_v26 = vadd.f32 %v7904_v7, %v2559_v30  ;;  %v2214_v10 = vadd.f32 %v7736_v59, %v7652_v60  ;;  %v2221_v40 = vadd.f32 %v7799_v2, %v2030_v19 }
 0x3ad   :  { %v2367_v60 = vadd.f32 %v10580_v15, %v2218_v3 }
 0x3ae   :  { %v2941_v34 = vadd.f32 %v7928_v13, %v2750_v26  ;;  %v2363_v37 = vadd.f32 %v7805_v17, %v2214_v10  ;;  %v2370_v7 = vadd.f32 %v7859_v8, %v2221_v40  ;;  %v10585_v8 = vld [vmem:[#allocation38_spill] sm:$0xff]  ;;  %v10586_v17 = vld [vmem:[#allocation40_spill] sm:$0xff]  ;;  %v10598_v26 = vld [vmem:[#allocation23_spill] sm:$0xff] }
 0x3af   :  { %v3113_v5 = vpop.f32.mrf.mxu3 }
 0x3b0   :  { %v3026_v6 = vpop.f32.mrf.mxu0  ;;  %v3055_v43 = vpop.f32.mrf.mxu1  ;;  %v3128_v20 = vadd.f32 %v3113_v5, %v2937_v62  ;;  %v2554_v9 = vadd.f32 %v10583_v16, %v2363_v37  ;;  %v2561_v13 = vadd.f32 %v10584_v38, %v2370_v7  ;;  %v10601_v7 = vld [vmem:[#allocation36_spill] sm:$0xff] }
 0x3b1   :  { %v3125_v55 = vadd.f32 %v3026_v6, %v2934_v36  ;;  %v3126_v31 = vadd.f32 %v3055_v43, %v2935_v14  ;;  %v10582_v36 = vld [vmem:[#allocation39_spill] sm:$0xff]  ;;  %v1757_v6 = vadd.f32 %v10586_v17, %v10585_v8  ;;  %v10604_v38 = vld [vmem:[#allocation56_spill] sm:$0xff]  ;;  %v10605_v17 = vld [vmem:[#allocation9_spill] sm:$0xff] }
 0x3b2   :  { %v3162_v46 = vadd.f32 %v7974_v28, %v3128_v20  ;;  %v1754_v14 = vadd.f32 %v10582_v36, %v10581_v42  ;;  %v10587_v43 = vld [vmem:[#allocation27_spill] sm:$0xff]  ;;  %v2752_v44 = vadd.f32 %v10590_v11, %v2561_v13 }
 0x3b3   :  { %v3159_v45 = vadd.f32 %v7974_v28, %v3125_v55  ;;  %v3160_v52 = vadd.f32 %v7974_v28, %v3126_v31  ;;  %v2558_v21 = vadd.f32 %v10587_v43, %v2367_v60  ;;  %v10589_v55 = vld [vmem:[#allocation33_spill] sm:$0xff]  ;;  %v3152_v60 = vpop.permute.xlu2 %3151 }
 0x3b4   :  { %v8012_v59 = vmax.f32 %v3162_v46, 0.0  ;;  %v2029_v5 = vadd.f32 %v10588_v22, %v1754_v14  ;;  %v2745_v31 = vadd.f32 %v10589_v55, %v2554_v9  ;;  %v10603_v14 = vld [vmem:[#allocation51_spill] sm:$0xff] }
 0x3b5   :  { %v7984_v50 = vmax.f32 %v3159_v45, 0.0  ;;  %v7986_v33 = vmax.f32 %v3160_v52, 0.0  ;;  %v10591_v45 = vld [vmem:[#allocation5_spill] sm:$0xff]  ;;  %v2749_v62 = vadd.f32 %v10592_v48, %v2558_v21 }
 0x3b6   :  { %v2033_v52 = vadd.f32 %v10591_v45, %v1757_v6  ;;  %v2220_v20 = vadd.f32 %v10593_v49, %v2029_v5  ;;  %v10606_v6 = vld [vmem:[#allocation15_spill] sm:$0xff] }
 0x3b7   :  { %3322 = vrot.lane.b32.xlu1 %v7986_v33, %s6367_s3  ;;  %3320 = vrot.lane.b32.xlu0 %v7984_v50, %s6367_s3  ;;  %v3116_v32 = vpop.f32.mrf.mxu3  ;;  %v2223_v43 = vadd.f32 %v10606_v6, %v10605_v17  ;;  %v10608_v45 = vld [vmem:[#allocation43_spill] sm:$0xff] }
 0x3b8   :  { %v3029_v25 = vpop.f32.mrf.mxu0  ;;  %v3058_v18 = vpop.f32.mrf.mxu1  ;;  %v3132_v2 = vadd.f32 %v3116_v32, %v2941_v34  ;;  %v2369_v46 = vadd.f32 %v10598_v26, %v2220_v20  ;;  %v10599_v32 = vld [vmem:[#allocation26_spill] sm:$0xff]  ;;  %v10600_v34 = vld [vmem:[#allocation31_spill] sm:$0xff] }
 0x3b9   :  { %v3129_v61 = vadd.f32 %v3029_v25, %v2938_v58  ;;  %v3130_v63 = vadd.f32 %v3058_v18, %v2939_v1  ;;  %v2936_v58 = vadd.f32 %v10594_v39, %v2745_v31  ;;  %v10595_v1 = vld [vmem:[#allocation57_spill] sm:$0xff]  ;;  %v3087_v25 = vpop.f32.mrf.mxu2  ;;  %v10596_v18 = vld [vmem:[#allocation16_spill] sm:$0xff]  ;;  %v10607_v31 = vld [vmem:[#allocation22_spill] sm:$0xff] }
 0x3ba   :  { %v3166_v35 = vadd.f32 %v3147_v56, %v3132_v2  ;;  %v2943_v30 = vadd.f32 %v10595_v1, %v2752_v44  ;;  %v2224_v19 = vadd.f32 %v10596_v18, %v2033_v52  ;;  %v2560_v37 = vadd.f32 %v10600_v34, %v2369_v46  ;;  %v10613_v39 = vld [vmem:[#allocation18_spill] sm:$0xff] }
 0x3bb   :  { %v3163_v53 = vadd.f32 %v3147_v56, %v3129_v61  ;;  %v3164_v41 = vadd.f32 %v3147_v56, %v3130_v63  ;;  %v10597_v61 = vld [vmem:[#allocation54_spill] sm:$0xff]  ;;  %v3127_v10 = vadd.f32 %v3084_v23, %v2936_v58  ;;  %v10602_v23 = vld [vmem:[#allocation47_spill] sm:$0xff]  ;;  %v2372_v11 = vadd.f32 %v10607_v31, %v2223_v43 }
 0x3bc   :  { %v2940_v63 = vadd.f32 %v10597_v61, %v2749_v62  ;;  %v8039_v3 = vmax.f32 %v3166_v35, 0.0  ;;  %v2751_v2 = vadd.f32 %v10602_v23, %v2560_v37  ;;  %v10620_v37 = vld [vmem:[#allocation25_spill] sm:$0xff] }
 0x3bd   :  { %v8007_v47 = vmax.f32 %v3163_v53, 0.0  ;;  %v8009_v27 = vmax.f32 %v3164_v41, 0.0  ;;  %v2373_v53 = vadd.f32 %v10599_v32, %v2224_v19  ;;  %v3161_v42 = vadd.f32 %v7974_v28, %v3127_v10  ;;  %v10616_v19 = vld [vmem:[#allocation55_spill] sm:$0xff]  ;;  %v10618_v10 = vld [vmem:[#allocation20_spill] sm:$0xff] }
 0x3be   :  { %v3131_v41 = vadd.f32 %v3087_v25, %v2940_v63  ;;  %v2942_v13 = vadd.f32 %v10604_v38, %v2751_v2  ;;  %v10615_v25 = vld [vmem:[#allocation7_spill] sm:$0xff]  ;;  %v10617_v63 = vld [vmem:[#allocation28_spill] sm:$0xff]  ;;  %v10622_v2 = vld [vmem:[#allocation45_spill] sm:$0xff] }
 0x3bf   :  { %3326 = vrot.lane.b32.xlu2 %v8007_v47, %s6367_s3  ;;  %3328 = vrot.lane.b32.xlu1 %v8009_v27, %s6367_s3  ;;  %v2564_v15 = vadd.f32 %v10601_v7, %v2373_v53  ;;  %v8056_v22 = vmax.f32 %v3161_v42, 0.0  ;;  %v3119_v1 = vpop.f32.mrf.mxu3 }
 0x3c0   :  { %3308 = vrot.lane.b32.xlu0 %v8012_v59, %s6367_s3  ;;  %v3032_v51 = vpop.f32.mrf.mxu0  ;;  %v3061_v29 = vpop.f32.mrf.mxu1  ;;  %v3165_v9 = vadd.f32 %v3147_v56, %v3131_v41  ;;  %v10609_v56 = vld [vmem:[#allocation41_spill] sm:$0xff]  ;;  %v10619_v41 = vld [vmem:[#allocation35_spill] sm:$0xff] }
 0x3c1   :  { %v3134_v40 = vadd.f32 %v3061_v29, %v2943_v30  ;;  %v2755_v16 = vadd.f32 %v10603_v14, %v2564_v15  ;;  %v3133_v5 = vadd.f32 %v3032_v51, %v2942_v13  ;;  %v1786_v52 = vadd.f32 %v10609_v56, %v10608_v45  ;;  %v10611_v51 = vld [vmem:[#allocation13_spill] sm:$0xff]  ;;  %v10612_v29 = vld [vmem:[#allocation46_spill] sm:$0xff]  ;;  %v10621_v15 = vld [vmem:[#allocation52_spill] sm:$0xff] }
 0x3c2   :  { %v8061_v28 = vmax.f32 %v3165_v9, 0.0  ;;  %v10614_v30 = vld [vmem:[#allocation42_spill] sm:$0xff]  ;;  %v3090_v9 = vpop.f32.mrf.mxu2 }
 0x3c3   :  { %v3168_v36 = vadd.f32 %v3152_v60, %v3134_v40  ;;  %v2946_v21 = vadd.f32 %v7952_v12, %v2755_v16  ;;  %v10610_v12 = vld [vmem:[#allocation32_spill] sm:$0xff]  ;;  %v2034_v62 = vadd.f32 %v10611_v51, %v1786_v52  ;;  %v3167_v35 = vadd.f32 %v3152_v60, %v3133_v5  ;;  %v10626_v45 = vld [vmem:[#allocation34_spill] sm:$0xff] }
 0x3c4   :  { %v2563_v48 = vadd.f32 %v10610_v12, %v2372_v11  ;;  %v2222_v18 = vadd.f32 %v10615_v25, %v10614_v30  ;;  %v10629_v51 = vld [vmem:[#allocation10_spill] sm:$0xff] }
 0x3c5   :  { %v8058_v55 = vmax.f32 %v3168_v36, 0.0  ;;  %v2225_v58 = vadd.f32 %v10613_v39, %v2034_v62  ;;  %v8080_v46 = vmax.f32 %v3167_v35, 0.0  ;;  %v10631_v39 = vld [vmem:[#allocation30_spill] sm:$0xff] }
 0x3c6   :  { %v2754_v49 = vadd.f32 %v10612_v29, %v2563_v48  ;;  %v2371_v40 = vadd.f32 %v10618_v10, %v2222_v18  ;;  %v10628_v48 = vld [vmem:[#allocation8_spill] sm:$0xff]  ;;  %v10630_v29 = vld [vmem:[#allocation19_spill] sm:$0xff] }
 0x3c7   :  { %3227 = vrot.lane.b32.xlu2 %v8009_v27, %s6368_s8  ;;  %3195 = vrot.lane.b32.xlu1 %v8012_v59, %s6368_s8  ;;  %v2374_v26 = vadd.f32 %v10617_v63, %v2225_v58  ;;  %v3122_v12 = vpop.f32.mrf.mxu3  ;;  %v2226_v62 = vadd.f32 %v10629_v51, %v10628_v48 }
 0x3c8   :  { %3310 = vrot.lane.b32.xlu0 %v8039_v3, %s6367_s3  ;;  %v3035_v8 = vpop.f32.mrf.mxu0  ;;  %v2945_v61 = vadd.f32 %v10616_v19, %v2754_v49  ;;  %v2562_v7 = vadd.f32 %v10620_v37, %v2371_v40  ;;  %v3064_v14 = vpop.f32.mrf.mxu1 }
 0x3c9   :  { %v3137_v44 = vadd.f32 %v3035_v8, %v2946_v21  ;;  %v2565_v34 = vadd.f32 %v10619_v41, %v2374_v26  ;;  %v10624_v21 = vld [vmem:[#allocation12_spill] sm:$0xff]  ;;  %v2375_v49 = vadd.f32 %v10630_v29, %v2226_v62 }
 0x3ca   :  { %v3136_v32 = vadd.f32 %v3119_v1, %v2945_v61  ;;  %v2753_v42 = vadd.f32 %v10622_v2, %v2562_v7  ;;  %v10632_v1 = vld [vmem:[#allocation49_spill] sm:$0xff]  ;;  %v3093_v18 = vpop.f32.mrf.mxu2 }
 0x3cb   :  { %v3171_v20 = vadd.f32 %v7948_v57, %v3137_v44  ;;  %v2756_v23 = vadd.f32 %v10621_v15, %v2565_v34  ;;  %v2566_v58 = vadd.f32 %v10631_v39, %v2375_v49 }
 0x3cc   :  { %v3170_v36 = vadd.f32 %v3152_v60, %v3136_v32  ;;  %v2944_v38 = vadd.f32 %v7944_v4, %v2753_v42  ;;  %v10625_v4 = vld [vmem:[#allocation21_spill] sm:$0xff] }
 0x3cd   :  { %v8083_v53 = vmax.f32 %v3171_v20, 0.0  ;;  %v2947_v16 = vadd.f32 %v7954_v0, %v2756_v23  ;;  %v10623_v0 = vld [vmem:[#allocation6_spill] sm:$0xff]  ;;  %v2757_v30 = vadd.f32 %v10632_v1, %v2566_v58  ;;  %v5964_v1 = vld [vmem:[%s9952_s4 + $0x20] sm:$0xff] }
 0x3ce   :  { %v3135_v8 = vadd.f32 %v3090_v9, %v2944_v38  ;;  %v8097_v17 = vmax.f32 %v3170_v36, 0.0  ;;  %v2227_v5 = vadd.f32 %v10624_v21, %v10623_v0  ;;  %v10633_v38 = vmov 0  }
 0x3cf   :  { %3324 = vrot.lane.b32.xlu2 %v8056_v22, %s6367_s3  ;;  %3334 = vrot.lane.b32.xlu1 %v8058_v55, %s6367_s3  ;;  %v3138_v13 = vadd.f32 %v3064_v14, %v2947_v16  ;;  %v8229_v14 = vld [vmem:[%s9949_s1] ss:$4 sm:$0xf] }
 0x3d0   :  { %3229 = vrot.lane.b32.xlu0 %v8061_v28, %s6368_s8  ;;  %v3169_v43 = vadd.f32 %v3152_v60, %v3135_v8  ;;  %v2376_v31 = vadd.f32 %v10625_v4, %v2227_v5  ;;  %v10627_v60 = vld [vmem:[#allocation50_spill] sm:$0xff]  ;;  %vm3276_vm9 = vcmp.ge.s32.totalorder %v8229_v14, 2 }
 0x3d1   :  { %v3172_v6 = vadd.f32 %v7948_v57, %v3138_v13  ;;  %v3377_v13 = vsel %vm3276_vm9, 1, %v10633_v38 }
 0x3d2   :  { %v8111_v44 = vmax.f32 %v3169_v43, 0.0  ;;  %v2567_v56 = vadd.f32 %v10626_v45, %v2376_v31  ;;  %v3379_v45 = vperm.slane %v3377_v13, 1 }
 0x3d3   :  { %v8109_v11 = vmax.f32 %v3172_v6, 0.0  ;;  %v3378_v6 = vperm.slane %v3377_v13, 0 }
 0x3d4   :  { %v2758_v52 = vadd.f32 %v10627_v60, %v2567_v56  ;;  %v3380_v56 = vperm.slane %v3377_v13, 2  ;;  %v3381_v60 = vperm.slane %v3377_v13, 3  ;;  %vm8270_vm8 = vcmp.eq.s32.totalorder %v3379_v45, 1 }
 0x3d5   :  { %vm8247_vm13 = vcmp.eq.s32.totalorder %v3378_v6, 1 }
 0x3d6   :  { %v2949_v35 = vadd.f32 %v7950_v54, %v2758_v52  ;;  %v2948_v54 = vadd.f32 %v7969_v24, %v2757_v30  ;;  %vm8274_vm4 = vcmp.eq.s32.totalorder %v3380_v56, 1  ;;  %vm8281_vm5 = vcmp.eq.s32.totalorder %v3381_v60, 1  ;;  %v8302_v30 = vld [vmem:[%s9949_s1 + $0x1] ss:$4 sm:$0xf] }
 0x3d7   :  { %3233 = vrot.lane.b32.xlu2 %v8058_v55, %s6368_s8  ;;  %3332 = vrot.lane.b32.xlu1 %v8080_v46, %s6367_s3  ;;  %vm3277_vm2 = vcmp.ge.s32.totalorder %v8302_v30, 2  ;;  %vm3732_vm11 = vcmp.lt.s32.totalorder %v8302_v30, 14 }
 0x3d8   :  { %3338 = vrot.lane.b32.xlu0 %v8083_v53, %s6367_s3  ;;  %v3140_v20 = vadd.f32 %v3122_v12, %v2949_v35  ;;  %v3139_v19 = vadd.f32 %v3093_v18, %v2948_v54  ;;  %vm3278_vm6 = vmand %vm3276_vm9, %vm3277_vm2 }
 0x3d9   :  { %vm3733_vm3 = vmand %vm3276_vm9, %vm3732_vm11 }
 0x3da   :  { %v3174_v25 = vadd.f32 %v7948_v57, %v3140_v20  ;;  %v3173_v63 = vadd.f32 %v7948_v57, %v3139_v19 }
 0x3dc   :  { %v8135_v61 = vmax.f32 %v3174_v25, 0.0  ;;  %v8144_v26 = vmax.f32 %v3173_v63, 0.0 }
 0x3df   :  { %3330 = vrot.lane.b32.xlu2 %v8061_v28, %s6367_s3  ;;  %3197 = vrot.lane.b32.xlu1 %v8039_v3, %s6368_s8 }
 0x3e0   :  { %3312 = vrot.lane.b32.xlu0 %v8097_v17, %s6367_s3 }
 0x3e7   :  { %3239 = vrot.lane.b32.xlu2 %v8109_v11, %s6368_s8  ;;  %3340 = vrot.lane.b32.xlu1 %v8109_v11, %s6367_s3 }
 0x3e8   :  { %3235 = vrot.lane.b32.xlu0 %v8111_v44, %s6368_s8 }
 0x3ef   :  { %3336 = vrot.lane.b32.xlu2 %v8111_v44, %s6367_s3  ;;  %3199 = vrot.lane.b32.xlu1 %v8097_v17, %s6368_s8 }
 0x3f0   :  { %3223 = vrot.lane.b32.xlu0 %v8056_v22, %s6368_s8 }
 0x3f7   :  { %3314 = vrot.lane.b32.xlu2 %v8135_v61, %s6367_s3  ;;  %3237 = vrot.lane.b32.xlu1 %v8083_v53, %s6368_s8 }
 0x3f8   :  { %3225 = vrot.lane.b32.xlu0 %v8007_v47, %s6368_s8 }
 0x3ff   :  { %3342 = vrot.lane.b32.xlu2 %v8144_v26, %s6367_s3  ;;  %3219 = vrot.lane.b32.xlu1 %v7984_v50, %s6368_s8  ;;  %s5589_s3 = sshll.u32 %s9955_s7, 4  ;;  %s5590_s3 = int_to_ptr.hbm [resolvable:$true] %s5589_s3 }
 0x400   :  { %3695 = vrot.lane.b32.xlu0 %v8109_v11, %s6369_s9 }
 0x407   :  { %3221 = vrot.lane.b32.xlu2 %v7986_v33, %s6368_s8  ;;  %3691 = vrot.lane.b32.xlu1 %v8111_v44, %s6369_s9 }
 0x408   :  { %3689 = vrot.lane.b32.xlu0 %v8058_v55, %s6369_s9 }
 0x40f   :  { %3231 = vrot.lane.b32.xlu2 %v8080_v46, %s6368_s8  ;;  %3201 = vrot.lane.b32.xlu1 %v8135_v61, %s6368_s8 }
 0x410   :  { %3241 = vrot.lane.b32.xlu0 %v8144_v26, %s6368_s8 }
 0x417   :  { %3667 = vrot.lane.b32.xlu2 %v8097_v17, %s6369_s9  ;;  %3685 = vrot.lane.b32.xlu1 %v8061_v28, %s6369_s9 }
 0x418   :  { %3683 = vrot.lane.b32.xlu0 %v8009_v27, %s6369_s9 }
 0x419   :  { %v8170_v57 = vpop.permute.xlu2 %3326 }
 0x41f   :  { %3665 = vrot.lane.b32.xlu2 %v8039_v3, %s6369_s9  ;;  %3679 = vrot.lane.b32.xlu1 %v8056_v22, %s6369_s9 }
 0x420   :  { %3677 = vrot.lane.b32.xlu0 %v7986_v33, %s6369_s9 }
 0x421   :  { %v8178_v24 = vpop.permute.xlu2 %3227 }
 0x427   :  { %3663 = vrot.lane.b32.xlu2 %v8012_v59, %s6369_s9  ;;  %3681 = vrot.lane.b32.xlu1 %v8007_v47, %s6369_s9 }
 0x428   :  { %3687 = vrot.lane.b32.xlu0 %v8080_v46, %s6369_s9 }
 0x429   :  { %v8186_v10 = vpop.permute.xlu2 %3324  ;;  %v8188_v40 = vpop.permute.xlu1 %3322 }
 0x42a   :  { %v8190_v32 = vpop.permute.xlu0 %3320 }
 0x42f   :  { %3693 = vrot.lane.b32.xlu2 %v8083_v53, %s6369_s9  ;;  %3697 = vrot.lane.b32.xlu1 %v8144_v26, %s6369_s9 }
 0x430   :  { %3912 = vrot.lane.b32.xlu0 %v8097_v17, %s6370_s24 }
 0x431   :  { %v8198_v41 = vpop.permute.xlu2 %3233  ;;  %v8200_v34 = vpop.permute.xlu1 %3328 }
 0x432   :  { %v8202_v37 = vpop.permute.xlu0 %3308 }
 0x433   :  { %v3373_v51 = vsel %vm3344_vm1, %v8202_v37, %v8190_v32 }
 0x437   :  { %3675 = vrot.lane.b32.xlu2 %v7984_v50, %s6369_s9  ;;  %3940 = vrot.lane.b32.xlu1 %v8109_v11, %s6370_s24 }
 0x438   :  { %3910 = vrot.lane.b32.xlu0 %v8039_v3, %s6370_s24 }
 0x439   :  { %v8210_v7 = vpop.permute.xlu2 %3330  ;;  %v8212_v15 = vpop.permute.xlu1 %3195 }
 0x43a   :  { %v8214_v23 = vpop.permute.xlu0 %3310  ;;  %v3349_v19 = vsel %vm3344_vm1, %v8200_v34, %v8210_v7 }
 0x43b   :  { %v3374_v52 = vsel %vm3344_vm1, %v8214_v23, %v8170_v57  ;;  %v3350_v63 = vsel %vm3344_vm1, %v8210_v7, %v8214_v23  ;;  %v3346_v7 = vsel %vm3344_vm1, %v8188_v40, %v8186_v10 }
 0x43f   :  { %3669 = vrot.lane.b32.xlu2 %v8135_v61, %s6369_s9  ;;  %3934 = vrot.lane.b32.xlu1 %v8058_v55, %s6370_s24  ;;  %s6373_s9 = smov 96  }
 0x440   :  { %3908 = vrot.lane.b32.xlu0 %v8012_v59, %s6370_s24 }
 0x441   :  { %v8222_v2 = vpop.permute.xlu2 %3239  ;;  %v3335_v42 = vpop.permute.xlu1 %3334 }
 0x442   :  { %v8224_v36 = vpop.permute.xlu0 %3229 }
 0x447   :  { %3936 = vrot.lane.b32.xlu2 %v8111_v44, %s6370_s24  ;;  %3928 = vrot.lane.b32.xlu1 %v8009_v27, %s6370_s24 }
 0x448   :  { %3938 = vrot.lane.b32.xlu0 %v8083_v53, %s6370_s24 }
 0x449   :  { %v3337_v16 = vpop.permute.xlu2 %3336  ;;  %v3333_v9 = vpop.permute.xlu1 %3332 }
 0x44a   :  { %v3339_v8 = vpop.permute.xlu0 %3338  ;;  %v3352_v25 = vsel %vm3344_vm1, %v3335_v42, %v3337_v16  ;;  %v3351_v18 = vsel %vm3344_vm1, %v3333_v9, %v3335_v42  ;;  %v3348_v42 = vsel %vm3344_vm1, %v8170_v57, %v8200_v34  ;;  %v3345_v57 = vsel %vm3344_vm1, %v8190_v32, %v8188_v40  ;;  %v5965_v40 = vld [vmem:[%s9952_s4 + $0x28] sm:$0xff] }
 0x44b   :  { %v3347_v34 = vsel %vm3344_vm1, %v8186_v10, %v8202_v37 }
 0x44f   :  { %3930 = vrot.lane.b32.xlu2 %v8061_v28, %s6370_s24  ;;  %3922 = vrot.lane.b32.xlu1 %v7986_v33, %s6370_s24 }
 0x450   :  { %3914 = vrot.lane.b32.xlu0 %v8135_v61, %s6370_s24 }
 0x451   :  { %v3315_v0 = vpop.permute.xlu2 %3314  ;;  %v8251_v21 = vpop.permute.xlu1 %3197 }
 0x452   :  { %v3376_v5 = vsel %vm3344_vm1, %v3315_v0, %v3339_v8  ;;  %v3313_v4 = vpop.permute.xlu0 %3312 }
 0x453   :  { %5968 = vmatpush.msk.msra.mxu0 %vm8247_vm13, %v3376_v5  ;;  %v3375_v31 = vsel %vm3344_vm1, %v3313_v4, %v3333_v9  ;;  %v3353_v54 = vsel %vm3344_vm1, %v3337_v16, %v3313_v4  ;;  %v8350_v9 = vsel %vm3278_vm6, 1, %v10633_v38  ;;  %v5966_v5 = vld [vmem:[%s9952_s4 + $0x30] sm:$0xff]  ;;  %vm3944_vm6 = vcmask 15360  }
 0x454   :  { %v3281_v10 = vperm.slane %v8350_v9, 1  ;;  %v3283_v29 = vperm.slane %v8350_v9, 3 }
 0x455   :  { %5969 = vmatpush.msk.msra.mxu0 %vm8247_vm13, %v3375_v31 }
 0x456   :  { %vm8380_vm0 = vcmp.eq.s32.totalorder %v3281_v10, 1  ;;  %vm8470_vm12 = vcmp.eq.s32.totalorder %v3283_v29, 1 }
 0x457   :  { %3924 = vrot.lane.b32.xlu2 %v8056_v22, %s6370_s24  ;;  %3932 = vrot.lane.b32.xlu1 %v8080_v46, %s6370_s24 }
 0x458   :  { %3920 = vrot.lane.b32.xlu0 %v7984_v50, %s6370_s24  ;;  %5970 = vmatpush.msk.msra.mxu0 %vm8247_vm13, %v3374_v52  ;;  %v5967_v52 = vld [vmem:[%s9952_s4 + $0x38] sm:$0xff] }
 0x459   :  { %v3343_v62 = vpop.permute.xlu2 %3342  ;;  %v3341_v35 = vpop.permute.xlu1 %3340 }
 0x45a   :  { %v3356_v49 = vsel %vm3344_vm1, %v3343_v62, %v3315_v0  ;;  %v3354_v20 = vsel %vm3344_vm1, %v3339_v8, %v3341_v35  ;;  %v3355_v39 = vsel %vm3344_vm1, %v3341_v35, %v3343_v62  ;;  %5971 = vmatpush.msk.msra.mxu0 %vm8247_vm13, %v3373_v51  ;;  %v8290_v58 = vpop.permute.xlu0 %3235  ;;  %v3280_v62 = vperm.slane %v8350_v9, 0 }
 0x45b   :  { %5976 = vmatpush.msk.msra.mxu1 %vm8270_vm8, %v3354_v20  ;;  %5984 = vmatpush.msk.msra.mxu2 %vm8274_vm4, %v3355_v39  ;;  %v3282_v35 = vperm.slane %v8350_v9, 2  ;;  %v8485_v9 = vsel %vm3733_vm3, 1, %v10633_v38  ;;  %vm4332_vm3 = vcmask 1031168  }
 0x45c   :  { %5992 = vmatpush.msk.msra.mxu3 %vm8281_vm5, %v3356_v49  ;;  %5972 = vmatmul.msk.f32.vlgmr.msra.gmra.mxu0 %vm3344_vm1, %v5964_v1  ;;  %vm8452_vm14 = vcmp.eq.s32.totalorder %v3280_v62, 1  ;;  %v3307_v62 = vld [vmem:[%s9952_s4 + $0x18] sm:$0xff]  ;;  %v3737_v29 = vperm.slane %v8485_v9, 2 }
 0x45d   :  { %5977 = vmatpush.msk.msra.mxu1 %vm8270_vm8, %v3351_v18  ;;  %5985 = vmatpush.msk.msra.mxu2 %vm8274_vm4, %v3352_v25  ;;  %vm8461_vm10 = vcmp.eq.s32.totalorder %v3282_v35, 1 }
 0x45e   :  { %5993 = vmatpush.msk.msra.mxu3 %vm8281_vm5, %v3353_v54 }
 0x45f   :  { %5986 = vmatpush.msk.msra.mxu2 %vm8274_vm4, %v3349_v19  ;;  %3942 = vrot.lane.b32.xlu2 %v8144_v26, %s6370_s24 }
 0x460   :  { %4324 = vrot.lane.b32.xlu1 %v8083_v53, %s6371_s14  ;;  %4322 = vrot.lane.b32.xlu0 %v8097_v17, %s6371_s14 }
 0x461   :  { %5978 = vmatpush.msk.msra.mxu1 %vm8270_vm8, %v3348_v42  ;;  %5994 = vmatpush.msk.msra.mxu3 %vm8281_vm5, %v3350_v63  ;;  %v8342_v16 = vpop.permute.xlu2 %3221  ;;  %v8347_v23 = vpop.permute.xlu1 %3199 }
 0x462   :  { %5987 = vmatpush.msk.msra.mxu2 %vm8274_vm4, %v3346_v7  ;;  %v8360_v13 = vpop.permute.xlu0 %3223 }
 0x463   :  { %5979 = vmatpush.msk.msra.mxu1 %vm8270_vm8, %v3345_v57  ;;  %5995 = vmatpush.msk.msra.mxu3 %vm8281_vm5, %v3347_v34  ;;  %v3252_v57 = vsel %vm3243_vm7, %v8290_v58, %v8347_v23  ;;  %v3248_v34 = vsel %vm3243_vm7, %v8178_v24, %v8224_v36  ;;  %v3245_v10 = vsel %vm3243_vm7, %v8342_v16, %v8360_v13  ;;  %vm8618_vm8 = vcmp.eq.s32.totalorder %v3737_v29, 1 }
 0x464   :  { %5980 = vmatmul.msk.f32.vlgmr.msra.gmra.mxu1 %vm3344_vm1, %v5964_v1  ;;  %5988 = vmatmul.msk.f32.vlgmr.msra.gmra.mxu2 %vm3344_vm1, %v5964_v1 }
 0x465   :  { %5996 = vmatmul.msk.f32.vlgmr.msra.gmra.mxu3 %vm3344_vm1, %v5964_v1  ;;  %5973 = vmatmul.msk.f32.gmra.mxu0 %vm3344_vm1, %v5965_v40  ;;  %v3304_v1 = vld [vmem:[%s9952_s4] sm:$0xff] }
 0x467   :  { %3926 = vrot.lane.b32.xlu2 %v8007_v47, %s6370_s24 }
 0x468   :  { %4316 = vrot.lane.b32.xlu1 %v8080_v46, %s6371_s14  ;;  %4314 = vrot.lane.b32.xlu0 %v8039_v3, %s6371_s14 }
 0x469   :  { %v3232_v37 = vpop.permute.xlu2 %3231  ;;  %v3238_v8 = vpop.permute.xlu1 %3237 }
 0x46a   :  { %v3253_v6 = vsel %vm3243_vm7, %v3238_v8, %v8222_v2  ;;  %v8386_v43 = vpop.permute.xlu0 %3225  ;;  %v3250_v0 = vsel %vm3243_vm7, %v3232_v37, %v8198_v41  ;;  %v3274_v7 = vsel %vm3243_vm7, %v8347_v23, %v3232_v37  ;;  %v3246_v37 = vsel %vm3243_vm7, %v8360_v13, %v8212_v15 }
 0x46b   :  { %6008 = vmatpush.msk.msrb.mxu1 %vm8380_vm0, %v3253_v6  ;;  %v3247_v4 = vsel %vm3243_vm7, %v8386_v43, %v8178_v24 }
 0x46c   :  { %5981 = vmatmul.msk.f32.gmra.mxu1 %vm3344_vm1, %v5965_v40  ;;  %5989 = vmatmul.msk.f32.gmra.mxu2 %vm3344_vm1, %v5965_v40 }
 0x46d   :  { %6009 = vmatpush.msk.msrb.mxu1 %vm8380_vm0, %v3250_v0  ;;  %5997 = vmatmul.msk.f32.gmra.mxu3 %vm3344_vm1, %v5965_v40  ;;  %v3273_v40 = vsel %vm3243_vm7, %v8251_v21, %v8386_v43  ;;  %v3306_v43 = vld [vmem:[%s9952_s4 + $0x10] sm:$0xff]  ;;  %v3735_v0 = vperm.slane %v8485_v9, 0 }
 0x46e   :  { %5974 = vmatmul.msk.f32.gmra.mxu0 %vm3344_vm1, %v5966_v5 }
 0x46f   :  { %4320 = vrot.lane.b32.xlu2 %v8111_v44, %s6371_s14  ;;  %6010 = vmatpush.msk.msrb.mxu1 %vm8380_vm0, %v3247_v4  ;;  %vm8580_vm13 = vcmp.eq.s32.totalorder %v3735_v0, 1 }
 0x470   :  { %4308 = vrot.lane.b32.xlu1 %v8007_v47, %s6371_s14  ;;  %4306 = vrot.lane.b32.xlu0 %v8012_v59, %s6371_s14 }
 0x471   :  { %v8412_v31 = vpop.permute.xlu2 %3667  ;;  %v3220_v45 = vpop.permute.xlu1 %3219 }
 0x472   :  { %v3244_v56 = vsel %vm3243_vm7, %v3220_v45, %v8342_v16  ;;  %v8416_v60 = vpop.permute.xlu0 %3695  ;;  %v3272_v32 = vsel %vm3243_vm7, %v8212_v15, %v3220_v45 }
 0x473   :  { %6011 = vmatpush.msk.msrb.mxu1 %vm8380_vm0, %v3244_v56 }
 0x474   :  { %5982 = vmatmul.msk.f32.gmra.mxu1 %vm3344_vm1, %v5966_v5  ;;  %5990 = vmatmul.msk.f32.gmra.mxu2 %vm3344_vm1, %v5966_v5 }
 0x475   :  { %5998 = vmatmul.msk.f32.gmra.mxu3 %vm3344_vm1, %v5966_v5  ;;  %v6035_v5 = vld [vmem:[%s9952_s4 + $0x58] sm:$0xff] }
 0x476   :  { %5975 = vmatmul.msk.f32.gmra.mxu0 %vm3344_vm1, %v5967_v52 }
 0x477   :  { %4312 = vrot.lane.b32.xlu2 %v8061_v28, %s6371_s14 }
 0x478   :  { %4300 = vrot.lane.b32.xlu1 %v7984_v50, %s6371_s14  ;;  %4310 = vrot.lane.b32.xlu0 %v8009_v27, %s6371_s14 }
 0x479   :  { %v8433_v12 = vpop.permute.xlu2 %3665  ;;  %v8435_v48 = vpop.permute.xlu1 %3691 }
 0x47a   :  { %v8437_v51 = vpop.permute.xlu0 %3689 }
 0x47c   :  { %5983 = vmatmul.msk.f32.gmra.mxu1 %vm3344_vm1, %v5967_v52  ;;  %5991 = vmatmul.msk.f32.gmra.mxu2 %vm3344_vm1, %v5967_v52 }
 0x47d   :  { %5999 = vmatmul.msk.f32.gmra.mxu3 %vm3344_vm1, %v5967_v52 }
 0x47f   :  { %4304 = vrot.lane.b32.xlu2 %v8056_v22, %s6371_s14 }
 0x480   :  { %4326 = vrot.lane.b32.xlu1 %v8109_v11, %s6371_s14  ;;  %4563 = vrot.lane.b32.xlu0 %v8111_v44, %s6372_s20 }
 0x481   :  { %v8456_v20 = vpop.permute.xlu2 %3663  ;;  %v3202_v39 = vpop.permute.xlu1 %3201 }
 0x482   :  { %v3275_v18 = vsel %vm3243_vm7, %v3202_v39, %v3238_v8  ;;  %v3242_v54 = vpop.permute.xlu0 %3241 }
 0x483   :  { %v3254_v63 = vsel %vm3243_vm7, %v8222_v2, %v3242_v54  ;;  %v3255_v42 = vsel %vm3243_vm7, %v3242_v54, %v3202_v39  ;;  %6000 = vmatpush.msk.msrb.mxu0 %vm8452_vm14, %v3275_v18  ;;  %v3251_v2 = vsel %vm3243_vm7, %v8198_v41, %v8290_v58  ;;  %v3736_v41 = vperm.slane %v8485_v9, 1 }
 0x484   :  { %6012 = vmatmul.msk.f32.vlgmr.msrb.gmra.mxu1 %vm3344_vm1, %v3304_v1  ;;  %6016 = vmatpush.msk.msrb.mxu2 %vm8461_vm10, %v3254_v63  ;;  %v3249_v58 = vsel %vm3243_vm7, %v8224_v36, %v8251_v21  ;;  %v3305_v21 = vld [vmem:[%s9952_s4 + $0x8] sm:$0xff]  ;;  %v3738_v39 = vperm.slane %v8485_v9, 3 }
 0x485   :  { %6024 = vmatpush.msk.msrb.mxu3 %vm8470_vm12, %v3255_v42  ;;  %6001 = vmatpush.msk.msrb.mxu0 %vm8452_vm14, %v3274_v7  ;;  %vm8544_vm9 = vcmp.eq.s32.totalorder %v3736_v41, 1  ;;  %v6032_v41 = vld [vmem:[%s9952_s4 + $0x40] sm:$0xff] }
 0x486   :  { %6017 = vmatpush.msk.msrb.mxu2 %vm8461_vm10, %v3251_v2  ;;  %vm8628_vm4 = vcmp.eq.s32.totalorder %v3738_v39, 1 }
 0x487   :  { %6025 = vmatpush.msk.msrb.mxu3 %vm8470_vm12, %v3252_v57  ;;  %4318 = vrot.lane.b32.xlu2 %v8058_v55, %s6371_s14 }
 0x488   :  { %4302 = vrot.lane.b32.xlu1 %v7986_v33, %s6371_s14  ;;  %4555 = vrot.lane.b32.xlu0 %v8061_v28, %s6372_s20 }
 0x489   :  { %6002 = vmatpush.msk.msrb.mxu0 %vm8452_vm14, %v3273_v40  ;;  %6018 = vmatpush.msk.msrb.mxu2 %vm8461_vm10, %v3248_v34  ;;  %v3694_v24 = vpop.permute.xlu2 %3693  ;;  %v8521_v23 = vpop.permute.xlu1 %3685  ;;  %v3708_v34 = vsel %vm3699_vm15, %v8435_v48, %v8412_v31 }
 0x48a   :  { %6026 = vmatpush.msk.msrb.mxu3 %vm8470_vm12, %v3249_v58  ;;  %v8530_v36 = vpop.permute.xlu0 %3683  ;;  %v3709_v16 = vsel %vm3699_vm15, %v3694_v24, %v8416_v60 }
 0x48b   :  { %6003 = vmatpush.msk.msrb.mxu0 %vm8452_vm14, %v3272_v32  ;;  %6019 = vmatpush.msk.msrb.mxu2 %vm8461_vm10, %v3245_v10  ;;  %v3704_v40 = vsel %vm3699_vm15, %v8530_v36, %v8521_v23  ;;  %v3977_v32 = vsel %vm3277_vm2, 1, %v10633_v38 }
 0x48c   :  { %6027 = vmatpush.msk.msrb.mxu3 %vm8470_vm12, %v3246_v37  ;;  %6004 = vmatmul.msk.f32.vlgmr.msrb.gmra.mxu0 %vm3344_vm1, %v3304_v1  ;;  %v3980_v37 = vperm.slane %v3977_v32, 2 }
 0x48d   :  { %6013 = vmatmul.msk.f32.gmra.mxu1 %vm3344_vm1, %v3305_v21  ;;  %6020 = vmatmul.msk.f32.vlgmr.msrb.gmra.mxu2 %vm3344_vm1, %v3304_v1 }
 0x48e   :  { %6028 = vmatmul.msk.f32.vlgmr.msrb.gmra.mxu3 %vm3344_vm1, %v3304_v1  ;;  %6044 = vmatpush.msk.msra.mxu1 %vm8544_vm9, %v3709_v16  ;;  %v3979_v16 = vperm.slane %v3977_v32, 1  ;;  %vm8727_vm5 = vcmp.eq.s32.totalorder %v3980_v37, 1 }
 0x48f   :  { %4567 = vrot.lane.b32.xlu2 %v8083_v53, %s6372_s20 }
 0x490   :  { %4565 = vrot.lane.b32.xlu1 %v8097_v17, %s6372_s20  ;;  %4330 = vrot.lane.b32.xlu0 %v8135_v61, %s6371_s14  ;;  %vm8731_vm0 = vcmp.eq.s32.totalorder %v3979_v16, 1 }
 0x491   :  { %v3676_v15 = vpop.permute.xlu2 %3675  ;;  %v8562_v13 = vpop.permute.xlu1 %3679 }
 0x492   :  { %v8564_v6 = vpop.permute.xlu0 %3677  ;;  %v3728_v7 = vsel %vm3699_vm15, %v8456_v20, %v3676_v15 }
 0x493   :  { %v3700_v25 = vsel %vm3699_vm15, %v3676_v15, %v8564_v6  ;;  %v3701_v58 = vsel %vm3699_vm15, %v8564_v6, %v8562_v13 }
 0x494   :  { %6005 = vmatmul.msk.f32.gmra.mxu0 %vm3344_vm1, %v3305_v21 }
 0x495   :  { %6014 = vmatmul.msk.f32.gmra.mxu1 %vm3344_vm1, %v3306_v43  ;;  %6021 = vmatmul.msk.f32.gmra.mxu2 %vm3344_vm1, %v3305_v21 }
 0x496   :  { %6029 = vmatmul.msk.f32.gmra.mxu3 %vm3344_vm1, %v3305_v21  ;;  %v6034_v21 = vld [vmem:[%s9952_s4 + $0x50] sm:$0xff] }
 0x497   :  { %4559 = vrot.lane.b32.xlu2 %v8080_v46, %s6372_s20 }
 0x498   :  { %4557 = vrot.lane.b32.xlu1 %v8039_v3, %s6372_s20  ;;  %4547 = vrot.lane.b32.xlu0 %v8056_v22, %s6372_s20 }
 0x499   :  { %v3670_v4 = vpop.permute.xlu2 %3669  ;;  %v3682_v45 = vpop.permute.xlu1 %3681 }
 0x49a   :  { %v3731_v56 = vsel %vm3699_vm15, %v3670_v4, %v3694_v24  ;;  %v3688_v52 = vpop.permute.xlu0 %3687  ;;  %v3703_v1 = vsel %vm3699_vm15, %v3682_v45, %v8530_v36  ;;  %v3729_v18 = vsel %vm3699_vm15, %v8433_v12, %v3682_v45 }
 0x49b   :  { %v3706_v35 = vsel %vm3699_vm15, %v3688_v52, %v8437_v51  ;;  %6036 = vmatpush.msk.msra.mxu0 %vm8580_vm13, %v3731_v56  ;;  %v3730_v49 = vsel %vm3699_vm15, %v8412_v31, %v3688_v52  ;;  %v3981_v56 = vperm.slane %v3977_v32, 3  ;;  %v3978_v52 = vperm.slane %v3977_v32, 0  ;;  %v6070_v32 = vld [vmem:[%s9952_s4 + $0x70] sm:$0xff] }
 0x49c   :  { %6006 = vmatmul.msk.f32.gmra.mxu0 %vm3344_vm1, %v3306_v43  ;;  %6045 = vmatpush.msk.msra.mxu1 %vm8544_vm9, %v3706_v35 }
 0x49d   :  { %6015 = vmatmul.msk.f32.gmra.mxu1 %vm3344_vm1, %v3307_v62  ;;  %6022 = vmatmul.msk.f32.gmra.mxu2 %vm3344_vm1, %v3306_v43  ;;  %vm8763_vm7 = vcmp.eq.s32.totalorder %v3981_v56, 1  ;;  %vm8769_vm14 = vcmp.eq.s32.totalorder %v3978_v52, 1 }
 0x49e   :  { %6030 = vmatmul.msk.f32.gmra.mxu3 %vm3344_vm1, %v3306_v43  ;;  %6037 = vmatpush.msk.msra.mxu0 %vm8580_vm13, %v3730_v49 }
 0x49f   :  { %6046 = vmatpush.msk.msra.mxu1 %vm8544_vm9, %v3703_v1  ;;  %4328 = vrot.lane.b32.xlu2 %v8144_v26, %s6371_s14 }
 0x4a0   :  { %4549 = vrot.lane.b32.xlu1 %v8012_v59, %s6372_s20  ;;  %4561 = vrot.lane.b32.xlu0 %v8058_v55, %s6372_s20 }
 0x4a1   :  { %6038 = vmatpush.msk.msra.mxu0 %vm8580_vm13, %v3729_v18  ;;  %6047 = vmatpush.msk.msra.mxu1 %vm8544_vm9, %v3700_v25  ;;  %v8626_v19 = vpop.permute.xlu2 %3936  ;;  %v3698_v63 = vpop.permute.xlu1 %3697 }
 0x4a2   :  { %v3710_v9 = vsel %vm3699_vm15, %v8416_v60, %v3698_v63  ;;  %v3711_v2 = vsel %vm3699_vm15, %v3698_v63, %v3670_v4  ;;  %v8637_v57 = vpop.permute.xlu0 %3912  ;;  %v3707_v60 = vsel %vm3699_vm15, %v8437_v51, %v8435_v48  ;;  %v3705_v51 = vsel %vm3699_vm15, %v8521_v23, %v8433_v12  ;;  %v6033_v23 = vld [vmem:[%s9952_s4 + $0x48] sm:$0xff] }
 0x4a3   :  { %6039 = vmatpush.msk.msra.mxu0 %vm8580_vm13, %v3728_v7  ;;  %6052 = vmatpush.msk.msra.mxu2 %vm8618_vm8, %v3710_v9  ;;  %v3702_v48 = vsel %vm3699_vm15, %v8562_v13, %v8456_v20  ;;  %v3953_v63 = vsel %vm3944_vm6, %v8626_v19, %v8637_v57  ;;  %vm4612_vm13 = vcmp.lt.s32.totalorder %v8229_v14, 14 }
 0x4a4   :  { %6007 = vmatmul.msk.f32.gmra.mxu0 %vm3344_vm1, %v3307_v62  ;;  %6060 = vmatpush.msk.msra.mxu3 %vm8628_vm4, %v3711_v2 }
 0x4a5   :  { %6023 = vmatmul.msk.f32.gmra.mxu2 %vm3344_vm1, %v3307_v62  ;;  %6048 = vmatmul.msk.f32.vlgmr.msra.gmra.mxu1 %vm3344_vm1, %v6032_v41 }
 0x4a6   :  { %6031 = vmatmul.msk.f32.gmra.mxu3 %vm3344_vm1, %v3307_v62  ;;  %6053 = vmatpush.msk.msra.mxu2 %vm8618_vm8, %v3707_v60 }
 0x4a7   :  { %6061 = vmatpush.msk.msra.mxu3 %vm8628_vm4, %v3708_v34  ;;  %4551 = vrot.lane.b32.xlu2 %v8007_v47, %s6372_s20  ;;  %v6068_v34 = vld [vmem:[%s9952_s4 + $0x60] sm:$0xff] }
 0x4a8   :  { %4553 = vrot.lane.b32.xlu1 %v8009_v27, %s6372_s20  ;;  %4812 = vrot.lane.b32.xlu0 %v8083_v53, %s6373_s9 }
 0x4a9   :  { %6054 = vmatpush.msk.msra.mxu2 %vm8618_vm8, %v3704_v40  ;;  %6062 = vmatpush.msk.msra.mxu3 %vm8628_vm4, %v3705_v51  ;;  %v8678_v31 = vpop.permute.xlu2 %3930  ;;  %v3941_v12 = vpop.permute.xlu1 %3940 }
 0x4aa   :  { %v8686_v24 = vpop.permute.xlu0 %3910 }
 0x4ab   :  { %6055 = vmatpush.msk.msra.mxu2 %vm8618_vm8, %v3701_v58  ;;  %6063 = vmatpush.msk.msra.mxu3 %vm8628_vm4, %v3702_v48  ;;  %v3950_v42 = vsel %vm3944_vm6, %v8678_v31, %v8686_v24  ;;  %vm4613_vm8 = vmand %vm4612_vm13, %vm3277_vm2  ;;  %vm4575_vm2 = vcmask 801792  }
 0x4ac   :  { %6040 = vmatmul.msk.f32.vlgmr.msra.gmra.mxu0 %vm3344_vm1, %v6032_v41 }
 0x4ad   :  { %6049 = vmatmul.msk.f32.gmra.mxu1 %vm3344_vm1, %v6033_v23  ;;  %6056 = vmatmul.msk.f32.vlgmr.msra.gmra.mxu2 %vm3344_vm1, %v6032_v41 }
 0x4ae   :  { %6064 = vmatmul.msk.f32.vlgmr.msra.gmra.mxu3 %vm3344_vm1, %v6032_v41 }
 0x4af   :  { %4543 = vrot.lane.b32.xlu2 %v7984_v50, %s6372_s20 }
 0x4b0   :  { %4573 = vrot.lane.b32.xlu1 %v8135_v61, %s6372_s20  ;;  %4571 = vrot.lane.b32.xlu0 %v8144_v26, %s6372_s20 }
 0x4b1   :  { %v8705_v20 = vpop.permute.xlu2 %3924  ;;  %v8707_v10 = vpop.permute.xlu1 %3934 }
 0x4b2   :  { %v8712_v36 = vpop.permute.xlu0 %3908  ;;  %v3952_v45 = vsel %vm3944_vm6, %v8707_v10, %v8626_v19 }
 0x4b3   :  { %v3947_v9 = vsel %vm3944_vm6, %v8705_v20, %v8712_v36 }
 0x4b4   :  { %6041 = vmatmul.msk.f32.gmra.mxu0 %vm3344_vm1, %v6033_v23 }
 0x4b5   :  { %6050 = vmatmul.msk.f32.gmra.mxu1 %vm3344_vm1, %v6034_v21  ;;  %6057 = vmatmul.msk.f32.gmra.mxu2 %vm3344_vm1, %v6033_v23 }
 0x4b6   :  { %6065 = vmatmul.msk.f32.gmra.mxu3 %vm3344_vm1, %v6033_v23 }
 0x4b7   :  { %4569 = vrot.lane.b32.xlu2 %v8109_v11, %s6372_s20 }
 0x4b8   :  { %4808 = vrot.lane.b32.xlu1 %v8111_v44, %s6373_s9  ;;  %4804 = vrot.lane.b32.xlu0 %v8080_v46, %s6373_s9 }
 0x4b9   :  { %v3943_v15 = vpop.permute.xlu2 %3942  ;;  %v3929_v13 = vpop.permute.xlu1 %3928 }
 0x4ba   :  { %v3955_v43 = vsel %vm3944_vm6, %v3941_v12, %v3943_v15  ;;  %v3939_v0 = vpop.permute.xlu0 %3938  ;;  %v3949_v62 = vsel %vm3944_vm6, %v3929_v13, %v8678_v31 }
 0x4bb   :  { %v3954_v4 = vsel %vm3944_vm6, %v3939_v0, %v3941_v12  ;;  %6088 = vmatpush.msk.msrb.mxu2 %vm8727_vm5, %v3955_v43 }
 0x4bc   :  { %6042 = vmatmul.msk.f32.gmra.mxu0 %vm3344_vm1, %v6034_v21  ;;  %6080 = vmatpush.msk.msrb.mxu1 %vm8731_vm0, %v3954_v4  ;;  %v8933_v4 = vsel %vm3732_vm11, 1, %v10633_v38 }
 0x4bd   :  { %6051 = vmatmul.msk.f32.gmra.mxu1 %vm3344_vm1, %v6035_v5  ;;  %6058 = vmatmul.msk.f32.gmra.mxu2 %vm3344_vm1, %v6034_v21 }
 0x4be   :  { %6066 = vmatmul.msk.f32.gmra.mxu3 %vm3344_vm1, %v6034_v21  ;;  %6089 = vmatpush.msk.msrb.mxu2 %vm8727_vm5, %v3952_v45 }
 0x4bf   :  { %4545 = vrot.lane.b32.xlu2 %v7986_v33, %s6372_s20 }
 0x4c0   :  { %4800 = vrot.lane.b32.xlu1 %v8061_v28, %s6373_s9  ;;  %4796 = vrot.lane.b32.xlu0 %v8007_v47, %s6373_s9 }
 0x4c1   :  { %6090 = vmatpush.msk.msrb.mxu2 %vm8727_vm5, %v3949_v62  ;;  %v3927_v35 = vpop.permute.xlu2 %3926  ;;  %v3923_v29 = vpop.permute.xlu1 %3922 }
 0x4c2   :  { %v3946_v39 = vsel %vm3944_vm6, %v3923_v29, %v8705_v20  ;;  %v3915_v1 = vpop.permute.xlu0 %3914  ;;  %v3974_v51 = vsel %vm3944_vm6, %v8686_v24, %v3927_v35  ;;  %v6069_v24 = vld [vmem:[%s9952_s4 + $0x68] sm:$0xff] }
 0x4c3   :  { %v3956_v18 = vsel %vm3944_vm6, %v3943_v15, %v3915_v1  ;;  %v3976_v54 = vsel %vm3944_vm6, %v3915_v1, %v3939_v0  ;;  %6091 = vmatpush.msk.msrb.mxu2 %vm8727_vm5, %v3946_v39  ;;  %v6071_v15 = vld [vmem:[%s9952_s4 + $0x78] sm:$0xff] }
 0x4c4   :  { %6043 = vmatmul.msk.f32.gmra.mxu0 %vm3344_vm1, %v6035_v5  ;;  %6096 = vmatpush.msk.msrb.mxu3 %vm8763_vm7, %v3956_v18  ;;  %v6125_v18 = vld [vmem:[%s9952_s4 + $0xa8] sm:$0xff] }
 0x4c5   :  { %6059 = vmatmul.msk.f32.gmra.mxu2 %vm3344_vm1, %v6035_v5  ;;  %6072 = vmatpush.msk.msrb.mxu0 %vm8769_vm14, %v3976_v54 }
 0x4c6   :  { %6067 = vmatmul.msk.f32.gmra.mxu3 %vm3344_vm1, %v6035_v5  ;;  %4238 = vmatpush.msra.mxu2 %v8144_v26  ;;  %v6104_v5 = vld [vmem:[%s9952_s4 + $0x80] sm:$0xff] }
 0x4c7   :  { %6097 = vmatpush.msk.msrb.mxu3 %vm8763_vm7, %v3953_v63  ;;  %4810 = vrot.lane.b32.xlu2 %v8097_v17, %s6373_s9 }
 0x4c8   :  { %4239 = vmatpush.msra.mxu2 %v8111_v44  ;;  %4792 = vrot.lane.b32.xlu1 %v8056_v22, %s6373_s9 }
 0x4c9   :  { %4788 = vrot.lane.b32.xlu0 %v7984_v50, %s6373_s9  ;;  %6098 = vmatpush.msk.msrb.mxu3 %vm8763_vm7, %v3950_v42  ;;  %v8802_v19 = vpop.permute.xlu2 %4320  ;;  %v3933_v7 = vpop.permute.xlu1 %3932 }
 0x4ca   :  { %4240 = vmatpush.msra.mxu2 %v8061_v28  ;;  %v3951_v2 = vsel %vm3944_vm6, %v3933_v7, %v8707_v10  ;;  %v3975_v41 = vsel %vm3944_vm6, %v8637_v57, %v3933_v7  ;;  %v3921_v60 = vpop.permute.xlu0 %3920  ;;  %v3948_v57 = vsel %vm3944_vm6, %v3927_v35, %v3929_v13 }
 0x4cb   :  { %6099 = vmatpush.msk.msrb.mxu3 %vm8763_vm7, %v3947_v9  ;;  %6073 = vmatpush.msk.msrb.mxu0 %vm8769_vm14, %v3975_v41  ;;  %v3945_v40 = vsel %vm3944_vm6, %v3921_v60, %v3923_v29  ;;  %v3973_v31 = vsel %vm3944_vm6, %v8712_v36, %v3921_v60  ;;  %v6106_v9 = vld [vmem:[%s9952_s4 + $0x90] sm:$0xff]  ;;  %v4372_v60 = vperm.slane %v8933_v4, 2 }
 0x4cc   :  { %4241 = vmatpush.msra.mxu2 %v8056_v22  ;;  %6081 = vmatpush.msk.msrb.mxu1 %vm8731_vm0, %v3951_v2 }
 0x4cd   :  { %4267 = vmatpush.msra.mxu3 %v8135_v61  ;;  %6092 = vmatmul.msk.f32.vlgmr.msrb.gmra.mxu2 %vm3344_vm1, %v6068_v34  ;;  %vm9042_vm15 = vcmp.eq.s32.totalorder %v4372_v60, 1 }
 0x4ce   :  { %6100 = vmatmul.msk.f32.vlgmr.msrb.gmra.mxu3 %vm3344_vm1, %v6068_v34  ;;  %6074 = vmatpush.msk.msrb.mxu0 %vm8769_vm14, %v3974_v51  ;;  %v4373_v51 = vperm.slane %v8933_v4, 3 }
 0x4cf   :  { %4268 = vmatpush.msra.mxu3 %v8097_v17  ;;  %6082 = vmatpush.msk.msrb.mxu1 %vm8731_vm0, %v3948_v57 }
 0x4d0   :  { %4802 = vrot.lane.b32.xlu2 %v8039_v3, %s6373_s9  ;;  %4816 = vrot.lane.b32.xlu1 %v8144_v26, %s6373_s9  ;;  %vm9053_vm9 = vcmp.eq.s32.totalorder %v4373_v51, 1 }
 0x4d1   :  { %4269 = vmatpush.msra.mxu3 %v8039_v3  ;;  %4814 = vrot.lane.b32.xlu0 %v8109_v11, %s6373_s9  ;;  %v8843_v12 = vpop.permute.xlu2 %4312 }
 0x4d2   :  { %6075 = vmatpush.msk.msrb.mxu0 %vm8769_vm14, %v3973_v31  ;;  %6083 = vmatpush.msk.msrb.mxu1 %vm8731_vm0, %v3945_v40  ;;  %v8849_v48 = vpop.permute.xlu1 %4324  ;;  %v8851_v58 = vpop.permute.xlu0 %4322 }
 0x4d3   :  { %6076 = vmatmul.msk.f32.vlgmr.msrb.gmra.mxu0 %vm3344_vm1, %v6068_v34  ;;  %6084 = vmatmul.msk.f32.vlgmr.msrb.gmra.mxu1 %vm3344_vm1, %v6068_v34 }
 0x4d4   :  { %4180 = vmatpush.msra.mxu0 %v8083_v53  ;;  %4209 = vmatpush.msra.mxu1 %v8109_v11 }
 0x4d5   :  { %4270 = vmatpush.msra.mxu3 %v8012_v59  ;;  %6093 = vmatmul.msk.f32.gmra.mxu2 %vm3344_vm1, %v6069_v24 }
 0x4d6   :  { %6101 = vmatmul.msk.f32.gmra.mxu3 %vm3344_vm1, %v6069_v24  ;;  %4181 = vmatpush.msra.mxu0 %v8080_v46 }
 0x4d7   :  { %4210 = vmatpush.msra.mxu1 %v8058_v55 }
 0x4d8   :  { %4182 = vmatpush.msra.mxu0 %v8007_v47  ;;  %4794 = vrot.lane.b32.xlu2 %v8012_v59, %s6373_s9 }
 0x4d9   :  { %4211 = vmatpush.msra.mxu1 %v8009_v27  ;;  %4806 = vrot.lane.b32.xlu1 %v8058_v55, %s6373_s9  ;;  %v8871_v23 = vpop.permute.xlu2 %4304  ;;  %v8890_v36 = vpop.f32.mrf.mxu0 }
 0x4da   :  { %4183 = vmatpush.msra.mxu0 %v7984_v50  ;;  %4790 = vrot.lane.b32.xlu0 %v7986_v33, %s6373_s9  ;;  %v8876_v20 = vpop.permute.xlu1 %4316  ;;  %v8878_v10 = vpop.permute.xlu0 %4314 }
 0x4db   :  { %4212 = vmatpush.msra.mxu1 %v7986_v33  ;;  %6077 = vmatmul.msk.f32.gmra.mxu0 %vm3344_vm1, %v6069_v24 }
 0x4dc   :  { %6085 = vmatmul.msk.f32.gmra.mxu1 %vm3344_vm1, %v6069_v24 }
 0x4dd   :  { %6094 = vmatmul.msk.f32.gmra.mxu2 %vm3344_vm1, %v6070_v32 }
 0x4de   :  { %6102 = vmatmul.msk.f32.gmra.mxu3 %vm3344_vm1, %v6070_v32 }
 0x4e0   :  { %4818 = vrot.lane.b32.xlu2 %v8135_v61, %s6373_s9 }
 0x4e1   :  { %5055 = vrot.lane.b32.xlu1 %v8083_v53, %s6374_s18  ;;  %v8894_v21 = vpop.f32.mrf.mxu1  ;;  %v8896_v37 = vpop.permute.xlu2 %4318 }
 0x4e2   :  { %5053 = vrot.lane.b32.xlu0 %v8097_v17, %s6374_s18  ;;  %v8900_v16 = vpop.permute.xlu1 %4308  ;;  %v8902_v8 = vpop.permute.xlu0 %4306  ;;  %v4339_v39 = vsel %vm4332_vm3, %v8876_v20, %v8896_v37 }
 0x4e3   :  { %6078 = vmatmul.msk.f32.gmra.mxu0 %vm3344_vm1, %v6070_v32 }
 0x4e4   :  { %6086 = vmatmul.msk.f32.gmra.mxu1 %vm3344_vm1, %v6070_v32 }
 0x4e5   :  { %6095 = vmatmul.msk.f32.gmra.mxu2 %vm3344_vm1, %v6071_v15 }
 0x4e6   :  { %6103 = vmatmul.msk.f32.gmra.mxu3 %vm3344_vm1, %v6071_v15 }
 0x4e7   :  { %v8911_v53 = vpop.f32.mrf.mxu2 }
 0x4e8   :  { %4798 = vrot.lane.b32.xlu2 %v8009_v27, %s6373_s9  ;;  %v8915_v17 = vpop.f32.mrf.mxu3 }
 0x4e9   :  { %5047 = vrot.lane.b32.xlu1 %v8080_v46, %s6374_s18  ;;  %v8919_v13 = vpop.f32.mrf.mxu1  ;;  %v8921_v6 = vpop.permute.xlu2 %4567 }
 0x4ea   :  { %5045 = vrot.lane.b32.xlu0 %v8039_v3, %s6374_s18  ;;  %v8925_v43 = vpop.permute.xlu1 %4300  ;;  %v4311_v0 = vpop.permute.xlu0 %4310  ;;  %v4370_v3 = vperm.slane %v8933_v4, 0 }
 0x4eb   :  { %6079 = vmatmul.msk.f32.gmra.mxu0 %vm3344_vm1, %v6071_v15  ;;  %v8936_v46 = vpop.f32.mrf.mxu0  ;;  %v4336_v25 = vsel %vm4332_vm3, %v8900_v16, %v4311_v0  ;;  %v4337_v34 = vsel %vm4332_vm3, %v4311_v0, %v8843_v12 }
 0x4ec   :  { %6087 = vmatmul.msk.f32.gmra.mxu1 %vm3344_vm1, %v6071_v15  ;;  %vm8952_vm10 = vcmp.eq.s32.totalorder %v4370_v3, 1 }
 0x4ed   :  { %6116 = vmatmul.msk.f32.vlgmr.msra.gmra.mxu2 %vm3344_vm1, %v6104_v5 }
 0x4ee   :  { %6120 = vmatmul.msk.f32.vlgmr.msra.gmra.mxu3 %vm3344_vm1, %v6104_v5 }
 0x4ef   :  { %v8944_v45 = vpop.f32.mrf.mxu2 }
 0x4f0   :  { %5051 = vrot.lane.b32.xlu2 %v8111_v44, %s6374_s18  ;;  %v6105_v44 = vld [vmem:[%s9952_s4 + $0x88] sm:$0xff]  ;;  %v8966_v49 = vpop.f32.mrf.mxu3 }
 0x4f1   :  { %5039 = vrot.lane.b32.xlu1 %v8007_v47, %s6374_s18  ;;  %v8948_v56 = vpop.f32.mrf.mxu1  ;;  %v8950_v52 = vpop.permute.xlu2 %4559 }
 0x4f2   :  { %5061 = vrot.lane.b32.xlu0 %v8135_v61, %s6374_s18  ;;  %v4327_v35 = vpop.permute.xlu1 %4326  ;;  %v8958_v29 = vpop.permute.xlu0 %4563  ;;  %v4371_v61 = vperm.slane %v8933_v4, 1 }
 0x4f3   :  { %6108 = vmatmul.msk.f32.vlgmr.msra.gmra.mxu0 %vm3344_vm1, %v6104_v5  ;;  %v4342_v47 = vsel %vm4332_vm3, %v8849_v48, %v4327_v35  ;;  %v8976_v1 = vpop.f32.mrf.mxu0 }
 0x4f4   :  { %6112 = vmatmul.msk.f32.vlgmr.msra.gmra.mxu1 %vm3344_vm1, %v6104_v5  ;;  %6128 = vmatpush.msk.msrb.mxu0 %vm8952_vm10, %v4342_v47  ;;  %vm8987_vm12 = vcmp.eq.s32.totalorder %v4371_v61, 1 }
 0x4f5   :  { %6117 = vmatmul.msk.f32.gmra.mxu2 %vm3344_vm1, %v6105_v44 }
 0x4f6   :  { %6121 = vmatmul.msk.f32.gmra.mxu3 %vm3344_vm1, %v6105_v44  ;;  %6129 = vmatpush.msk.msrb.mxu0 %vm8952_vm10, %v4339_v39 }
 0x4f7   :  { %v9014_v2 = vpop.f32.mrf.mxu2 }
 0x4f8   :  { %5043 = vrot.lane.b32.xlu2 %v8061_v28, %s6374_s18  ;;  %6130 = vmatpush.msk.msrb.mxu0 %vm8952_vm10, %v4336_v25  ;;  %v9017_v41 = vpop.f32.mrf.mxu3 }
 0x4f9   :  { %5031 = vrot.lane.b32.xlu1 %v7984_v50, %s6374_s18  ;;  %v8993_v54 = vpop.f32.mrf.mxu1  ;;  %v4329_v63 = vpop.permute.xlu2 %4328 }
 0x4fa   :  { %5037 = vrot.lane.b32.xlu0 %v8012_v59, %s6374_s18  ;;  %v4343_v42 = vsel %vm4332_vm3, %v4327_v35, %v4329_v63  ;;  %v4303_v7 = vpop.permute.xlu1 %4302  ;;  %v8998_v28 = vpop.permute.xlu0 %4555  ;;  %v4340_v59 = vsel %vm4332_vm3, %v8896_v37, %v8802_v19 }
 0x4fb   :  { %6109 = vmatmul.msk.f32.gmra.mxu0 %vm3344_vm1, %v6105_v44  ;;  %v4333_v50 = vsel %vm4332_vm3, %v8925_v43, %v4303_v7  ;;  %6136 = vmatpush.msk.msrb.mxu1 %vm8987_vm12, %v4343_v42  ;;  %v9026_v57 = vpop.f32.mrf.mxu0  ;;  %v4334_v40 = vsel %vm4332_vm3, %v4303_v7, %v8871_v23 }
 0x4fc   :  { %6113 = vmatmul.msk.f32.gmra.mxu1 %vm3344_vm1, %v6105_v44  ;;  %6131 = vmatpush.msk.msrb.mxu0 %vm8952_vm10, %v4333_v50  ;;  %vm4820_vm10 = vcmask 785408  }
 0x4fd   :  { %6118 = vmatmul.msk.f32.gmra.mxu2 %vm3344_vm1, %v6106_v9  ;;  %6137 = vmatpush.msk.msrb.mxu1 %vm8987_vm12, %v4340_v59 }
 0x4fe   :  { %6122 = vmatmul.msk.f32.gmra.mxu3 %vm3344_vm1, %v6106_v9 }
 0x4ff   :  { %6138 = vmatpush.msk.msrb.mxu1 %vm8987_vm12, %v4337_v34  ;;  %v9075_v4 = vpop.f32.mrf.mxu2 }
 0x500   :  { %5059 = vrot.lane.b32.xlu2 %v8144_v26, %s6374_s18  ;;  %v9082_v3 = vpop.f32.mrf.mxu3 }
 0x501   :  { %5057 = vrot.lane.b32.xlu1 %v8109_v11, %s6374_s18  ;;  %v9036_v31 = vpop.f32.mrf.mxu1  ;;  %v9038_v24 = vpop.permute.xlu2 %4551  ;;  %6139 = vmatpush.msk.msrb.mxu1 %vm8987_vm12, %v4334_v40  ;;  %v6107_v11 = vld [vmem:[%s9952_s4 + $0x98] sm:$0xff]  ;;  %v6126_v40 = vld [vmem:[%s9952_s4 + $0xb0] sm:$0xff] }
 0x502   :  { %5041 = vrot.lane.b32.xlu0 %v8009_v27, %s6374_s18  ;;  %v9048_v37 = vpop.permute.xlu1 %4565  ;;  %v4331_v26 = vpop.permute.xlu0 %4330  ;;  %v4341_v27 = vsel %vm4332_vm3, %v8802_v19, %v8851_v58  ;;  %v4338_v19 = vsel %vm4332_vm3, %v8843_v12, %v8878_v10  ;;  %v4335_v12 = vsel %vm4332_vm3, %v8871_v23, %v8902_v8 }
 0x503   :  { %6110 = vmatmul.msk.f32.gmra.mxu0 %vm3344_vm1, %v6106_v9  ;;  %v4344_v0 = vsel %vm4332_vm3, %v4329_v63, %v4331_v26  ;;  %v4368_v5 = vsel %vm4332_vm3, %v4331_v26, %v8849_v48  ;;  %v4367_v48 = vsel %vm4332_vm3, %v8851_v58, %v8876_v20  ;;  %v4366_v58 = vsel %vm4332_vm3, %v8878_v10, %v8900_v16 }
 0x504   :  { %6114 = vmatmul.msk.f32.gmra.mxu1 %vm3344_vm1, %v6106_v9  ;;  %6144 = vmatpush.msk.msrb.mxu2 %vm9042_vm15, %v4344_v0  ;;  %v4365_v10 = vsel %vm4332_vm3, %v8902_v8, %v8925_v43  ;;  %v9126_v8 = vsel %vm4613_vm8, 1, %v10633_v38 }
 0x505   :  { %6119 = vmatmul.msk.f32.gmra.mxu2 %vm3344_vm1, %v6107_v11  ;;  %6152 = vmatpush.msk.msrb.mxu3 %vm9053_vm9, %v4368_v5  ;;  %v4615_v43 = vperm.slane %v9126_v8, 0  ;;  %v4616_v15 = vperm.slane %v9126_v8, 1  ;;  %v4617_v0 = vperm.slane %v9126_v8, 2 }
 0x506   :  { %6123 = vmatmul.msk.f32.gmra.mxu3 %vm3344_vm1, %v6107_v11  ;;  %6145 = vmatpush.msk.msrb.mxu2 %vm9042_vm15, %v4341_v27  ;;  %v4618_v27 = vperm.slane %v9126_v8, 3 }
 0x507   :  { %6153 = vmatpush.msk.msrb.mxu3 %vm9053_vm9, %v4367_v48  ;;  %vm9145_vm4 = vcmp.eq.s32.totalorder %v4615_v43, 1  ;;  %vm9211_vm5 = vcmp.eq.s32.totalorder %v4616_v15, 1  ;;  %vm9216_vm0 = vcmp.eq.s32.totalorder %v4617_v0, 1 }
 0x508   :  { %5035 = vrot.lane.b32.xlu2 %v8056_v22, %s6374_s18  ;;  %6146 = vmatpush.msk.msrb.mxu2 %vm9042_vm15, %v4338_v19  ;;  %vm9225_vm7 = vcmp.eq.s32.totalorder %v4618_v27, 1 }
 0x509   :  { %5033 = vrot.lane.b32.xlu1 %v7986_v33, %s6374_s18  ;;  %v9102_v20 = vpop.f32.mrf.mxu0  ;;  %6154 = vmatpush.msk.msrb.mxu3 %vm9053_vm9, %v4366_v58  ;;  %v9106_v22 = vpop.permute.xlu2 %4543  ;;  %v6124_v33 = vld [vmem:[%s9952_s4 + $0xa0] sm:$0xff] }
 0x50a   :  { %v9111_v16 = vpop.f32.mrf.mxu1  ;;  %v9113_v62 = vpop.permute.xlu1 %4557  ;;  %6147 = vmatpush.msk.msrb.mxu2 %vm9042_vm15, %v4335_v12 }
 0x50b   :  { %6111 = vmatmul.msk.f32.gmra.mxu0 %vm3344_vm1, %v6107_v11  ;;  %6155 = vmatpush.msk.msrb.mxu3 %vm9053_vm9, %v4365_v10  ;;  %v9123_v23 = vpop.permute.xlu0 %4547  ;;  %vm5100_vm9 = vmand %vm4612_vm13, %vm3732_vm11  ;;  %vm5063_vm11 = vcmask 769024  }
 0x50c   :  { %6115 = vmatmul.msk.f32.gmra.mxu1 %vm3344_vm1, %v6107_v11 }
 0x50d   :  { %6148 = vmatmul.msk.f32.vlgmr.msrb.gmra.mxu2 %vm3344_vm1, %v6124_v33 }
 0x50e   :  { %6156 = vmatmul.msk.f32.vlgmr.msrb.gmra.mxu3 %vm3344_vm1, %v6124_v33 }
 0x510   :  { %v3622_v35 = vpop.f32.mrf.mxu2  ;;  %5049 = vrot.lane.b32.xlu2 %v8058_v55, %s6374_s18 }
 0x511   :  { %v9135_v44 = vadd.f32 %v3622_v35, %v8911_v53  ;;  %v3651_v47 = vpop.f32.mrf.mxu3  ;;  %v9137_v61 = vpop.f32.mrf.mxu0 }
 0x512   :  { %v9140_v39 = vadd.f32 %v3651_v47, %v8915_v17  ;;  %v4570_v25 = vpop.permute.xlu2 %4569  ;;  %v9152_v53 = vpop.permute.xlu1 %4549 }
 0x513   :  { %6132 = vmatmul.msk.f32.vlgmr.msrb.gmra.mxu0 %vm3344_vm1, %v6124_v33  ;;  %v4585_v55 = vsel %vm4575_vm2, %v8921_v6, %v4570_v25  ;;  %v4562_v42 = vpop.permute.xlu0 %4561  ;;  %v9154_v7 = vpop.f32.mrf.mxu1 }
 0x514   :  { %6140 = vmatmul.msk.f32.vlgmr.msrb.gmra.mxu1 %vm3344_vm1, %v6124_v33  ;;  %6164 = vmatpush.msk.msra.mxu0 %vm9145_vm4, %v4585_v55  ;;  %v4582_v17 = vsel %vm4575_vm2, %v8950_v52, %v4562_v42  ;;  %v6127_v33 = vld [vmem:[%s9952_s4 + $0xb8] sm:$0xff]  ;;  %v4583_v55 = vsel %vm4575_vm2, %v4562_v42, %v8958_v29 }
 0x515   :  { %6149 = vmatmul.msk.f32.gmra.mxu2 %vm3344_vm1, %v6125_v18 }
 0x516   :  { %6157 = vmatmul.msk.f32.gmra.mxu3 %vm3344_vm1, %v6125_v18  ;;  %6165 = vmatpush.msk.msra.mxu0 %vm9145_vm4, %v4582_v17 }
 0x518   :  { %v3625_v9 = vpop.f32.mrf.mxu2 }
 0x519   :  { %v9166_v50 = vadd.f32 %v3625_v9, %v8944_v45  ;;  %v3654_v59 = vpop.f32.mrf.mxu3  ;;  %v9168_v60 = vpop.f32.mrf.mxu0 }
 0x51a   :  { %v9171_v34 = vadd.f32 %v3654_v59, %v8966_v49  ;;  %v9173_v51 = vpop.permute.xlu2 %4545  ;;  %v4554_v32 = vpop.permute.xlu1 %4553 }
 0x51b   :  { %6133 = vmatmul.msk.f32.gmra.mxu0 %vm3344_vm1, %v6125_v18  ;;  %v9179_v26 = vpop.permute.xlu0 %4812  ;;  %v4579_v45 = vsel %vm4575_vm2, %v9038_v24, %v4554_v32  ;;  %v9187_v49 = vpop.f32.mrf.mxu1  ;;  %v4576_v11 = vsel %vm4575_vm2, %v9106_v22, %v9173_v51  ;;  %v4580_v42 = vsel %vm4575_vm2, %v4554_v32, %v8998_v28 }
 0x51c   :  { %6141 = vmatmul.msk.f32.gmra.mxu1 %vm3344_vm1, %v6125_v18  ;;  %6166 = vmatpush.msk.msra.mxu0 %vm9145_vm4, %v4579_v45  ;;  %10676 = vst [vmem:[#allocation17_spill] sm:$0xff] %v9187_v49  ;;  %v4608_v45 = vsel %vm4575_vm2, %v9152_v53, %v9106_v22 }
 0x51d   :  { %6150 = vmatmul.msk.f32.gmra.mxu2 %vm3344_vm1, %v6126_v40 }
 0x51e   :  { %6158 = vmatmul.msk.f32.gmra.mxu3 %vm3344_vm1, %v6126_v40  ;;  %6167 = vmatpush.msk.msra.mxu0 %vm9145_vm4, %v4576_v11  ;;  %v4577_v11 = vsel %vm4575_vm2, %v9173_v51, %v9123_v23 }
 0x520   :  { %v3628_v5 = vpop.f32.mrf.mxu2 }
 0x521   :  { %v9199_v48 = vadd.f32 %v3628_v5, %v9014_v2  ;;  %v3657_v19 = vpop.f32.mrf.mxu3  ;;  %v9201_v58 = vpop.f32.mrf.mxu0  ;;  %v4857_v5 = vsel %vm4612_vm13, 1, %v10633_v38 }
 0x522   :  { %v9204_v12 = vadd.f32 %v3657_v19, %v9017_v41  ;;  %v9206_v10 = vpop.permute.xlu2 %4810  ;;  %v4574_v2 = vpop.permute.xlu1 %4573 }
 0x523   :  { %6134 = vmatmul.msk.f32.gmra.mxu0 %vm3344_vm1, %v6126_v40  ;;  %v4572_v8 = vpop.permute.xlu0 %4571  ;;  %v4611_v41 = vsel %vm4575_vm2, %v4574_v2, %v8921_v6  ;;  %v4584_v6 = vsel %vm4575_vm2, %v8958_v29, %v9048_v37  ;;  %v9249_v17 = vpop.f32.mrf.mxu1  ;;  %v4581_v29 = vsel %vm4575_vm2, %v8998_v28, %v9113_v62 }
 0x524   :  { %6142 = vmatmul.msk.f32.gmra.mxu1 %vm3344_vm1, %v6126_v40  ;;  %v4586_v47 = vsel %vm4575_vm2, %v4570_v25, %v4572_v8  ;;  %v4587_v18 = vsel %vm4575_vm2, %v4572_v8, %v4574_v2  ;;  %6188 = vmatpush.msk.msra.mxu3 %vm9225_vm7, %v4611_v41  ;;  %v4610_v25 = vsel %vm4575_vm2, %v9048_v37, %v8950_v52 }
 0x525   :  { %6151 = vmatmul.msk.f32.gmra.mxu2 %vm3344_vm1, %v6127_v33  ;;  %6172 = vmatpush.msk.msra.mxu1 %vm9211_vm5, %v4586_v47  ;;  %v4609_v52 = vsel %vm4575_vm2, %v9113_v62, %v9038_v24  ;;  %v6160_v62 = vld [vmem:[%s9952_s4 + $0xc0] sm:$0xff] }
 0x526   :  { %6159 = vmatmul.msk.f32.gmra.mxu3 %vm3344_vm1, %v6127_v33  ;;  %6180 = vmatpush.msk.msra.mxu2 %vm9216_vm0, %v4587_v18 }
 0x527   :  { %6173 = vmatpush.msk.msra.mxu1 %vm9211_vm5, %v4583_v55  ;;  %6189 = vmatpush.msk.msra.mxu3 %vm9225_vm7, %v4610_v25 }
 0x528   :  { %v3631_v9 = vpop.f32.mrf.mxu2  ;;  %6181 = vmatpush.msk.msra.mxu2 %vm9216_vm0, %v4584_v6 }
 0x529   :  { %v9257_v59 = vadd.f32 %v3631_v9, %v9075_v4  ;;  %v3660_v40 = vpop.f32.mrf.mxu3  ;;  %6174 = vmatpush.msk.msra.mxu1 %vm9211_vm5, %v4580_v42  ;;  %v9269_v32 = vpop.f32.mrf.mxu0  ;;  %v4578_v4 = vsel %vm4575_vm2, %v9123_v23, %v9152_v53  ;;  %6190 = vmatpush.msk.msra.mxu3 %vm9225_vm7, %v4609_v52  ;;  %v4858_v42 = vperm.slane %v4857_v5, 0  ;;  %v4859_v9 = vperm.slane %v4857_v5, 1 }
 0x52a   :  { %v9267_v37 = vadd.f32 %v3660_v40, %v9082_v3  ;;  %6182 = vmatpush.msk.msra.mxu2 %vm9216_vm0, %v4581_v29  ;;  %v9273_v28 = vpop.permute.xlu2 %4802  ;;  %v9281_v24 = vpop.permute.xlu1 %4808  ;;  %v4860_v52 = vperm.slane %v4857_v5, 2 }
 0x52b   :  { %6135 = vmatmul.msk.f32.gmra.mxu0 %vm3344_vm1, %v6127_v33  ;;  %v9283_v3 = vpop.permute.xlu0 %4804  ;;  %6175 = vmatpush.msk.msra.mxu1 %vm9211_vm5, %v4577_v11  ;;  %v9306_v51 = vpop.f32.mrf.mxu1  ;;  %vm9377_vm3 = vcmp.eq.s32.totalorder %v4858_v42, 1  ;;  %vm9381_vm12 = vcmp.eq.s32.totalorder %v4859_v9, 1 }
 0x52c   :  { %6143 = vmatmul.msk.f32.gmra.mxu1 %vm3344_vm1, %v6127_v33  ;;  %6183 = vmatpush.msk.msra.mxu2 %vm9216_vm0, %v4578_v4  ;;  %v4855_v6 = vsel %vm4820_vm10, %v9206_v10, %v9283_v3  ;;  %vm9396_vm15 = vcmp.eq.s32.totalorder %v4860_v52, 1 }
 0x52d   :  { %6191 = vmatpush.msk.msra.mxu3 %vm9225_vm7, %v4608_v45  ;;  %6184 = vmatmul.msk.f32.vlgmr.msra.gmra.mxu2 %vm3344_vm1, %v6160_v62 }
 0x52e   :  { %6192 = vmatmul.msk.f32.vlgmr.msra.gmra.mxu3 %vm3344_vm1, %v6160_v62 }
 0x530   :  { %v3851_v22 = vpop.f32.mrf.mxu2 }
 0x531   :  { %v9304_v53 = vadd.f32 %v3851_v22, %v9135_v44  ;;  %v3880_v23 = vpop.f32.mrf.mxu3  ;;  %v6161_v44 = vld [vmem:[%s9952_s4 + $0xc8] sm:$0xff]  ;;  %v9324_v33 = vpop.f32.mrf.mxu0 }
 0x532   :  { %v9309_v15 = vadd.f32 %v3880_v23, %v9140_v39  ;;  %v9311_v0 = vpop.permute.xlu2 %4794  ;;  %v9317_v27 = vpop.permute.xlu1 %4800  ;;  %v4861_v39 = vperm.slane %v4857_v5, 3 }
 0x533   :  { %6168 = vmatmul.msk.f32.vlgmr.msra.gmra.mxu0 %vm3344_vm1, %v6160_v62  ;;  %v9319_v19 = vpop.permute.xlu0 %4796  ;;  %v4826_v9 = vsel %vm4820_vm10, %v9317_v27, %v9273_v28 }
 0x534   :  { %6176 = vmatmul.msk.f32.vlgmr.msra.gmra.mxu1 %vm3344_vm1, %v6160_v62  ;;  %vm9332_vm14 = vcmp.eq.s32.totalorder %v4861_v39, 1  ;;  %v4854_v29 = vsel %vm4820_vm10, %v9273_v28, %v9319_v19 }
 0x535   :  { %6185 = vmatmul.msk.f32.gmra.mxu2 %vm3344_vm1, %v6161_v44 }
 0x536   :  { %6193 = vmatmul.msk.f32.gmra.mxu3 %vm3344_vm1, %v6161_v44 }
 0x538   :  { %v3854_v43 = vpop.f32.mrf.mxu2 }
 0x539   :  { %v9330_v2 = vadd.f32 %v3854_v43, %v9166_v50  ;;  %v3883_v8 = vpop.f32.mrf.mxu3  ;;  %v6162_v50 = vld [vmem:[%s9952_s4 + $0xd0] sm:$0xff]  ;;  %v9357_v25 = vpop.f32.mrf.mxu0 }
 0x53a   :  { %v9337_v41 = vadd.f32 %v3883_v8, %v9171_v34  ;;  %v4819_v47 = vpop.permute.xlu2 %4818  ;;  %v9342_v63 = vpop.permute.xlu1 %4792 }
 0x53b   :  { %6169 = vmatmul.msk.f32.gmra.mxu0 %vm3344_vm1, %v6161_v44  ;;  %v4856_v18 = vsel %vm4820_vm10, %v4819_v47, %v9179_v26  ;;  %v9344_v55 = vpop.permute.xlu0 %4788  ;;  %v9352_v34 = vpop.f32.mrf.mxu1 }
 0x53c   :  { %6177 = vmatmul.msk.f32.gmra.mxu1 %vm3344_vm1, %v6161_v44  ;;  %6224 = vmatpush.msk.msrb.mxu3 %vm9332_vm14, %v4856_v18  ;;  %v4853_v45 = vsel %vm4820_vm10, %v9311_v0, %v9344_v55  ;;  %v6198_v18 = vld [vmem:[%s9952_s4 + $0xf0] sm:$0xff] }
 0x53d   :  { %6186 = vmatmul.msk.f32.gmra.mxu2 %vm3344_vm1, %v6162_v50 }
 0x53e   :  { %6194 = vmatmul.msk.f32.gmra.mxu3 %vm3344_vm1, %v6162_v50 }
 0x53f   :  { %6225 = vmatpush.msk.msrb.mxu3 %vm9332_vm14, %v4855_v6 }
 0x540   :  { %v3857_v40 = vpop.f32.mrf.mxu2 }
 0x541   :  { %v9367_v4 = vadd.f32 %v3857_v40, %v9199_v48  ;;  %v3886_v62 = vpop.f32.mrf.mxu3  ;;  %6226 = vmatpush.msk.msrb.mxu3 %vm9332_vm14, %v4854_v29  ;;  %v4823_v40 = vsel %vm4820_vm10, %v9342_v63, %v9311_v0 }
 0x542   :  { %v9375_v11 = vadd.f32 %v3886_v62, %v9204_v12  ;;  %v4799_v22 = vpop.permute.xlu2 %4798  ;;  %v4817_v48 = vpop.permute.xlu1 %4816  ;;  %v6163_v12 = vld [vmem:[%s9952_s4 + $0xd8] sm:$0xff] }
 0x543   :  { %6170 = vmatmul.msk.f32.gmra.mxu0 %vm3344_vm1, %v6162_v50  ;;  %6227 = vmatpush.msk.msrb.mxu3 %vm9332_vm14, %v4853_v45  ;;  %v4815_v44 = vpop.permute.xlu0 %4814  ;;  %v4832_v39 = vsel %vm4820_vm10, %v4817_v48, %v4819_v47  ;;  %v9406_v35 = vpop.f32.mrf.mxu1  ;;  %v4824_v0 = vsel %vm4820_vm10, %v9319_v19, %v4799_v22 }
 0x544   :  { %6178 = vmatmul.msk.f32.gmra.mxu1 %vm3344_vm1, %v6162_v50  ;;  %v4830_v43 = vsel %vm4820_vm10, %v9179_v26, %v4815_v44  ;;  %v4831_v8 = vsel %vm4820_vm10, %v4815_v44, %v4817_v48  ;;  %10691 = vst [vmem:[#allocation37_spill] sm:$0xff] %v9406_v35  ;;  %6216 = vmatpush.msk.msrb.mxu2 %vm9396_vm15, %v4832_v39  ;;  %v9413_v47 = vpop.f32.mrf.mxu0 }
 0x545   :  { %6200 = vmatpush.msk.msrb.mxu0 %vm9377_vm3, %v4830_v43  ;;  %6208 = vmatpush.msk.msrb.mxu1 %vm9381_vm12, %v4831_v8  ;;  %v4829_v26 = vsel %vm4820_vm10, %v9281_v24, %v9206_v10  ;;  %10692 = vst [vmem:[#allocation39_spill] sm:$0xff] %v9413_v47 }
 0x546   :  { %6187 = vmatmul.msk.f32.gmra.mxu2 %vm3344_vm1, %v6163_v12  ;;  %6195 = vmatmul.msk.f32.gmra.mxu3 %vm3344_vm1, %v6163_v12 }
 0x547   :  { %6217 = vmatpush.msk.msrb.mxu2 %vm9396_vm15, %v4829_v26 }
 0x548   :  { %v3860_v50 = vpop.f32.mrf.mxu2 }
 0x549   :  { %v9416_v6 = vadd.f32 %v3860_v50, %v9257_v59  ;;  %v3889_v42 = vpop.f32.mrf.mxu3  ;;  %6218 = vmatpush.msk.msrb.mxu2 %vm9396_vm15, %v4826_v9  ;;  %v6196_v59 = vld [vmem:[%s9952_s4 + $0xe0] sm:$0xff]  ;;  %v9505_v50 = vsel %vm5100_vm9, 1, %v10633_v38  ;;  %vm5580_vm9 = vcmask 8192  }
 0x54a   :  { %v9424_v29 = vadd.f32 %v3889_v42, %v9267_v37  ;;  %v9436_v28 = vpop.permute.xlu2 %5051  ;;  %v5104_v42 = vperm.slane %v9505_v50, 2  ;;  %v5105_v9 = vperm.slane %v9505_v50, 3 }
 0x54b   :  { %6171 = vmatmul.msk.f32.gmra.mxu0 %vm3344_vm1, %v6163_v12  ;;  %v4807_v10 = vpop.permute.xlu1 %4806  ;;  %6219 = vmatpush.msk.msrb.mxu2 %vm9396_vm15, %v4823_v40 }
 0x54c   :  { %6179 = vmatmul.msk.f32.gmra.mxu1 %vm3344_vm1, %v6163_v12  ;;  %v4827_v37 = vsel %vm4820_vm10, %v9283_v3, %v4807_v10  ;;  %v4828_v52 = vsel %vm4820_vm10, %v4807_v10, %v9281_v24  ;;  %v4791_v62 = vpop.permute.xlu0 %4790  ;;  %v4825_v24 = vsel %vm4820_vm10, %v4799_v22, %v9317_v27  ;;  %v6197_v22 = vld [vmem:[%s9952_s4 + $0xe8] sm:$0xff]  ;;  %vm9528_vm13 = vcmp.eq.s32.totalorder %v5104_v42, 1 }
 0x54d   :  { %6201 = vmatpush.msk.msrb.mxu0 %vm9377_vm3, %v4827_v37  ;;  %6209 = vmatpush.msk.msrb.mxu1 %vm9381_vm12, %v4828_v52  ;;  %v4821_v3 = vsel %vm4820_vm10, %v9344_v55, %v4791_v62  ;;  %v4822_v27 = vsel %vm4820_vm10, %v4791_v62, %v9342_v63  ;;  %v6199_v52 = vld [vmem:[%s9952_s4 + $0xf8] sm:$0xff]  ;;  %vm9532_vm8 = vcmp.eq.s32.totalorder %v5105_v9, 1  ;;  %vm10725_vm10 = vcmask 7168  }
 0x54e   :  { %6220 = vmatmul.msk.f32.vlgmr.msrb.gmra.mxu2 %vm3344_vm1, %v6196_v59  ;;  %6228 = vmatmul.msk.f32.vlgmr.msrb.gmra.mxu3 %vm3344_vm1, %v6196_v59 }
 0x54f   :  { %6202 = vmatpush.msk.msrb.mxu0 %vm9377_vm3, %v4824_v0  ;;  %6210 = vmatpush.msk.msrb.mxu1 %vm9381_vm12, %v4825_v24  ;;  %v9602_v0 = vld [vmem:[%s9954_s6 + $0x8] sm:$0xff] }
 0x550   :  { %v9458_v45 = vpop.f32.mrf.mxu0  ;;  %v9460_v48 = vpop.f32.mrf.mxu1  ;;  %10699 = vst [vmem:[#allocation38_spill] sm:$0xff] %v9602_v0 }
 0x551   :  { %v9462_v19 = vpop.f32.mrf.mxu2  ;;  %v9464_v44 = vpop.f32.mrf.mxu3  ;;  %6203 = vmatpush.msk.msrb.mxu0 %vm9377_vm3, %v4821_v3  ;;  %6211 = vmatpush.msk.msrb.mxu1 %vm9381_vm12, %v4822_v27  ;;  %vm10726_vm3 = vmmov %vm10725_vm10 }
 0x552   :  { %v9481_v39 = vpop.permute.xlu2 %5043  ;;  %vm10727_vm12 = vmmov %vm10726_vm3 }
 0x553   :  { %6204 = vmatmul.msk.f32.vlgmr.msrb.gmra.mxu0 %vm3344_vm1, %v6196_v59  ;;  %v9475_v55 = vpop.permute.xlu1 %5055  ;;  %vm10728_vm15 = vmmov %vm10726_vm3 }
 0x554   :  { %6212 = vmatmul.msk.f32.vlgmr.msrb.gmra.mxu1 %vm3344_vm1, %v6196_v59  ;;  %v5054_v12 = vpop.permute.xlu0 %5053 }
 0x556   :  { %6221 = vmatmul.msk.f32.gmra.mxu2 %vm3344_vm1, %v6197_v22  ;;  %6229 = vmatmul.msk.f32.gmra.mxu3 %vm3344_vm1, %v6197_v22 }
 0x558   :  { %v9485_v63 = vpop.f32.mrf.mxu0 }
 0x559   :  { %v9487_v23 = vpop.f32.mrf.mxu1  ;;  %v9489_v5 = vpop.f32.mrf.mxu2 }
 0x55a   :  { %v9491_v43 = vpop.f32.mrf.mxu3  ;;  %v9509_v14 = vpop.permute.xlu2 %5059 }
 0x55b   :  { %6205 = vmatmul.msk.f32.gmra.mxu0 %vm3344_vm1, %v6197_v22  ;;  %v9498_v8 = vpop.permute.xlu1 %5047 }
 0x55c   :  { %6213 = vmatmul.msk.f32.gmra.mxu1 %vm3344_vm1, %v6197_v22  ;;  %v5046_v26 = vpop.permute.xlu0 %5045  ;;  %v5072_v22 = vsel %vm5063_vm11, %v9436_v28, %v5054_v12 }
 0x55e   :  { %6222 = vmatmul.msk.f32.gmra.mxu2 %vm3344_vm1, %v6198_v18  ;;  %6230 = vmatmul.msk.f32.gmra.mxu3 %vm3344_vm1, %v6198_v18 }
 0x560   :  { %v9511_v30 = vpop.f32.mrf.mxu0 }
 0x561   :  { %v9515_v10 = vpop.f32.mrf.mxu1  ;;  %v9517_v59 = vpop.f32.mrf.mxu2 }
 0x562   :  { %v9519_v40 = vpop.f32.mrf.mxu3 }
 0x563   :  { %6206 = vmatmul.msk.f32.gmra.mxu0 %vm3344_vm1, %v6198_v18  ;;  %v9522_v37 = vpop.permute.xlu1 %5039 }
 0x564   :  { %6214 = vmatmul.msk.f32.gmra.mxu1 %vm3344_vm1, %v6198_v18  ;;  %v5062_v62 = vpop.permute.xlu0 %5061  ;;  %v5098_v18 = vsel %vm5063_vm11, %v5054_v12, %v9498_v8  ;;  %v5097_v12 = vsel %vm5063_vm11, %v5046_v26, %v9522_v37 }
 0x565   :  { %v5075_v3 = vsel %vm5063_vm11, %v9509_v14, %v5062_v62  ;;  %v5099_v27 = vsel %vm5063_vm11, %v5062_v62, %v9475_v55 }
 0x566   :  { %6223 = vmatmul.msk.f32.gmra.mxu2 %vm3344_vm1, %v6199_v52  ;;  %6231 = vmatmul.msk.f32.gmra.mxu3 %vm3344_vm1, %v6199_v52 }
 0x567   :  { %6252 = vmatpush.msk.msra.mxu2 %vm9528_vm13, %v5075_v3  ;;  %6260 = vmatpush.msk.msra.mxu3 %vm9532_vm8, %v5099_v27  ;;  %v5069_v3 = vsel %vm5063_vm11, %v9481_v39, %v5046_v26  ;;  %v9562_v27 = vpop.permute.xlu2 %5035 }
 0x568   :  { %v9550_v42 = vpop.f32.mrf.mxu0 }
 0x569   :  { %10697 = vst [vmem:[#allocation24_spill] sm:$0xff] %v9550_v42  ;;  %v9552_v9 = vpop.f32.mrf.mxu1  ;;  %v9554_v62 = vpop.f32.mrf.mxu2  ;;  %6253 = vmatpush.msk.msra.mxu2 %vm9528_vm13, %v5072_v22  ;;  %6261 = vmatpush.msk.msra.mxu3 %vm9532_vm8, %v5098_v18  ;;  %v6375_v42 = vmov 2  }
 0x56a   :  { %10698 = vst [vmem:[#allocation29_spill] sm:$0xff] %v9552_v9  ;;  %v9566_v38 = vpop.f32.mrf.mxu3  ;;  %v9579_v9 = vld [vmem:[%s9952_s4 + $0x100] sm:$0xff]  ;;  %6314 = vset.pattern.permute.xlu1 %v6375_v42  ;;  %6312 = vset.pattern.permute.xlu2 %v6375_v42 }
 0x56b   :  { %6254 = vmatpush.msk.msra.mxu2 %vm9528_vm13, %v5069_v3  ;;  %6262 = vmatpush.msk.msra.mxu3 %vm9532_vm8, %v5097_v12  ;;  %v9572_v22 = vpop.permute.xlu1 %5031  ;;  %v5103_v12 = vperm.slane %v9505_v50, 1 }
 0x56c   :  { %6207 = vmatmul.msk.f32.gmra.mxu0 %vm3344_vm1, %v6199_v52  ;;  %6215 = vmatmul.msk.f32.gmra.mxu1 %vm3344_vm1, %v6199_v52  ;;  %v5038_v18 = vpop.permute.xlu0 %5037  ;;  %v5102_v52 = vperm.slane %v9505_v50, 0  ;;  %v4138_v50 = vadd.f32 %v9464_v44, %v9309_v15  ;;  %v4146_v44 = vadd.f32 %v9519_v40, %v9375_v11  ;;  %v4150_v40 = vadd.f32 %v9566_v38, %v9424_v29 }
 0x56d   :  { %v5066_v26 = vsel %vm5063_vm11, %v9562_v27, %v5038_v18  ;;  %v5096_v3 = vsel %vm5063_vm11, %v5038_v18, %v9572_v22  ;;  %v4137_v18 = vadd.f32 %v9462_v19, %v9304_v53  ;;  %5280 = vperm.xlu1 %6314, %v9602_v0   ;;  %6313 = vset.pattern.permute.xlu0 %v6375_v42  ;;  %v9612_v53 = vld [vmem:[%s9954_s6 + $0x18] sm:$0xff]  ;;  %v9618_v19 = vld [vmem:[%s9954_s6 + $0x10] sm:$0xff]  ;;  %vm9627_vm4 = vcmp.eq.s32.totalorder %v5103_v12, 1 }
 0x56e   :  { %6255 = vmatpush.msk.msra.mxu2 %vm9528_vm13, %v5066_v26  ;;  %6263 = vmatpush.msk.msra.mxu3 %vm9532_vm8, %v5096_v3  ;;  %10700 = vst [vmem:[#allocation40_spill] sm:$0xff] %v9612_v53  ;;  %vm9623_vm2 = vcmp.eq.s32.totalorder %v5102_v52, 1  ;;  %v6233_v52 = vld [vmem:[%s9952_s4 + $0x108] sm:$0xff] }
 0x56f   :  { %6256 = vmatmul.msk.f32.vlgmr.msra.gmra.mxu2 %vm3344_vm1, %v9579_v9  ;;  %6264 = vmatmul.msk.f32.vlgmr.msra.gmra.mxu3 %vm3344_vm1, %v9579_v9  ;;  %v5050_v47 = vpop.permute.xlu2 %5049 }
 0x570   :  { %v9597_v35 = vpop.f32.mrf.mxu0  ;;  %5288 = vperm.xlu2 %6312, %v9612_v53   ;;  %5284 = vperm.xlu0 %6313, %v9618_v19  }
 0x571   :  { %v9607_v24 = vpop.f32.mrf.mxu1  ;;  %v4243_v26 = vpop.f32.mrf.mxu2 }
 0x572   :  { %v9621_v42 = vadd.f32 %v4243_v26, %v4137_v18  ;;  %v4272_v15 = vpop.f32.mrf.mxu3 }
 0x573   :  { %v9631_v0 = vadd.f32 %v4272_v15, %v4138_v50  ;;  %v5058_v53 = vpop.permute.xlu1 %5057  ;;  %v5070_v50 = vsel %vm5063_vm11, %v9498_v8, %v5050_v47 }
 0x574   :  { %v5073_v49 = vsel %vm5063_vm11, %v9475_v55, %v5058_v53  ;;  %v5074_v18 = vsel %vm5063_vm11, %v5058_v53, %v9509_v14  ;;  %v5042_v12 = vpop.permute.xlu0 %5041  ;;  %v5071_v55 = vsel %vm5063_vm11, %v5050_v47, %v9436_v28  ;;  %v4141_v14 = vadd.f32 %v9489_v5, %v9330_v2  ;;  %v9669_v5 = vld [vmem:[%s9954_s6] sm:$0xff] }
 0x575   :  { %6236 = vmatpush.msk.msra.mxu0 %vm9623_vm2, %v5073_v49  ;;  %6244 = vmatpush.msk.msra.mxu1 %vm9627_vm4, %v5074_v18  ;;  %v4142_v49 = vadd.f32 %v9491_v43, %v9337_v41  ;;  %v5067_v47 = vsel %vm5063_vm11, %v9522_v37, %v5042_v12  ;;  %v5068_v28 = vsel %vm5063_vm11, %v5042_v12, %v9481_v39  ;;  %v6234_v18 = vld [vmem:[%s9952_s4 + $0x110] sm:$0xff] }
 0x577   :  { %6257 = vmatmul.msk.f32.gmra.mxu2 %vm3344_vm1, %v6233_v52  ;;  %6265 = vmatmul.msk.f32.gmra.mxu3 %vm3344_vm1, %v6233_v52 }
 0x578   :  { %v9652_v26 = vpop.f32.mrf.mxu0  ;;  %6237 = vmatpush.msk.msra.mxu0 %vm9623_vm2, %v5070_v50  ;;  %6245 = vmatpush.msk.msra.mxu1 %vm9627_vm4, %v5071_v55 }
 0x579   :  { %v9664_v8 = vpop.f32.mrf.mxu1  ;;  %v4246_v2 = vpop.f32.mrf.mxu2  ;;  %5276 = vperm.xlu2 %6312, %v9669_v5  }
 0x57a   :  { %v9672_v53 = vadd.f32 %v4246_v2, %v4141_v14  ;;  %v4275_v15 = vpop.f32.mrf.mxu3  ;;  %6238 = vmatpush.msk.msra.mxu0 %vm9623_vm2, %v5067_v47  ;;  %6246 = vmatpush.msk.msra.mxu1 %vm9627_vm4, %v5068_v28 }
 0x57b   :  { %v9678_v41 = vadd.f32 %v4275_v15, %v4142_v49  ;;  %v5034_v39 = vpop.permute.xlu1 %5033 }
 0x57c   :  { %v5064_v43 = vsel %vm5063_vm11, %v9572_v22, %v5034_v39  ;;  %v5065_v37 = vsel %vm5063_vm11, %v5034_v39, %v9562_v27  ;;  %v4145_v27 = vadd.f32 %v9517_v59, %v9367_v4  ;;  %v4149_v4 = vadd.f32 %v9554_v62, %v9416_v6 }
 0x57d   :  { %6239 = vmatpush.msk.msra.mxu0 %vm9623_vm2, %v5064_v43  ;;  %6247 = vmatpush.msk.msra.mxu1 %vm9627_vm4, %v5065_v37  ;;  %v3565_v59 = vadd.f32 %v9102_v20, %v8890_v36 }
 0x57e   :  { %6240 = vmatmul.msk.f32.vlgmr.msra.gmra.mxu0 %vm3344_vm1, %v9579_v9  ;;  %6248 = vmatmul.msk.f32.vlgmr.msra.gmra.mxu1 %vm3344_vm1, %v9579_v9  ;;  %v6235_v9 = vld [vmem:[%s9952_s4 + $0x118] sm:$0xff] }
 0x57f   :  { %6258 = vmatmul.msk.f32.gmra.mxu2 %vm3344_vm1, %v6234_v18  ;;  %6266 = vmatmul.msk.f32.gmra.mxu3 %vm3344_vm1, %v6234_v18  ;;  %v3892_v15 = vadd.f32 %v9269_v32, %v3565_v59  ;;  %v3568_v32 = vadd.f32 %v9137_v61, %v8936_v46 }
 0x580   :  { %v4191_v22 = vpop.f32.mrf.mxu0 }
 0x581   :  { %v4220_v12 = vpop.f32.mrf.mxu1  ;;  %v4249_v3 = vpop.f32.mrf.mxu2  ;;  %v4135_v36 = vadd.f32 %v9458_v45, %v3892_v15  ;;  %v10708_v15 = vld [vmem:[#allocation24_spill] sm:$0xff] }
 0x582   :  { %v9701_v50 = vadd.f32 %v4249_v3, %v4145_v27  ;;  %v4278_v55 = vpop.f32.mrf.mxu3 }
 0x583   :  { %v9703_v14 = vadd.f32 %v4278_v55, %v4146_v44  ;;  %v4284_v38 = vadd.f32 %v9597_v35, %v4135_v36  ;;  %v10709_v36 = vld [vmem:[#allocation29_spill] sm:$0xff] }
 0x586   :  { %6241 = vmatmul.msk.f32.gmra.mxu0 %vm3344_vm1, %v6233_v52  ;;  %6249 = vmatmul.msk.f32.gmra.mxu1 %vm3344_vm1, %v6233_v52  ;;  %v3594_v52 = vadd.f32 %v9036_v31, %v8894_v21 }
 0x587   :  { %6259 = vmatmul.msk.f32.gmra.mxu2 %vm3344_vm1, %v6235_v9  ;;  %6267 = vmatmul.msk.f32.gmra.mxu3 %vm3344_vm1, %v6235_v9 }
 0x588   :  { %v9714_v11 = vpop.f32.mrf.mxu0  ;;  %v3893_v62 = vadd.f32 %v9249_v17, %v3594_v52  ;;  %v3597_v17 = vadd.f32 %v9111_v16, %v8919_v13 }
 0x589   :  { %v9720_v49 = vpop.f32.mrf.mxu1  ;;  %v4252_v47 = vpop.f32.mrf.mxu2 }
 0x58a   :  { %v9724_v28 = vadd.f32 %v4252_v47, %v4149_v4  ;;  %v4281_v2 = vpop.f32.mrf.mxu3  ;;  %v4136_v20 = vadd.f32 %v9460_v48, %v3893_v62  ;;  %v10705_v47 = vld [vmem:[#allocation17_spill] sm:$0xff] }
 0x58b   :  { %v9727_v6 = vadd.f32 %v4281_v2, %v4150_v40  ;;  %v10706_v2 = vld [vmem:[#allocation39_spill] sm:$0xff] }
 0x58c   :  { %v4285_v21 = vadd.f32 %v9607_v24, %v4136_v20  ;;  %v3897_v24 = vadd.f32 %v9306_v51, %v3597_v17  ;;  %v3600_v51 = vadd.f32 %v9154_v7, %v8948_v56  ;;  %v3574_v56 = vadd.f32 %v9201_v58, %v9026_v57 }
 0x58e   :  { %6242 = vmatmul.msk.f32.gmra.mxu0 %vm3344_vm1, %v6234_v18  ;;  %6250 = vmatmul.msk.f32.gmra.mxu1 %vm3344_vm1, %v6234_v18  ;;  %v3896_v18 = vadd.f32 %v9324_v33, %v3568_v32  ;;  %v4140_v46 = vadd.f32 %v9487_v23, %v3897_v24  ;;  %v3571_v33 = vadd.f32 %v9168_v60, %v8976_v1 }
 0x590   :  { %v4428_v31 = vpop.f32.mrf.mxu0  ;;  %v4139_v27 = vadd.f32 %v9485_v63, %v3896_v18  ;;  %v4289_v16 = vadd.f32 %v9664_v8, %v4140_v46  ;;  %v3900_v55 = vadd.f32 %v9357_v25, %v3571_v33  ;;  %v3901_v8 = vadd.f32 %v9352_v34, %v3600_v51 }
 0x591   :  { %v4527_v29 = vadd.f32 %v4428_v31, %v4284_v38  ;;  %v4457_v39 = vpop.f32.mrf.mxu1  ;;  %v4486_v43 = vpop.f32.mrf.mxu2  ;;  %v3603_v25 = vadd.f32 %v10705_v47, %v8993_v54 }
 0x592   :  { %v4528_v45 = vadd.f32 %v4457_v39, %v4285_v21  ;;  %v4529_v48 = vadd.f32 %v4486_v43, %v9621_v42  ;;  %v4515_v37 = vpop.f32.mrf.mxu3  ;;  %v4288_v13 = vadd.f32 %v9652_v26, %v4139_v27  ;;  %v4144_v1 = vadd.f32 %v9515_v10, %v3901_v8 }
 0x593   :  { %v4530_v35 = vadd.f32 %v4515_v37, %v9631_v0 }
 0x594   :  { %v4293_v4 = vadd.f32 %v4220_v12, %v4144_v1 }
 0x596   :  { %6243 = vmatmul.msk.f32.gmra.mxu0 %vm3344_vm1, %v6235_v9  ;;  %6251 = vmatmul.msk.f32.gmra.mxu1 %vm3344_vm1, %v6235_v9  ;;  %v4143_v9 = vadd.f32 %v9511_v30, %v3900_v55  ;;  %v3904_v30 = vadd.f32 %v10706_v2, %v3574_v56 }
 0x598   :  { %v4431_v61 = vpop.f32.mrf.mxu0  ;;  %v4292_v60 = vadd.f32 %v4191_v22, %v4143_v9  ;;  %v10707_v22 = vld [vmem:[#allocation37_spill] sm:$0xff]  ;;  %v4147_v62 = vadd.f32 %v10708_v15, %v3904_v30 }
 0x599   :  { %v4531_v42 = vadd.f32 %v4431_v61, %v4288_v13  ;;  %v4460_v0 = vpop.f32.mrf.mxu1  ;;  %v4489_v44 = vpop.f32.mrf.mxu2  ;;  %v3905_v12 = vadd.f32 %v10707_v22, %v3603_v25 }
 0x59a   :  { %v4532_v63 = vadd.f32 %v4460_v0, %v4289_v16  ;;  %v4533_v23 = vadd.f32 %v4489_v44, %v9672_v53  ;;  %v4518_v3 = vpop.f32.mrf.mxu3  ;;  %v4296_v58 = vadd.f32 %v9714_v11, %v4147_v62 }
 0x59b   :  { %v4534_v26 = vadd.f32 %v4518_v3, %v9678_v41  ;;  %v4148_v57 = vadd.f32 %v10709_v36, %v3905_v12 }
 0x59d   :  { %v4297_v20 = vadd.f32 %v9720_v49, %v4148_v57 }
 0x5a0   :  { %v4434_v59 = vpop.f32.mrf.mxu0 }
 0x5a1   :  { %v4535_v7 = vadd.f32 %v4434_v59, %v4292_v60  ;;  %v4463_v40 = vpop.f32.mrf.mxu1  ;;  %v4492_v53 = vpop.f32.mrf.mxu2 }
 0x5a2   :  { %v4536_v52 = vadd.f32 %v4463_v40, %v4293_v4  ;;  %v4537_v41 = vadd.f32 %v4492_v53, %v9701_v50  ;;  %v4521_v34 = vpop.f32.mrf.mxu3 }
 0x5a3   :  { %v4538_v10 = vadd.f32 %v4521_v34, %v9703_v14 }
 0x5a8   :  { %v4437_v38 = vpop.f32.mrf.mxu0 }
 0x5a9   :  { %v9772_v54 = vadd.f32 %v4437_v38, %v4296_v58  ;;  %v4466_v21 = vpop.f32.mrf.mxu1  ;;  %v4495_v50 = vpop.f32.mrf.mxu2 }
 0x5aa   :  { %v9774_v31 = vadd.f32 %v4466_v21, %v4297_v20  ;;  %v4541_v32 = vadd.f32 %v4495_v50, %v9724_v28  ;;  %v4524_v14 = vpop.f32.mrf.mxu3 }
 0x5ab   :  { %v4542_v39 = vadd.f32 %v4524_v14, %v9727_v6 }
 0x5b0   :  { %v4673_v43 = vpop.f32.mrf.mxu0 }
 0x5b1   :  { %v9778_v17 = vadd.f32 %v4673_v43, %v4527_v29  ;;  %v4702_v37 = vpop.f32.mrf.mxu1  ;;  %v4731_v18 = vpop.f32.mrf.mxu2 }
 0x5b2   :  { %v9780_v11 = vadd.f32 %v4702_v37, %v4528_v45  ;;  %v4774_v49 = vadd.f32 %v4731_v18, %v4529_v48  ;;  %v4760_v24 = vpop.f32.mrf.mxu3 }
 0x5b3   :  { %v4775_v27 = vadd.f32 %v4760_v24, %v4530_v35 }
 0x5b8   :  { %v4676_v46 = vpop.f32.mrf.mxu0 }
 0x5b9   :  { %v9782_v13 = vadd.f32 %v4676_v46, %v4531_v42  ;;  %v4705_v16 = vpop.f32.mrf.mxu1  ;;  %v4734_v61 = vpop.f32.mrf.mxu2 }
 0x5ba   :  { %v9784_v33 = vadd.f32 %v4705_v16, %v4532_v63  ;;  %v4778_v28 = vadd.f32 %v4734_v61, %v4533_v23  ;;  %v4763_v0 = vpop.f32.mrf.mxu3 }
 0x5bb   :  { %v4779_v6 = vadd.f32 %v4763_v0, %v4534_v26 }
 0x5c0   :  { %v4679_v44 = vpop.f32.mrf.mxu0 }
 0x5c1   :  { %v9786_v29 = vadd.f32 %v4679_v44, %v4535_v7  ;;  %v4708_v51 = vpop.f32.mrf.mxu1  ;;  %v4737_v3 = vpop.f32.mrf.mxu2 }
 0x5c2   :  { %v9788_v45 = vadd.f32 %v4708_v51, %v4536_v52  ;;  %v4782_v48 = vadd.f32 %v4737_v3, %v4537_v41  ;;  %v4766_v55 = vpop.f32.mrf.mxu3 }
 0x5c3   :  { %v4783_v35 = vadd.f32 %v4766_v55, %v4538_v10 }
 0x5c8   :  { %v9790_v9 = vpop.f32.mrf.mxu0 }
 0x5c9   :  { %v4740_v8 = vpop.f32.mrf.mxu2  ;;  %v9792_v1 = vpop.f32.mrf.mxu1 }
 0x5ca   :  { %v4769_v42 = vpop.f32.mrf.mxu3  ;;  %v9814_v38 = vpop.permute.xlu2 %5288  ;;  %v4786_v21 = vadd.f32 %v4740_v8, %v4541_v32 }
 0x5cb   :  { %v4787_v50 = vadd.f32 %v4769_v42, %v4542_v39 }
 0x5d0   :  { %v9794_v60 = vpop.f32.mrf.mxu0 }
 0x5d1   :  { %v4974_v63 = vpop.f32.mrf.mxu2  ;;  %v9796_v26 = vpop.f32.mrf.mxu1 }
 0x5d2   :  { %v5003_v23 = vpop.f32.mrf.mxu3  ;;  %v5017_v44 = vadd.f32 %v4974_v63, %v4774_v49 }
 0x5d3   :  { %v5018_v51 = vadd.f32 %v5003_v23, %v4775_v27 }
 0x5d8   :  { %v9798_v56 = vpop.f32.mrf.mxu0 }
 0x5d9   :  { %v4977_v4 = vpop.f32.mrf.mxu2  ;;  %v9800_v7 = vpop.f32.mrf.mxu1 }
 0x5da   :  { %v5006_v59 = vpop.f32.mrf.mxu3  ;;  %v5021_v37 = vadd.f32 %v4977_v4, %v4778_v28  ;;  %v10712_v4 = vld [vmem:[#allocation38_spill] sm:$0xff] }
 0x5db   :  { %v5022_v18 = vadd.f32 %v5006_v59, %v4779_v6  ;;  %v4784_v59 = vadd.f32 %v9790_v9, %v9772_v54 }
 0x5df   :  { %v5281_v42 = vpop.permute.xlu1 %5280 }
 0x5e0   :  { %v4922_v47 = vpop.f32.mrf.mxu0 }
 0x5e1   :  { %v4980_v40 = vpop.f32.mrf.mxu2  ;;  %v4951_v25 = vpop.f32.mrf.mxu1 }
 0x5e2   :  { %v5009_v53 = vpop.f32.mrf.mxu3  ;;  %v5025_v14 = vadd.f32 %v4980_v40, %v4782_v48  ;;  %v9816_v0 = vpop.permute.xlu0 %5284  ;;  %v4785_v40 = vadd.f32 %v9792_v1, %v9774_v31 }
 0x5e3   :  { %v5026_v43 = vadd.f32 %v5009_v53, %v4783_v35  ;;  %v5277_v53 = vpop.permute.xlu2 %5276 }
 0x5e9   :  { %v4983_v52 = vpop.f32.mrf.mxu2  ;;  %v9802_v30 = vpop.f32.mrf.mxu0 }
 0x5ea   :  { %v5012_v41 = vpop.f32.mrf.mxu3  ;;  %v9804_v10 = vpop.f32.mrf.mxu1  ;;  %v5029_v24 = vadd.f32 %v4983_v52, %v4786_v21 }
 0x5eb   :  { %v5030_v46 = vadd.f32 %v5012_v41, %v4787_v50 }
 0x5f2   :  { %v5218_v34 = vpop.f32.mrf.mxu2  ;;  %v5247_v2 = vpop.f32.mrf.mxu3 }
 0x5f3   :  { %v5261_v6 = vadd.f32 %v5218_v34, %v5017_v44  ;;  %v5262_v8 = vadd.f32 %v5247_v2, %v5018_v51 }
 0x5f5   :  { %v5293_v31 = vadd.f32 %v5277_v53, %v5261_v6  ;;  %v5294_v1 = vadd.f32 %v5277_v53, %v5262_v8  ;;  %v5324_v6 = vld [vmem:[%s9953_s5 + $0x8] sm:$0xff]  ;;  %v5326_v8 = vld [vmem:[%s9953_s5 + $0x18] sm:$0xff] }
 0x5fa   :  { %v5221_v22 = vpop.f32.mrf.mxu2  ;;  %v5250_v12 = vpop.f32.mrf.mxu3 }
 0x5fb   :  { %v9806_v15 = vpop.f32.mrf.mxu0  ;;  %v9808_v62 = vpop.f32.mrf.mxu1  ;;  %v5265_v3 = vadd.f32 %v5221_v22, %v5021_v37  ;;  %v5266_v32 = vadd.f32 %v5250_v12, %v5022_v18  ;;  %v5019_v22 = vadd.f32 %v9798_v56, %v9782_v13  ;;  %v5020_v12 = vadd.f32 %v9800_v7, %v9784_v33  ;;  %v5323_v18 = vld [vmem:[%s9953_s5] sm:$0xff] }
 0x5fc   :  { %10710 = vst [vmem:[#allocation27_spill] sm:$0xff] %v9806_v15  ;;  %v6376_v15 = vmov 3   ;;  %v5015_v13 = vadd.f32 %v9794_v60, %v9778_v17  ;;  %v5016_v33 = vadd.f32 %v9796_v26, %v9780_v11  ;;  %v5309_v11 = vmax.f32 %v5293_v31, 0.0 }
 0x5fd   :  { %10711 = vst [vmem:[#allocation11_spill] sm:$0xff] %v9808_v62  ;;  %6315 = vset.pattern.permute.xlu1 %v6376_v15  ;;  %6317 = vset.pattern.permute.xlu0 %v6376_v15  ;;  %v5297_v34 = vadd.f32 %v5281_v42, %v5265_v3  ;;  %v5298_v2 = vadd.f32 %v5281_v42, %v5266_v32  ;;  %v5310_v26 = vmax.f32 %v5294_v1, 0.0 }
 0x5fe   :  { %5328 = vperm.xlu1 %6315, %v9669_v5   ;;  %5336 = vperm.xlu0 %6317, %v9618_v19  }
 0x5ff   :  { %6316 = vset.pattern.permute.xlu2 %v6376_v15  ;;  %v5023_v15 = vadd.f32 %v4922_v47, %v9786_v29  ;;  %v5313_v56 = vmax.f32 %v5297_v34, 0.0  ;;  %v5314_v7 = vmax.f32 %v5298_v2, 0.0 }
 0x600   :  { %5332 = vperm.xlu2 %6316, %v10712_v4  }
 0x602   :  { %v5224_v36 = vpop.f32.mrf.mxu2  ;;  %v5253_v57 = vpop.f32.mrf.mxu3 }
 0x603   :  { %v9810_v58 = vpop.f32.mrf.mxu0  ;;  %v9812_v20 = vpop.f32.mrf.mxu1  ;;  %v5269_v16 = vadd.f32 %v5224_v36, %v5025_v14  ;;  %v5270_v61 = vadd.f32 %v5253_v57, %v5026_v43  ;;  %v5027_v36 = vadd.f32 %v9802_v30, %v4784_v59  ;;  %v5028_v57 = vadd.f32 %v9804_v10, %v4785_v40  ;;  %v10713_v14 = vld [vmem:[#allocation40_spill] sm:$0xff]  ;;  %v10714_v43 = vld [vmem:[#allocation27_spill] sm:$0xff] }
 0x604   :  { %v5263_v47 = vadd.f32 %v9810_v58, %v5019_v22  ;;  %v5259_v37 = vadd.f32 %v10714_v43, %v5015_v13  ;;  %v10715_v17 = vld [vmem:[#allocation11_spill] sm:$0xff] }
 0x605   :  { %v5301_v63 = vadd.f32 %v9816_v0, %v5269_v16  ;;  %v5302_v23 = vadd.f32 %v9816_v0, %v5270_v61  ;;  %v5260_v60 = vadd.f32 %v10715_v17, %v5016_v33 }
 0x606   :  { %5340 = vperm.xlu1 %6315, %v10713_v14   ;;  %v5295_v16 = vadd.f32 %v5281_v42, %v5263_v47  ;;  %v5291_v3 = vadd.f32 %v5277_v53, %v5259_v37 }
 0x607   :  { %v5317_v54 = vmax.f32 %v5301_v63, 0.0  ;;  %v5318_v9 = vmax.f32 %v5302_v23, 0.0 }
 0x60a   :  { %v5227_v55 = vpop.f32.mrf.mxu2  ;;  %v5256_v62 = vpop.f32.mrf.mxu3 }
 0x60b   :  { %v5273_v39 = vadd.f32 %v5227_v55, %v5029_v24  ;;  %v5274_v48 = vadd.f32 %v5256_v62, %v5030_v46  ;;  %v5166_v35 = vpop.f32.mrf.mxu0  ;;  %v5195_v28 = vpop.f32.mrf.mxu1  ;;  %v5024_v62 = vadd.f32 %v4951_v25, %v9788_v45  ;;  %v5264_v25 = vadd.f32 %v9812_v20, %v5020_v12 }
 0x60c   :  { %v5267_v21 = vadd.f32 %v5166_v35, %v5023_v15  ;;  %v5292_v55 = vadd.f32 %v5277_v53, %v5260_v60  ;;  %v5307_v35 = vmax.f32 %v5291_v3, 0.0 }
 0x60d   :  { %v5305_v49 = vadd.f32 %v9814_v38, %v5273_v39  ;;  %v5306_v27 = vadd.f32 %v9814_v38, %v5274_v48  ;;  %v5268_v50 = vadd.f32 %v5195_v28, %v5024_v62  ;;  %v5296_v61 = vadd.f32 %v5281_v42, %v5264_v25  ;;  %v5599_v42 = vld [vmem:[%s9949_s1 + $0x2] ss:$4 sm:$0xf] }
 0x60e   :  { %v5299_v58 = vadd.f32 %v9816_v0, %v5267_v21  ;;  %v5308_v28 = vmax.f32 %v5292_v55, 0.0  ;;  %vm32_vm5 = vcmp.gt.s32.totalorder %v5599_v42, 0 }
 0x60f   :  { %v5321_v52 = vmax.f32 %v5305_v49, 0.0  ;;  %v5322_v41 = vmax.f32 %v5306_v27, 0.0  ;;  %v5300_v20 = vadd.f32 %v9816_v0, %v5268_v50  ;;  %v6377_v0 = vmov 4  }
 0x610   :  { %v5315_v32 = vmax.f32 %v5299_v58, 0.0  ;;  %6318 = vset.pattern.permute.xlu2 %v6377_v0  ;;  %6319 = vset.pattern.permute.xlu0 %v6377_v0  ;;  %v5312_v48 = vmax.f32 %v5296_v61, 0.0  ;;  %v10716_v49 = vmov 0  }
 0x611   :  { %5425 = vmatpush.msrb.mxu2 %v5321_v52  ;;  %5454 = vmatpush.msrb.mxu3 %v5322_v41  ;;  %v5316_v39 = vmax.f32 %v5300_v20, 0.0  ;;  %v5487_v27 = vsel %vm32_vm5, 1, %v10716_v49 }
 0x612   :  { %5541 = vperm.xlu2 %6318, %v9669_v5   ;;  %6320 = vset.pattern.permute.xlu1 %v6377_v0  ;;  %v5325_v5 = vld [vmem:[%s9953_s5 + $0x10] sm:$0xff]  ;;  %v5490_v23 = vperm.slane %v5487_v27, 2  ;;  %v5491_v59 = vperm.slane %v5487_v27, 3  ;;  %v5488_v52 = vperm.slane %v5487_v27, 0  ;;  %v5489_v41 = vperm.slane %v5487_v27, 1 }
 0x613   :  { %5426 = vmatpush.msrb.mxu2 %v5317_v54  ;;  %5455 = vmatpush.msrb.mxu3 %v5318_v9  ;;  %v5169_v29 = vpop.f32.mrf.mxu0  ;;  %v5198_v45 = vpop.f32.mrf.mxu1 }
 0x614   :  { %v5271_v30 = vadd.f32 %v5169_v29, %v5027_v36  ;;  %v5272_v10 = vadd.f32 %v5198_v45, %v5028_v57  ;;  %vm9883_vm0 = vcmp.eq.s32.totalorder %v5490_v23, 1  ;;  %vm9891_vm7 = vcmp.eq.s32.totalorder %v5488_v52, 1 }
 0x615   :  { %5427 = vmatpush.msrb.mxu2 %v5313_v56  ;;  %5456 = vmatpush.msrb.mxu3 %v5314_v7  ;;  %vm9895_vm14 = vcmp.eq.s32.totalorder %v5489_v41, 1 }
 0x616   :  { %v5303_v24 = vadd.f32 %v9814_v38, %v5271_v30  ;;  %v5304_v46 = vadd.f32 %v9814_v38, %v5272_v10  ;;  %v5311_v38 = vmax.f32 %v5295_v16, 0.0 }
 0x617   :  { %5428 = vmatpush.msrb.mxu2 %v5309_v11  ;;  %5457 = vmatpush.msrb.mxu3 %v5310_v26 }
 0x618   :  { %v5319_v44 = vmax.f32 %v5303_v24, 0.0  ;;  %v5320_v51 = vmax.f32 %v5304_v46, 0.0  ;;  %6276 = vmatmul.msk.f32.vlgmr.msrb.gmra.mxu2 %vm3344_vm1, %v5323_v18  ;;  %6280 = vmatmul.msk.f32.vlgmr.msrb.gmra.mxu3 %vm3344_vm1, %v5323_v18 }
 0x61a   :  { %5367 = vmatpush.msrb.mxu0 %v5319_v44  ;;  %5396 = vmatpush.msrb.mxu1 %v5320_v51 }
 0x61c   :  { %5368 = vmatpush.msrb.mxu0 %v5315_v32  ;;  %5397 = vmatpush.msrb.mxu1 %v5316_v39 }
 0x61e   :  { %5369 = vmatpush.msrb.mxu0 %v5311_v38  ;;  %5398 = vmatpush.msrb.mxu1 %v5312_v48 }
 0x620   :  { %5370 = vmatpush.msrb.mxu0 %v5307_v35  ;;  %5399 = vmatpush.msrb.mxu1 %v5308_v28 }
 0x621   :  { %6268 = vmatmul.msk.f32.vlgmr.msrb.gmra.mxu0 %vm3344_vm1, %v5323_v18  ;;  %6272 = vmatmul.msk.f32.vlgmr.msrb.gmra.mxu1 %vm3344_vm1, %v5323_v18 }
 0x622   :  { %6277 = vmatmul.msk.f32.gmra.mxu2 %vm3344_vm1, %v5324_v6  ;;  %6281 = vmatmul.msk.f32.gmra.mxu3 %vm3344_vm1, %v5324_v6 }
 0x629   :  { %6269 = vmatmul.msk.f32.gmra.mxu0 %vm3344_vm1, %v5324_v6  ;;  %6273 = vmatmul.msk.f32.gmra.mxu1 %vm3344_vm1, %v5324_v6 }
 0x62a   :  { %6278 = vmatmul.msk.f32.gmra.mxu2 %vm3344_vm1, %v5325_v5  ;;  %6282 = vmatmul.msk.f32.gmra.mxu3 %vm3344_vm1, %v5325_v5 }
 0x631   :  { %6270 = vmatmul.msk.f32.gmra.mxu0 %vm3344_vm1, %v5325_v5  ;;  %6274 = vmatmul.msk.f32.gmra.mxu1 %vm3344_vm1, %v5325_v5 }
 0x632   :  { %6279 = vmatmul.msk.f32.gmra.mxu2 %vm3344_vm1, %v5326_v8  ;;  %6283 = vmatmul.msk.f32.gmra.mxu3 %vm3344_vm1, %v5326_v8 }
 0x639   :  { %6271 = vmatmul.msk.f32.gmra.mxu0 %vm3344_vm1, %v5326_v8  ;;  %6275 = vmatmul.msk.f32.gmra.mxu1 %vm3344_vm1, %v5326_v8  ;;  %vm9887_vm1 = vcmp.eq.s32.totalorder %v5491_v59, 1 }
 0x65a   :  { %v5333_v47 = vpop.permute.xlu2 %5332 }
 0x670   :  { %v5329_v63 = vpop.permute.xlu1 %5328  ;;  %v5337_v58 = vpop.permute.xlu0 %5336 }
 0x678   :  { %v5341_v35 = vpop.permute.xlu1 %5340 }
 0x69b   :  { %v5430_v40 = vpop.f32.mrf.mxu2  ;;  %v5459_v53 = vpop.f32.mrf.mxu3 }
 0x69c   :  { %v5431_v34 = vadd.f32 %v5430_v40, %v5329_v63  ;;  %v5460_v2 = vadd.f32 %v5459_v53, %v5329_v63 }
 0x69e   :  { %v5372_v15 = vpop.f32.mrf.mxu0  ;;  %v5401_v62 = vpop.f32.mrf.mxu1  ;;  %v5473_v54 = vmax.f32 %v5431_v34, 0.0  ;;  %v5474_v9 = vmax.f32 %v5460_v2, 0.0 }
 0x69f   :  { %v5373_v31 = vadd.f32 %v5372_v15, %v5329_v63  ;;  %v5402_v1 = vadd.f32 %v5401_v62, %v5329_v63 }
 0x6a0   :  { %v5498_v21 = vsel %vm9883_vm0, %v5473_v54, 0.0  ;;  %v5499_v50 = vsel %vm9887_vm1, %v5474_v9, 0.0 }
 0x6a1   :  { %v5471_v13 = vmax.f32 %v5373_v31, 0.0  ;;  %v5472_v33 = vmax.f32 %v5402_v1, 0.0  ;;  %v5524_v29 = vadd.f32 %v5499_v50, %v5498_v21 }
 0x6a3   :  { %v5496_v45 = vsel %vm9891_vm7, %v5471_v13, 0.0  ;;  %v5497_v56 = vsel %vm9895_vm14, %v5472_v33, 0.0  ;;  %5525 = vadd.xlane.f32.xlu0 %v5524_v29  ;;  %v6378_v13 = vmov 5  }
 0x6a4   :  { %v5512_v7 = vadd.f32 %v5497_v56, %v5496_v45  ;;  %v37_v56 = vld [vmem:[%s9954_s6] sm:$0x1]  ;;  %s6379_s6 = smov [#allocation2]  }
 0x6a5   :  { %v5433_v60 = vpop.f32.mrf.mxu2  ;;  %v5462_v11 = vpop.f32.mrf.mxu3  ;;  %s5587_s0 = sshll.u32 %s6379_s6, 4  ;;  %s5588_s0 = int_to_ptr.vmem [resolvable:$true] %s5587_s0 }
 0x6a6   :  { %v5375_v25 = vpop.f32.mrf.mxu0  ;;  %v5404_v30 = vpop.f32.mrf.mxu1  ;;  %5513 = vadd.xlane.f32.xlu2 %v5512_v7  ;;  %v5434_v3 = vadd.f32 %v5433_v60, %v5333_v47  ;;  %v5463_v55 = vadd.f32 %v5462_v11, %v5333_v47 }
 0x6a7   :  { %v5376_v10 = vadd.f32 %v5375_v25, %v5333_v47  ;;  %v5405_v43 = vadd.f32 %v5404_v30, %v5333_v47  ;;  %v5542_v7 = vpop.permute.xlu2 %5541 }
 0x6a8   :  { %v5477_v28 = vmax.f32 %v5434_v3, 0.0  ;;  %v5478_v6 = vmax.f32 %v5463_v55, 0.0 }
 0x6a9   :  { %v5475_v37 = vmax.f32 %v5376_v10, 0.0  ;;  %v5476_v17 = vmax.f32 %v5405_v43, 0.0 }
 0x6aa   :  { %v5502_v40 = vsel %vm9883_vm0, %v5477_v28, 0.0  ;;  %v5503_v53 = vsel %vm9887_vm1, %v5478_v6, 0.0 }
 0x6ab   :  { %v5500_v26 = vsel %vm9891_vm7, %v5475_v37, 0.0  ;;  %v5501_v18 = vsel %vm9895_vm14, %v5476_v17, 0.0  ;;  %v5527_v62 = vadd.f32 %v5503_v53, %v5502_v40 }
 0x6ac   :  { %v5515_v20 = vadd.f32 %v5501_v18, %v5500_v26 }
 0x6ad   :  { %v5436_v38 = vpop.f32.mrf.mxu2  ;;  %v5465_v48 = vpop.f32.mrf.mxu3 }
 0x6ae   :  { %v5378_v24 = vpop.f32.mrf.mxu0  ;;  %v5407_v46 = vpop.f32.mrf.mxu1  ;;  %5516 = vadd.xlane.f32.xlu1 %v5515_v20  ;;  %v5437_v27 = vadd.f32 %v5436_v38, %v5337_v58  ;;  %v5466_v63 = vadd.f32 %v5465_v48, %v5337_v58 }
 0x6af   :  { %v5379_v16 = vadd.f32 %v5378_v24, %v5337_v58  ;;  %v5408_v61 = vadd.f32 %v5407_v46, %v5337_v58 }
 0x6b0   :  { %v5481_v34 = vmax.f32 %v5437_v27, 0.0  ;;  %v5482_v2 = vmax.f32 %v5466_v63, 0.0 }
 0x6b1   :  { %v5479_v44 = vmax.f32 %v5379_v16, 0.0  ;;  %v5480_v51 = vmax.f32 %v5408_v61, 0.0 }
 0x6b2   :  { %v5506_v9 = vsel %vm9883_vm0, %v5481_v34, 0.0  ;;  %v5507_v31 = vsel %vm9887_vm1, %v5482_v2, 0.0 }
 0x6b3   :  { %v5504_v32 = vsel %vm9891_vm7, %v5479_v44, 0.0  ;;  %v5505_v39 = vsel %vm9895_vm14, %v5480_v51, 0.0  ;;  %v5530_v21 = vadd.f32 %v5507_v31, %v5506_v9 }
 0x6b4   :  { %v5518_v0 = vadd.f32 %v5505_v39, %v5504_v32 }
 0x6b5   :  { %v5468_v54 = vpop.f32.mrf.mxu3 }
 0x6b6   :  { %v5381_v5 = vpop.f32.mrf.mxu0  ;;  %v5410_v8 = vpop.f32.mrf.mxu1  ;;  %5519 = vadd.xlane.f32.xlu2 %v5518_v0  ;;  %v5469_v36 = vadd.f32 %v5468_v54, %v5341_v35 }
 0x6b7   :  { %v5382_v42 = vadd.f32 %v5381_v5, %v5341_v35  ;;  %v5411_v49 = vadd.f32 %v5410_v8, %v5341_v35  ;;  %5545 = vperm.xlu0 %6319, %v10712_v4   ;;  %v5439_v4 = vpop.f32.mrf.mxu2 }
 0x6b8   :  { %v5440_v1 = vadd.f32 %v5439_v4, %v5341_v35  ;;  %v5486_v57 = vmax.f32 %v5469_v36, 0.0 }
 0x6b9   :  { %v5483_v23 = vmax.f32 %v5382_v42, 0.0  ;;  %v5484_v59 = vmax.f32 %v5411_v49, 0.0 }
 0x6ba   :  { %v5485_v50 = vmax.f32 %v5440_v1, 0.0  ;;  %v5511_v29 = vsel %vm9887_vm1, %v5486_v57, 0.0 }
 0x6bb   :  { %v5508_v52 = vsel %vm9891_vm7, %v5483_v23, 0.0  ;;  %v5509_v41 = vsel %vm9895_vm14, %v5484_v59, 0.0 }
 0x6bc   :  { %v5521_v15 = vadd.f32 %v5509_v41, %v5508_v52  ;;  %v5510_v33 = vsel %vm9883_vm0, %v5485_v50, 0.0 }
 0x6bd   :  { %v5533_v45 = vadd.f32 %v5511_v29, %v5510_v33 }
 0x6be   :  { %5522 = vadd.xlane.f32.xlu1 %v5521_v15  ;;  %5528 = vadd.xlane.f32.xlu2 %v5527_v62 }
 0x6bf   :  { %6322 = vset.pattern.permute.xlu0 %v6378_v13 }
 0x6c6   :  { %5531 = vadd.xlane.f32.xlu1 %v5530_v21 }
 0x6ce   :  { %5534 = vadd.xlane.f32.xlu1 %v5533_v45 }
 0x6d6   :  { %5553 = vperm.xlu2 %6318, %v10713_v14  }
 0x6de   :  { %6321 = vset.pattern.permute.xlu2 %v6378_v13 }
 0x6df   :  { %5576 = vperm.xlu2 %6321, %v37_v56  }
 0x6e7   :  { %5549 = vperm.xlu1 %6320, %v9618_v19  }
 0x716   :  { %v5526_v12 = vpop.xlane.xlu0 %5525 }
 0x719   :  { %v5514_v25 = vpop.xlane.xlu2 %5513 }
 0x71a   :  { %v5536_v60 = vsel %vm10726_vm3, %v5514_v25, %v5526_v12 }
 0x71b   :  { %v5556_v26 = vmul.f32 %v5542_v7, %v5536_v60 }
 0x71d   :  { %v5560_v46 = vsel %vm3944_vm6, %v5556_v26, 0.0 }
 0x721   :  { %v5517_v47 = vpop.xlane.xlu1 %5516 }
 0x729   :  { %v5520_v30 = vpop.xlane.xlu2 %5519  ;;  %v5546_v17 = vpop.permute.xlu0 %5545 }
 0x731   :  { %v5523_v22 = vpop.xlane.xlu1 %5522  ;;  %v5529_v43 = vpop.xlane.xlu2 %5528 }
 0x732   :  { %v5537_v37 = vsel %vm10725_vm10, %v5517_v47, %v5529_v43 }
 0x733   :  { %v5557_v11 = vmul.f32 %v5546_v17, %v5537_v37 }
 0x735   :  { %v5561_v19 = vsel %vm3944_vm6, %v5557_v11, 0.0 }
 0x736   :  { %v5562_v44 = vadd.f32 %v5561_v19, %v5560_v46 }
 0x739   :  { %v5532_v10 = vpop.xlane.xlu1 %5531  ;;  %v5554_v58 = vpop.permute.xlu2 %5553 }
 0x73a   :  { %v5538_v24 = vsel %vm10728_vm15, %v5520_v30, %v5532_v10 }
 0x741   :  { %v5535_v14 = vpop.xlane.xlu1 %5534  ;;  %v5577_v6 = vpop.permute.xlu2 %5576 }
 0x742   :  { %v5539_v18 = vsel %vm10727_vm12, %v5523_v22, %v5535_v14 }
 0x743   :  { %v5559_v16 = vmul.f32 %v5554_v58, %v5539_v18 }
 0x745   :  { %v5565_v55 = vsel %vm3944_vm6, %v5559_v16, 0.0 }
 0x759   :  { %v5550_v20 = vpop.permute.xlu1 %5549 }
 0x75a   :  { %v5558_v61 = vmul.f32 %v5550_v20, %v5538_v24 }
 0x75c   :  { %v5563_v51 = vsel %vm3944_vm6, %v5558_v61, 0.0 }
 0x75d   :  { %v5564_v3 = vadd.f32 %v5563_v51, %v5562_v44 }
 0x75f   :  { %v5566_v32 = vadd.f32 %v5565_v55, %v5564_v3 }
 0x761   :  { %v5567_v39 = vrot.slane %v5566_v32, 4 }
 0x763   :  { %v5568_v0 = vadd.f32 %v5567_v39, %v5566_v32 }
 0x765   :  { %v5569_v38 = vrot.slane %v5568_v0, 2 }
 0x767   :  { %v5570_v48 = vadd.f32 %v5569_v38, %v5568_v0 }
 0x769   :  { %v5571_v35 = vrot.slane %v5570_v48, 1 }
 0x76b   :  { %v5572_v28 = vadd.f32 %v5571_v35, %v5570_v48 }
 0x76d   :  { %v5573_v5 = vmul.f32 0.015625, %v5572_v28 }
 0x76f   :  { %v5579_v8 = vadd.f32 %v5577_v6, %v5573_v5 }
 0x771   :  { %5581 = vst.msk [vmem:[#allocation2] sm:$0x1] %vm5580_vm9, %v5579_v8 }
 0x772   :  { %5592 = dma.vmem_to_hbm [thread:$0]  %s5588_s0, 16, %s5590_s3, [#allocation3]  }
 0x773   :  { %6355 = dma.done.wait [#allocation3], 16  }
 0x774   :  { %6356 = vsyncadd [#allocation3], 4294967280 }
 0x775   :  { %5597 = vsyncpa [#allocation3], 1 }

</bundles_post_ra>
